<compile_context>
chip_gen: v7x
topology: tpu7x:2x2x1
jax: 0.10.0
libtpu: 0.0.40
codegen_flags: <defaults>
</compile_context>

<pallas_src>
import functools

import jax
import jax.numpy as jnp
from jax import lax
from jax.experimental import pallas as pl
from jax.experimental.pallas import tpu as pltpu

BN_EPS = 1e-5
LANE = 128
MATMUL_DTYPE = jnp.bfloat16        # MXU operand dtype (f32 accumulation)
MID_DTYPE = jnp.bfloat16           # conv1 activation scratch dtype


def _round_up(v, m):
    return (v + m - 1) // m * m


# ------------------------------ fused kernel ------------------------------- #

def _conv3x3_taps(src_ref, base, we, rows, w_ref, cin):
    """3x3 'same' conv read from a flattened zero-bordered layout.

    `src_ref` rows are row-major positions of a (W+2)-wide padded image with
    channels on lanes.  Tap (dy, dx) is ONE contiguous row-slice starting at
    `base + dy*we + dx` (length `rows`) -- no strided windows, no relayout
    copies.  Returns f32 (rows, Cp).

    * 9*cin <= 512 (stem): single im2col matmul, K = 9*cin.
    * large cin: taps grouped in pairs -> K = 2*cin contractions, filling the
      256-deep MXU on v6e/v7x (neutral on v5e).
    """
    def tap(t):
        dy, dx = divmod(t, 3)
        return src_ref[pl.ds(base + dy * we + dx, rows), :]

    if 9 * cin <= 512:
        # TODO(synk): stem-only path; tap slots are lane-misaligned for tiny
        # Cin -- acceptable (first layer only), see review item on stem input.
        patches = jnp.concatenate([tap(t) for t in range(9)], axis=-1)
        return jnp.dot(patches.astype(MATMUL_DTYPE), w_ref[...],
                       preferred_element_type=jnp.float32)

    acc = jnp.dot(tap(8).astype(MATMUL_DTYPE), w_ref[pl.ds(8 * cin, cin), :],
                  preferred_element_type=jnp.float32)
    for t0 in range(0, 8, 2):
        pair = jnp.concatenate([tap(t0), tap(t0 + 1)], axis=-1)   # K = 2*cin
        acc = acc + jnp.dot(pair.astype(MATMUL_DTYPE),
                            w_ref[pl.ds(t0 * cin, 2 * cin), :],
                            preferred_element_type=jnp.float32)
    return acc


def _basic_block_kernel(*refs, H, W, TH, NT, Cin, Cp, has_shortcut):
    if has_shortcut:
        (x_ref, w1_ref, b1_ref, w2_ref, b2_ref, cmask_ref,
         wsc_ref, bsc_ref, o_ref, mid_ref) = refs
    else:
        (x_ref, w1_ref, b1_ref, w2_ref, b2_ref, cmask_ref,
         o_ref, mid_ref) = refs
        wsc_ref = bsc_ref = None

    we = W + 2
    mr = (TH + 2) * we          # conv1 rows per tile (1-row halo each side)
    orr = TH * we               # output rows per tile (extended columns)

    t = pl.program_id(1)
    h0 = t * TH                 # first output row of this H tile

    # Zero only the thin strips of mid that the bulk store below does not
    # overwrite (no full-scratch zeroing).  Done every step so the kernel is
    # correct under megacore grid sharding.
    zrow8 = jnp.zeros((8, Cp), MID_DTYPE)
    mid_ref[pl.ds(0, 8), :] = zrow8
    mid_ref[pl.ds(mid_ref.shape[0] - 8, 8), :] = zrow8

    # conv1 (+ folded BN1 scale) + BN1 bias + ReLU on the (TH+2, W+2) extended
    # grid.  Junk columns (w >= W) are masked to zero so that, once stored,
    # they serve as conv2's left/right zero padding.
    h1 = _conv3x3_taps(x_ref, h0 * we, we, mr, w1_ref, Cin)
    h1 = jnp.maximum(h1 + b1_ref[...], 0.0) * cmask_ref[...]
    mid_ref[pl.ds(1, mr), :] = h1.astype(MID_DTYPE)

    # Halo rows that fall outside the image are conv2's top/bottom zero pad.
    @pl.when(t == 0)
    def _():
        mid_ref[pl.ds(0, we), :] = jnp.zeros((we, Cp), MID_DTYPE)

    @pl.when(t == NT - 1)
    def _():
        mid_ref[pl.ds(mr - we, we), :] = jnp.zeros((we, Cp), MID_DTYPE)

    # Shortcut branch on the same extended output grid (read from f32 x).
    xs = x_ref[pl.ds((h0 + 2) * we + 1, orr), :]              # (orr, Cin) f32
    if has_shortcut:
        sc = jnp.dot(xs.astype(MATMUL_DTYPE), wsc_ref[...],
                     preferred_element_type=jnp.float32) + bsc_ref[...]
    else:
        sc = xs
        if Cp > Cin:
            # Only hit when Cout is not a multiple of 128 (e.g. 64-ch stage);
            # 128/256/512 stages take the no-pad path.
            sc = jnp.concatenate(
                [sc, jnp.zeros((orr, Cp - Cin), jnp.float32)], axis=-1)

    # conv2 (+ folded BN2 scale) + bias + residual + ReLU, lane-dense store.
    # TODO(synk): emit bf16 output on v5e to halve output HBM bytes.
    h2 = _conv3x3_taps(mid_ref, 0, we, orr, w2_ref, Cp)
    out = jnp.maximum(h2 + b2_ref[...] + sc, 0.0)
    o_ref[...] = out.astype(o_ref.dtype)


# ------------------------------ host wrappers ------------------------------ #

def _fold_bn(gamma, beta, mean, var):
    scale = gamma / jnp.sqrt(var + BN_EPS)
    bias = beta - mean * scale
    return scale.astype(jnp.float32), bias.astype(jnp.float32)


def _pick_tile_h(H, W):
    """H-tile size: second parallel grid axis (v7x megacore) + small per-step
    VMEM; the output block's sublane dim (TH*(W+2)) must stay a multiple of 8."""
    we = W + 2
    for th in (8, 16, 4, 2):
        if H % th == 0 and (th * we) % 8 == 0 and H // th >= 2:
            return th
    return H


def _vmem_limit_bytes():
    # Generation-aware scoped-VMEM cap: ~3/4 of physical (96 MiB on the
    # 128 MiB v5e/v6e, 48 MiB on the 64 MiB v7x); safe 32 MiB fallback.
    default = 32 * 1024 * 1024
    try:
        info_fn = getattr(pltpu, "get_tpu_info", None)
        if info_fn is None:
            return default
        cap = getattr(info_fn(), "vmem_capacity_bytes", None)
        if not cap:
            return default
        return int(min(cap * 3 // 4, 100 * 1024 * 1024))
    except Exception:  # pragma: no cover - defensive, query is best-effort
        return default


def basic_block_forward_nhwc(x_nhwc, params, in_planes, planes, stride=1):
    """Fused Pallas BasicBlock forward.  Input/output NHWC float32."""
    if stride != 1:
        # TODO(synk): strided 3x3 conv / strided 1x1 shortcut not implemented.
        raise NotImplementedError("stride != 1 not supported")

    N, H, W, Cin = x_nhwc.shape
    assert Cin == in_planes
    Cout = planes
    Cp = _round_up(Cout, LANE)                  # lane-dense channel dim
    has_sc = (stride != 1) or (in_planes != planes)

    we = W + 2
    TH = _pick_tile_h(H, W)
    NT = H // TH
    MR = (TH + 2) * we

    # ---- fold BN (inference form) scale into the conv weights (exact) ----
    s1, b1 = _fold_bn(params["bn1_gamma"], params["bn1_beta"],
                      params["bn1_mean"], params["bn1_var"])
    s2, b2 = _fold_bn(params["bn2_gamma"], params["bn2_beta"],
                      params["bn2_mean"], params["bn2_var"])

    w1 = params["w1"] * s1[None, None, None, :]               # (3,3,Cin,Cout)
    w1 = jnp.pad(w1, ((0, 0), (0, 0), (0, 0), (0, Cp - Cout)))
    w1 = w1.reshape(9 * Cin, Cp).astype(MATMUL_DTYPE)

    w2 = params["w2"] * s2[None, None, None, :]               # (3,3,Cout,Cout)
    w2 = jnp.pad(w2, ((0, 0), (0, 0), (0, Cp - Cout), (0, Cp - Cout)))
    w2 = w2.reshape(9 * Cp, Cp).astype(MATMUL_DTYPE)

    b1 = jnp.pad(b1, (0, Cp - Cout)).reshape(1, Cp)
    b2 = jnp.pad(b2, (0, Cp - Cout)).reshape(1, Cp)

    # ---- flattened zero-bordered input layout (2 pad rows / 1 pad col; the
    # extra row lets boundary H-tiles use the same static tap pattern) ----
    xp = jnp.pad(x_nhwc.astype(jnp.float32),
                 ((0, 0), (2, 2), (1, 1), (0, 0)))            # (N, H+4, W+2, Cin)
    xp = xp.reshape(N, (H + 4) * we, Cin)
    NX = _round_up((H + 4) * we + 2, 8)          # +2: last tap's overhang
    xp = jnp.pad(xp, ((0, 0), (0, NX - (H + 4) * we), (0, 0)))

    # {0,1} column mask: zeroes the 2 junk columns of the extended conv1 grid.
    cmask = (jnp.arange(MR, dtype=jnp.int32) % we < W)
    cmask = cmask.astype(jnp.float32).reshape(MR, 1)

    vec_spec = pl.BlockSpec((1, Cp), lambda n, t: (0, 0))
    in_specs = [
        pl.BlockSpec((None, NX, Cin), lambda n, t: (n, 0, 0)),
        pl.BlockSpec((9 * Cin, Cp), lambda n, t: (0, 0)),
        vec_spec,
        pl.BlockSpec((9 * Cp, Cp), lambda n, t: (0, 0)),
        vec_spec,
        pl.BlockSpec((MR, 1), lambda n, t: (0, 0)),
    ]
    args = [xp, w1, b1, w2, b2, cmask]

    if has_sc:
        ssc, bsc = _fold_bn(params["bnsc_gamma"], params["bnsc_beta"],
                            params["bnsc_mean"], params["bnsc_var"])
        wsc = params["wsc"] * ssc[None, :]
        wsc = jnp.pad(wsc, ((0, 0), (0, Cp - Cout))).astype(MATMUL_DTYPE)
        bsc = jnp.pad(bsc, (0, Cp - Cout)).reshape(1, Cp)
        in_specs += [pl.BlockSpec((Cin, Cp), lambda n, t: (0, 0)), vec_spec]
        args += [wsc, bsc]

    # TODO(synk): weight / bias specs are grid-constant -- mark them
    # pipeline_mode=pl.Buffered(1) (or DMA once into scratch) to drop the
    # second pipeline buffer at large Cp.

    mid_rows = _round_up(MR + 2, 8)              # +2: last conv2 tap overhang
    kern = functools.partial(_basic_block_kernel, H=H, W=W, TH=TH, NT=NT,
                             Cin=Cin, Cp=Cp, has_shortcut=has_sc)
    out = pl.pallas_call(
        kern,
        out_shape=jax.ShapeDtypeStruct((N, H * we, Cp), jnp.float32),
        grid=(N, NT),
        in_specs=in_specs,
        out_specs=pl.BlockSpec((None, TH * we, Cp), lambda n, t: (n, t, 0)),
        scratch_shapes=[pltpu.VMEM((mid_rows, Cp), MID_DTYPE)],
        compiler_params=pltpu.CompilerParams(
            dimension_semantics=("parallel", "parallel"),
            vmem_limit_bytes=_vmem_limit_bytes()),
    )(*args)

    # Strip the 2 junk columns and the channel padding.  Fuses with the NCHW
    # transpose in the caller; the junk columns cost 2/(W+2) extra HBM writes
    # in exchange for fully contiguous tap reads / stores inside the kernel.
    return out.reshape(N, H, we, Cp)[:, :, :W, :Cout]


def basic_block_forward(x_nchw, params, in_planes, planes, stride=1):
    """PyTorch-compatible NCHW boundary around the NHWC Pallas kernel."""
    x = jnp.transpose(x_nchw, (0, 2, 3, 1)).astype(jnp.float32)
    out = basic_block_forward_nhwc(x, params, in_planes, planes, stride)
    return jnp.transpose(out, (0, 3, 1, 2))


# ------------------------------- parameters -------------------------------- #

def init_basic_block_params(key, in_planes, planes, stride=1):
    ks = jax.random.split(key, 16)
    p = {
        "w1": 0.1 * jax.random.normal(ks[0], (3, 3, in_planes, planes), jnp.float32),
        "bn1_gamma": 1.0 + 0.1 * jax.random.normal(ks[1], (planes,), jnp.float32),
        "bn1_beta": 0.1 * jax.random.normal(ks[2], (planes,), jnp.float32),
        "bn1_mean": 0.1 * jax.random.normal(ks[3], (planes,), jnp.float32),
        "bn1_var": jax.random.uniform(ks[4], (planes,), jnp.float32, 0.5, 1.5),
        "w2": 0.1 * jax.random.normal(ks[5], (3, 3, planes, planes), jnp.float32),
        "bn2_gamma": 1.0 + 0.1 * jax.random.normal(ks[6], (planes,), jnp.float32),
        "bn2_beta": 0.1 * jax.random.normal(ks[7], (planes,), jnp.float32),
        "bn2_mean": 0.1 * jax.random.normal(ks[8], (planes,), jnp.float32),
        "bn2_var": jax.random.uniform(ks[9], (planes,), jnp.float32, 0.5, 1.5),
    }
    if stride != 1 or in_planes != planes:
        p.update({
            "wsc": 0.1 * jax.random.normal(ks[10], (in_planes, planes), jnp.float32),
            "bnsc_gamma": 1.0 + 0.1 * jax.random.normal(ks[11], (planes,), jnp.float32),
            "bnsc_beta": 0.1 * jax.random.normal(ks[12], (planes,), jnp.float32),
            "bnsc_mean": 0.1 * jax.random.normal(ks[13], (planes,), jnp.float32),
            "bnsc_var": jax.random.uniform(ks[14], (planes,), jnp.float32, 0.5, 1.5),
        })
    return p


# -------------------------------- reference -------------------------------- #

def _ref_forward(x_nchw, params, in_planes, planes):
    def conv(x, w_hwio, one_by_one=False):
        if one_by_one:
            w = params["wsc"].T[:, :, None, None]            # (Cout, Cin, 1, 1)
            pad = ((0, 0), (0, 0))
        else:
            w = jnp.transpose(w_hwio, (3, 2, 0, 1))           # HWIO -> OIHW
            pad = ((1, 1), (1, 1))
        return lax.conv_general_dilated(
            x, w, (1, 1), pad, dimension_numbers=("NCHW", "OIHW", "NCHW"))

    def bn(x, pre):
        s, b = _fold_bn(params[pre + "_gamma"], params[pre + "_beta"],
                        params[pre + "_mean"], params[pre + "_var"])
        return x * s[None, :, None, None] + b[None, :, None, None]

    out = jax.nn.relu(bn(conv(x_nchw, params["w1"]), "bn1"))
    out = bn(conv(out, params["w2"]), "bn2")
    if in_planes != planes:
        out = out + bn(conv(x_nchw, None, one_by_one=True), "bnsc")
    else:
        out = out + x_nchw
    return jax.nn.relu(out)


# ----------------------------------- main ----------------------------------- #

if __name__ == "__main__":
    key = jax.random.PRNGKey(0)
    k_x, k_p, k_x2, k_p2 = jax.random.split(key, 4)

    N, H, W = 2, 16, 16

    # Case 1: channel-expanding block (1x1-conv + BN shortcut branch).
    in_planes, planes = 4, 8
    x = jax.random.normal(k_x, (N, in_planes, H, W), jnp.float32)     # NCHW
    params = init_basic_block_params(k_p, in_planes, planes, stride=1)
    out = jax.block_until_ready(
        basic_block_forward(x, params, in_planes, planes, stride=1))
    ref = jax.block_until_ready(_ref_forward(x, params, in_planes, planes))
    assert out.shape == (N, planes, H, W)
    err = float(jnp.max(jnp.abs(out - ref)))
    # bf16 MXU operands / bf16 mid activations, f32 accumulation & epilogue.
    assert jnp.allclose(out, ref, atol=3e-2, rtol=3e-2), f"max abs err = {err}"

    # Case 2: identity-shortcut block (in_planes == planes).
    in_planes2 = planes2 = 8
    x2 = jax.random.normal(k_x2, (N, in_planes2, H, W), jnp.float32)
    params2 = init_basic_block_params(k_p2, in_planes2, planes2, stride=1)
    out2 = jax.block_until_ready(
        basic_block_forward(x2, params2, in_planes2, planes2, stride=1))
    ref2 = jax.block_until_ready(_ref_forward(x2, params2, in_planes2, planes2))
    assert out2.shape == (N, planes2, H, W)
    err2 = float(jnp.max(jnp.abs(out2 - ref2)))
    assert jnp.allclose(out2, ref2, atol=3e-2, rtol=3e-2), f"max abs err = {err2}"

    print("KERNEL_OK")
</pallas_src>

<mosaic_0001>
module attributes {stable_mosaic.version = 11 : i64} {
  func.func @_basic_block_kernel(%arg0: i32, %arg1: i32, %arg2: memref<1x368x4xf32, #tpu.memory_space<vmem>>, %arg3: memref<36x128xbf16, #tpu.memory_space<vmem>>, %arg4: memref<1x128xf32, #tpu.memory_space<vmem>>, %arg5: memref<1152x128xbf16, #tpu.memory_space<vmem>>, %arg6: memref<1x128xf32, #tpu.memory_space<vmem>>, %arg7: memref<180x1xf32, #tpu.memory_space<vmem>>, %arg8: memref<4x128xbf16, #tpu.memory_space<vmem>>, %arg9: memref<1x128xf32, #tpu.memory_space<vmem>>, %arg10: memref<1x144x128xf32, #tpu.memory_space<vmem>>, %arg11: memref<184x128xbf16, #tpu.memory_space<vmem>>) attributes {dimension_semantics = [#tpu.dimension_semantics<parallel>, #tpu.dimension_semantics<parallel>], iteration_bounds = array<i64: 2, 2>, scalar_prefetch = 0 : i64, scratch_operands = 1 : i64, tpu.core_type = #tpu.core_type<tc>, window_params = [{transform_indices = @transform_0, window_bounds = array<i64: 1, 368, 4>}, {pipeline_mode = #tpu.pipeline_mode<synchronous>, transform_indices = @transform_1, window_bounds = array<i64: 36, 128>}, {pipeline_mode = #tpu.pipeline_mode<synchronous>, transform_indices = @transform_2, window_bounds = array<i64: 1, 128>}, {pipeline_mode = #tpu.pipeline_mode<synchronous>, transform_indices = @transform_3, window_bounds = array<i64: 1152, 128>}, {pipeline_mode = #tpu.pipeline_mode<synchronous>, transform_indices = @transform_4, window_bounds = array<i64: 1, 128>}, {pipeline_mode = #tpu.pipeline_mode<synchronous>, transform_indices = @transform_5, window_bounds = array<i64: 180, 1>}, {pipeline_mode = #tpu.pipeline_mode<synchronous>, transform_indices = @transform_6, window_bounds = array<i64: 4, 128>}, {pipeline_mode = #tpu.pipeline_mode<synchronous>, transform_indices = @transform_7, window_bounds = array<i64: 1, 128>}, {transform_indices = @transform_8, window_bounds = array<i64: 1, 144, 128>}]} {
    %c8_i32 = arith.constant 8 : i32
    %0 = arith.muli %arg1, %c8_i32 : i32
    %cst = arith.constant 0.000000e+00 : bf16
    %1 = vector.broadcast %cst : bf16 to vector<8x128xbf16>
    %c0 = arith.constant 0 : index
    %c0_0 = arith.constant 0 : index
    %2 = vector.load %arg11[%c0, %c0_0] : memref<184x128xbf16, #tpu.memory_space<vmem>>, vector<8x128xbf16>
    tpu.vector_store %arg11[%c0, %c0_0], %1 {strides = array<i32>} : memref<184x128xbf16, #tpu.memory_space<vmem>>, vector<8x128xbf16>,
    %c176 = arith.constant 176 : index
    %c0_1 = arith.constant 0 : index
    %3 = vector.load %arg11[%c176, %c0_1] : memref<184x128xbf16, #tpu.memory_space<vmem>>, vector<8x128xbf16>
    tpu.vector_store %arg11[%c176, %c0_1], %1 {strides = array<i32>} : memref<184x128xbf16, #tpu.memory_space<vmem>>, vector<8x128xbf16>,
    %c18_i32 = arith.constant 18 : i32
    %4 = arith.muli %0, %c18_i32 : i32
    %c0_i32 = arith.constant 0 : i32
    %5 = arith.addi %4, %c0_i32 : i32
    %c0_i32_2 = arith.constant 0 : i32
    %6 = arith.addi %5, %c0_i32_2 : i32
    %c0_3 = arith.constant 0 : index
    %7 = arith.index_cast %6 : i32 to index
    %c0_4 = arith.constant 0 : index
    %8 = vector.load %arg2[%c0_3, %7, %c0_4] : memref<1x368x4xf32, #tpu.memory_space<vmem>>, vector<1x180x4xf32>
    %9 = vector.shape_cast %8 : vector<1x180x4xf32> to vector<180x4xf32>
    %c0_i32_5 = arith.constant 0 : i32
    %10 = arith.addi %4, %c0_i32_5 : i32
    %c1_i32 = arith.constant 1 : i32
    %11 = arith.addi %10, %c1_i32 : i32
    %c0_6 = arith.constant 0 : index
    %12 = arith.index_cast %11 : i32 to index
    %c0_7 = arith.constant 0 : index
    %13 = vector.load %arg2[%c0_6, %12, %c0_7] : memref<1x368x4xf32, #tpu.memory_space<vmem>>, vector<1x180x4xf32>
    %14 = vector.shape_cast %13 : vector<1x180x4xf32> to vector<180x4xf32>
    %c0_i32_8 = arith.constant 0 : i32
    %15 = arith.addi %4, %c0_i32_8 : i32
    %c2_i32 = arith.constant 2 : i32
    %16 = arith.addi %15, %c2_i32 : i32
    %c0_9 = arith.constant 0 : index
    %17 = arith.index_cast %16 : i32 to index
    %c0_10 = arith.constant 0 : index
    %18 = vector.load %arg2[%c0_9, %17, %c0_10] : memref<1x368x4xf32, #tpu.memory_space<vmem>>, vector<1x180x4xf32>
    %19 = vector.shape_cast %18 : vector<1x180x4xf32> to vector<180x4xf32>
    %c18_i32_11 = arith.constant 18 : i32
    %20 = arith.addi %4, %c18_i32_11 : i32
    %c0_i32_12 = arith.constant 0 : i32
    %21 = arith.addi %20, %c0_i32_12 : i32
    %c0_13 = arith.constant 0 : index
    %22 = arith.index_cast %21 : i32 to index
    %c0_14 = arith.constant 0 : index
    %23 = vector.load %arg2[%c0_13, %22, %c0_14] : memref<1x368x4xf32, #tpu.memory_space<vmem>>, vector<1x180x4xf32>
    %24 = vector.shape_cast %23 : vector<1x180x4xf32> to vector<180x4xf32>
    %c18_i32_15 = arith.constant 18 : i32
    %25 = arith.addi %4, %c18_i32_15 : i32
    %c1_i32_16 = arith.constant 1 : i32
    %26 = arith.addi %25, %c1_i32_16 : i32
    %c0_17 = arith.constant 0 : index
    %27 = arith.index_cast %26 : i32 to index
    %c0_18 = arith.constant 0 : index
    %28 = vector.load %arg2[%c0_17, %27, %c0_18] : memref<1x368x4xf32, #tpu.memory_space<vmem>>, vector<1x180x4xf32>
    %29 = vector.shape_cast %28 : vector<1x180x4xf32> to vector<180x4xf32>
    %c18_i32_19 = arith.constant 18 : i32
    %30 = arith.addi %4, %c18_i32_19 : i32
    %c2_i32_20 = arith.constant 2 : i32
    %31 = arith.addi %30, %c2_i32_20 : i32
    %c0_21 = arith.constant 0 : index
    %32 = arith.index_cast %31 : i32 to index
    %c0_22 = arith.constant 0 : index
    %33 = vector.load %arg2[%c0_21, %32, %c0_22] : memref<1x368x4xf32, #tpu.memory_space<vmem>>, vector<1x180x4xf32>
    %34 = vector.shape_cast %33 : vector<1x180x4xf32> to vector<180x4xf32>
    %c36_i32 = arith.constant 36 : i32
    %35 = arith.addi %4, %c36_i32 : i32
    %c0_i32_23 = arith.constant 0 : i32
    %36 = arith.addi %35, %c0_i32_23 : i32
    %c0_24 = arith.constant 0 : index
    %37 = arith.index_cast %36 : i32 to index
    %c0_25 = arith.constant 0 : index
    %38 = vector.load %arg2[%c0_24, %37, %c0_25] : memref<1x368x4xf32, #tpu.memory_space<vmem>>, vector<1x180x4xf32>
    %39 = vector.shape_cast %38 : vector<1x180x4xf32> to vector<180x4xf32>
    %c36_i32_26 = arith.constant 36 : i32
    %40 = arith.addi %4, %c36_i32_26 : i32
    %c1_i32_27 = arith.constant 1 : i32
    %41 = arith.addi %40, %c1_i32_27 : i32
    %c0_28 = arith.constant 0 : index
    %42 = arith.index_cast %41 : i32 to index
    %c0_29 = arith.constant 0 : index
    %43 = vector.load %arg2[%c0_28, %42, %c0_29] : memref<1x368x4xf32, #tpu.memory_space<vmem>>, vector<1x180x4xf32>
    %44 = vector.shape_cast %43 : vector<1x180x4xf32> to vector<180x4xf32>
    %c36_i32_30 = arith.constant 36 : i32
    %45 = arith.addi %4, %c36_i32_30 : i32
    %c2_i32_31 = arith.constant 2 : i32
    %46 = arith.addi %45, %c2_i32_31 : i32
    %c0_32 = arith.constant 0 : index
    %47 = arith.index_cast %46 : i32 to index
    %c0_33 = arith.constant 0 : index
    %48 = vector.load %arg2[%c0_32, %47, %c0_33] : memref<1x368x4xf32, #tpu.memory_space<vmem>>, vector<1x180x4xf32>
    %49 = vector.shape_cast %48 : vector<1x180x4xf32> to vector<180x4xf32>
    %50 = tpu.concatenate %9, %14, %19, %24, %29, %34, %39, %44, %49 in 1 : vector<180x4xf32>, vector<180x4xf32>, vector<180x4xf32>, vector<180x4xf32>, vector<180x4xf32>, vector<180x4xf32>, vector<180x4xf32>, vector<180x4xf32>, vector<180x4xf32> -> vector<180x36xf32>
    %51 = arith.truncf %50 : vector<180x36xf32> to vector<180x36xbf16>
    %c0_34 = arith.constant 0 : index
    %c0_35 = arith.constant 0 : index
    %52 = vector.load %arg3[%c0_34, %c0_35] : memref<36x128xbf16, #tpu.memory_space<vmem>>, vector<36x128xbf16>
    %cst_36 = arith.constant dense<0.000000e+00> : vector<180x128xf32>
    %53 = tpu.matmul %51, %52, %cst_36 {dimension_numbers = #tpu.dot_dimension_numbers<[1], [0], [0], [1], [0, 0, 1, 1], [], []>} : vector<180x36xbf16>, vector<36x128xbf16>, vector<180x128xf32> -> vector<180x128xf32>
    %c0_37 = arith.constant 0 : index
    %c0_38 = arith.constant 0 : index
    %54 = vector.load %arg4[%c0_37, %c0_38] : memref<1x128xf32, #tpu.memory_space<vmem>>, vector<1x128xf32>
    %55 = vector.broadcast %54 : vector<1x128xf32> to vector<180x128xf32>
    %56 = arith.addf %53, %55 : vector<180x128xf32>
    %cst_39 = arith.constant 0.000000e+00 : f32
    %57 = vector.broadcast %cst_39 : f32 to vector<180x128xf32>
    %58 = arith.maximumf %56, %57 : vector<180x128xf32>
    %c0_40 = arith.constant 0 : index
    %c0_41 = arith.constant 0 : index
    %59 = vector.load %arg7[%c0_40, %c0_41] : memref<180x1xf32, #tpu.memory_space<vmem>>, vector<180x1xf32>
    %60 = vector.broadcast %59 : vector<180x1xf32> to vector<180x128xf32>
    %61 = arith.mulf %58, %60 : vector<180x128xf32>
    %62 = arith.truncf %61 : vector<180x128xf32> to vector<180x128xbf16>
    %c1 = arith.constant 1 : index
    %c0_42 = arith.constant 0 : index
    %63 = vector.load %arg11[%c1, %c0_42] : memref<184x128xbf16, #tpu.memory_space<vmem>>, vector<180x128xbf16>
    tpu.vector_store %arg11[%c1, %c0_42], %62 {strides = array<i32>} : memref<184x128xbf16, #tpu.memory_space<vmem>>, vector<180x128xbf16>,
    %c0_i32_43 = arith.constant 0 : i32
    %64 = arith.cmpi eq, %arg1, %c0_i32_43 : i32
    %65 = arith.extui %64 : i1 to i32
    %c0_i32_44 = arith.constant 0 : i32
    %66 = arith.cmpi ne, %65, %c0_i32_44 : i32
    scf.if %66 {
      %cst_85 = arith.constant 0.000000e+00 : bf16
      %118 = vector.broadcast %cst_85 : bf16 to vector<18x128xbf16>
      %c0_86 = arith.constant 0 : index
      %c0_87 = arith.constant 0 : index
      %119 = vector.load %arg11[%c0_86, %c0_87] : memref<184x128xbf16, #tpu.memory_space<vmem>>, vector<18x128xbf16>
      tpu.vector_store %arg11[%c0_86, %c0_87], %118 {strides = array<i32>} : memref<184x128xbf16, #tpu.memory_space<vmem>>, vector<18x128xbf16>,
    } else {
    }
    %c1_i32_45 = arith.constant 1 : i32
    %67 = arith.cmpi eq, %arg1, %c1_i32_45 : i32
    %68 = arith.extui %67 : i1 to i32
    %c0_i32_46 = arith.constant 0 : i32
    %69 = arith.cmpi ne, %68, %c0_i32_46 : i32
    scf.if %69 {
      %cst_85 = arith.constant 0.000000e+00 : bf16
      %118 = vector.broadcast %cst_85 : bf16 to vector<18x128xbf16>
      %c162 = arith.constant 162 : index
      %c0_86 = arith.constant 0 : index
      %119 = vector.load %arg11[%c162, %c0_86] : memref<184x128xbf16, #tpu.memory_space<vmem>>, vector<18x128xbf16>
      tpu.vector_store %arg11[%c162, %c0_86], %118 {strides = array<i32>} : memref<184x128xbf16, #tpu.memory_space<vmem>>, vector<18x128xbf16>,
    } else {
    }
    %c2_i32_47 = arith.constant 2 : i32
    %70 = arith.addi %0, %c2_i32_47 : i32
    %c18_i32_48 = arith.constant 18 : i32
    %71 = arith.muli %70, %c18_i32_48 : i32
    %c1_i32_49 = arith.constant 1 : i32
    %72 = arith.addi %71, %c1_i32_49 : i32
    %c0_50 = arith.constant 0 : index
    %73 = arith.index_cast %72 : i32 to index
    %c0_51 = arith.constant 0 : index
    %74 = vector.load %arg2[%c0_50, %73, %c0_51] : memref<1x368x4xf32, #tpu.memory_space<vmem>>, vector<1x144x4xf32>
    %75 = vector.shape_cast %74 : vector<1x144x4xf32> to vector<144x4xf32>
    %76 = arith.truncf %75 : vector<144x4xf32> to vector<144x4xbf16>
    %c0_52 = arith.constant 0 : index
    %c0_53 = arith.constant 0 : index
    %77 = vector.load %arg8[%c0_52, %c0_53] : memref<4x128xbf16, #tpu.memory_space<vmem>>, vector<4x128xbf16>
    %cst_54 = arith.constant dense<0.000000e+00> : vector<144x128xf32>
    %78 = tpu.matmul %76, %77, %cst_54 {dimension_numbers = #tpu.dot_dimension_numbers<[1], [0], [0], [1], [0, 0, 1, 1], [], []>} : vector<144x4xbf16>, vector<4x128xbf16>, vector<144x128xf32> -> vector<144x128xf32>
    %c0_55 = arith.constant 0 : index
    %c0_56 = arith.constant 0 : index
    %79 = vector.load %arg9[%c0_55, %c0_56] : memref<1x128xf32, #tpu.memory_space<vmem>>, vector<1x128xf32>
    %80 = vector.broadcast %79 : vector<1x128xf32> to vector<144x128xf32>
    %81 = arith.addf %78, %80 : vector<144x128xf32>
    %c38 = arith.constant 38 : index
    %c0_57 = arith.constant 0 : index
    %82 = vector.load %arg11[%c38, %c0_57] : memref<184x128xbf16, #tpu.memory_space<vmem>>, vector<144x128xbf16>
    %c1024 = arith.constant 1024 : index
    %c0_58 = arith.constant 0 : index
    %83 = vector.load %arg5[%c1024, %c0_58] : memref<1152x128xbf16, #tpu.memory_space<vmem>>, vector<128x128xbf16>
    %cst_59 = arith.constant dense<0.000000e+00> : vector<144x128xf32>
    %84 = tpu.matmul %82, %83, %cst_59 {dimension_numbers = #tpu.dot_dimension_numbers<[1], [0], [0], [1], [0, 0, 1, 1], [], []>} : vector<144x128xbf16>, vector<128x128xbf16>, vector<144x128xf32> -> vector<144x128xf32>
    %c0_60 = arith.constant 0 : index
    %c0_61 = arith.constant 0 : index
    %85 = vector.load %arg11[%c0_60, %c0_61] : memref<184x128xbf16, #tpu.memory_space<vmem>>, vector<144x128xbf16>
    %c1_62 = arith.constant 1 : index
    %c0_63 = arith.constant 0 : index
    %86 = vector.load %arg11[%c1_62, %c0_63] : memref<184x128xbf16, #tpu.memory_space<vmem>>, vector<144x128xbf16>
    %87 = tpu.concatenate %85, %86 in 1 : vector<144x128xbf16>, vector<144x128xbf16> -> vector<144x256xbf16>
    %c0_64 = arith.constant 0 : index
    %c0_65 = arith.constant 0 : index
    %88 = vector.load %arg5[%c0_64, %c0_65] : memref<1152x128xbf16, #tpu.memory_space<vmem>>, vector<256x128xbf16>
    %cst_66 = arith.constant dense<0.000000e+00> : vector<144x128xf32>
    %89 = tpu.matmul %87, %88, %cst_66 {dimension_numbers = #tpu.dot_dimension_numbers<[1], [0], [0], [1], [0, 0, 1, 1], [], []>} : vector<144x256xbf16>, vector<256x128xbf16>, vector<144x128xf32> -> vector<144x128xf32>
    %90 = arith.addf %84, %89 : vector<144x128xf32>
    %c2 = arith.constant 2 : index
    %c0_67 = arith.constant 0 : index
    %91 = vector.load %arg11[%c2, %c0_67] : memref<184x128xbf16, #tpu.memory_space<vmem>>, vector<144x128xbf16>
    %c18 = arith.constant 18 : index
    %c0_68 = arith.constant 0 : index
    %92 = vector.load %arg11[%c18, %c0_68] : memref<184x128xbf16, #tpu.memory_space<vmem>>, vector<144x128xbf16>
    %93 = tpu.concatenate %91, %92 in 1 : vector<144x128xbf16>, vector<144x128xbf16> -> vector<144x256xbf16>
    %c256 = arith.constant 256 : index
    %c0_69 = arith.constant 0 : index
    %94 = vector.load %arg5[%c256, %c0_69] : memref<1152x128xbf16, #tpu.memory_space<vmem>>, vector<256x128xbf16>
    %cst_70 = arith.constant dense<0.000000e+00> : vector<144x128xf32>
    %95 = tpu.matmul %93, %94, %cst_70 {dimension_numbers = #tpu.dot_dimension_numbers<[1], [0], [0], [1], [0, 0, 1, 1], [], []>} : vector<144x256xbf16>, vector<256x128xbf16>, vector<144x128xf32> -> vector<144x128xf32>
    %96 = arith.addf %90, %95 : vector<144x128xf32>
    %c19 = arith.constant 19 : index
    %c0_71 = arith.constant 0 : index
    %97 = vector.load %arg11[%c19, %c0_71] : memref<184x128xbf16, #tpu.memory_space<vmem>>, vector<144x128xbf16>
    %c20 = arith.constant 20 : index
    %c0_72 = arith.constant 0 : index
    %98 = vector.load %arg11[%c20, %c0_72] : memref<184x128xbf16, #tpu.memory_space<vmem>>, vector<144x128xbf16>
    %99 = tpu.concatenate %97, %98 in 1 : vector<144x128xbf16>, vector<144x128xbf16> -> vector<144x256xbf16>
    %c512 = arith.constant 512 : index
    %c0_73 = arith.constant 0 : index
    %100 = vector.load %arg5[%c512, %c0_73] : memref<1152x128xbf16, #tpu.memory_space<vmem>>, vector<256x128xbf16>
    %cst_74 = arith.constant dense<0.000000e+00> : vector<144x128xf32>
    %101 = tpu.matmul %99, %100, %cst_74 {dimension_numbers = #tpu.dot_dimension_numbers<[1], [0], [0], [1], [0, 0, 1, 1], [], []>} : vector<144x256xbf16>, vector<256x128xbf16>, vector<144x128xf32> -> vector<144x128xf32>
    %102 = arith.addf %96, %101 : vector<144x128xf32>
    %c36 = arith.constant 36 : index
    %c0_75 = arith.constant 0 : index
    %103 = vector.load %arg11[%c36, %c0_75] : memref<184x128xbf16, #tpu.memory_space<vmem>>, vector<144x128xbf16>
    %c37 = arith.constant 37 : index
    %c0_76 = arith.constant 0 : index
    %104 = vector.load %arg11[%c37, %c0_76] : memref<184x128xbf16, #tpu.memory_space<vmem>>, vector<144x128xbf16>
    %105 = tpu.concatenate %103, %104 in 1 : vector<144x128xbf16>, vector<144x128xbf16> -> vector<144x256xbf16>
    %c768 = arith.constant 768 : index
    %c0_77 = arith.constant 0 : index
    %106 = vector.load %arg5[%c768, %c0_77] : memref<1152x128xbf16, #tpu.memory_space<vmem>>, vector<256x128xbf16>
    %cst_78 = arith.constant dense<0.000000e+00> : vector<144x128xf32>
    %107 = tpu.matmul %105, %106, %cst_78 {dimension_numbers = #tpu.dot_dimension_numbers<[1], [0], [0], [1], [0, 0, 1, 1], [], []>} : vector<144x256xbf16>, vector<256x128xbf16>, vector<144x128xf32> -> vector<144x128xf32>
    %108 = arith.addf %102, %107 : vector<144x128xf32>
    %c0_79 = arith.constant 0 : index
    %c0_80 = arith.constant 0 : index
    %109 = vector.load %arg6[%c0_79, %c0_80] : memref<1x128xf32, #tpu.memory_space<vmem>>, vector<1x128xf32>
    %110 = vector.broadcast %109 : vector<1x128xf32> to vector<144x128xf32>
    %111 = arith.addf %108, %110 : vector<144x128xf32>
    %112 = arith.addf %111, %81 : vector<144x128xf32>
    %cst_81 = arith.constant 0.000000e+00 : f32
    %113 = vector.broadcast %cst_81 : f32 to vector<144x128xf32>
    %114 = arith.maximumf %112, %113 : vector<144x128xf32>
    %c0_82 = arith.constant 0 : index
    %c0_83 = arith.constant 0 : index
    %c0_84 = arith.constant 0 : index
    %115 = vector.load %arg10[%c0_82, %c0_83, %c0_84] : memref<1x144x128xf32, #tpu.memory_space<vmem>>, vector<1x144x128xf32>
    %116 = vector.shape_cast %115 : vector<1x144x128xf32> to vector<144x128xf32>
    %117 = vector.shape_cast %114 : vector<144x128xf32> to vector<1x144x128xf32>
    tpu.vector_store %arg10[%c0_82, %c0_83, %c0_84], %117 {strides = array<i32>} : memref<1x144x128xf32, #tpu.memory_space<vmem>>, vector<1x144x128xf32>,
    return
  }
  func.func @transform_0(%arg0: i32, %arg1: i32) -> (i32, i32, i32) {
    %c0_i32 = arith.constant 0 : i32
    %c0_i32_0 = arith.constant 0 : i32
    %c0_i32_1 = arith.constant 0 : i32
    return %arg0, %c0_i32, %c0_i32_0 : i32, i32, i32
  }
  func.func @transform_1(%arg0: i32, %arg1: i32) -> (i32, i32) {
    %c0_i32 = arith.constant 0 : i32
    %c0_i32_0 = arith.constant 0 : i32
    %c0_i32_1 = arith.constant 0 : i32
    return %c0_i32, %c0_i32_0 : i32, i32
  }
  func.func @transform_2(%arg0: i32, %arg1: i32) -> (i32, i32) {
    %c0_i32 = arith.constant 0 : i32
    %c0_i32_0 = arith.constant 0 : i32
    %c0_i32_1 = arith.constant 0 : i32
    return %c0_i32, %c0_i32_0 : i32, i32
  }
  func.func @transform_3(%arg0: i32, %arg1: i32) -> (i32, i32) {
    %c0_i32 = arith.constant 0 : i32
    %c0_i32_0 = arith.constant 0 : i32
    %c0_i32_1 = arith.constant 0 : i32
    return %c0_i32, %c0_i32_0 : i32, i32
  }
  func.func @transform_4(%arg0: i32, %arg1: i32) -> (i32, i32) {
    %c0_i32 = arith.constant 0 : i32
    %c0_i32_0 = arith.constant 0 : i32
    %c0_i32_1 = arith.constant 0 : i32
    return %c0_i32, %c0_i32_0 : i32, i32
  }
  func.func @transform_5(%arg0: i32, %arg1: i32) -> (i32, i32) {
    %c0_i32 = arith.constant 0 : i32
    %c0_i32_0 = arith.constant 0 : i32
    %c0_i32_1 = arith.constant 0 : i32
    return %c0_i32, %c0_i32_0 : i32, i32
  }
  func.func @transform_6(%arg0: i32, %arg1: i32) -> (i32, i32) {
    %c0_i32 = arith.constant 0 : i32
    %c0_i32_0 = arith.constant 0 : i32
    %c0_i32_1 = arith.constant 0 : i32
    return %c0_i32, %c0_i32_0 : i32, i32
  }
  func.func @transform_7(%arg0: i32, %arg1: i32) -> (i32, i32) {
    %c0_i32 = arith.constant 0 : i32
    %c0_i32_0 = arith.constant 0 : i32
    %c0_i32_1 = arith.constant 0 : i32
    return %c0_i32, %c0_i32_0 : i32, i32
  }
  func.func @transform_8(%arg0: i32, %arg1: i32) -> (i32, i32, i32) {
    %c0_i32 = arith.constant 0 : i32
    %c0_i32_0 = arith.constant 0 : i32
    return %arg0, %arg1, %c0_i32 : i32, i32, i32
  }
}

</mosaic_0001>

<bundles_post_ra>
// kernel: tpu_custom_call.1
= control target key start
LH: loop header
LB: loop body
LE: loop exit
PB: predicated region body
PF: predicated region fallthrough
CT: control target
= control target key end

     0   :  { %13 = vsyncpa [#allocation4], 0  ;;  %s8277_s0 = inlined_call_operand.vmem [shape: f32[2,368,4], index: 0, kind: input, shape index: {}]   ;;  %s8278_s1 = inlined_call_operand.vmem [shape: bf16[36,128], index: 1, kind: input, shape index: {}]   ;;  %s8279_s2 = inlined_call_operand.vmem [shape: f32[1,128], index: 2, kind: input, shape index: {}]   ;;  %s8280_s3 = inlined_call_operand.vmem [shape: bf16[1152,128], index: 3, kind: input, shape index: {}]   ;;  %s8281_s4 = inlined_call_operand.vmem [shape: f32[1,128], index: 4, kind: input, shape index: {}]   ;;  %s8282_s5 = inlined_call_operand.vmem [shape: f32[180,1], index: 5, kind: input, shape index: {}]   ;;  %s8283_s6 = inlined_call_operand.vmem [shape: bf16[4,128], index: 6, kind: input, shape index: {}]   ;;  %s8284_s7 = inlined_call_operand.vmem [shape: f32[1,128], index: 7, kind: input, shape index: {}]   ;;  %s8285_s8 = inlined_call_operand.hbm [shape: f32[2,288,128], index: 8, kind: output, shape index: {}]  }
   0x1   :  { %15 = vsyncpa [#allocation4 + $0x1], 0  ;;  %s6309_s27 = smov 0   ;;  %s6311_s28 = smov 0  }
   0x2   :  { %s6313_s29 = smov 0   ;;  %s6315_s30 = smov 0  }
   0x3   :  { %s6317_s9 = smov 0   ;;  %s6319_s10 = smov 0  }
   0x4   :  { %s6321_s11 = smov 0   ;;  %s6323_s12 = smov 0  }
   0x5 LB: > { %8299 = sst [smem:[#allocation6_spill]] %s6239_s10  ;;  %s4515_s13 = sadd.s32 4294967295, %s6247_s12   ;;  %s6247_s12 = sphi %s6323_s12, %s21_s12   ;;  %s6243_s11 = sphi %s6321_s11, %s8348_s11   ;;  %s6239_s10 = sphi %s6319_s10, %s8343_s10   ;;  %s6235_s9 = sphi %s6317_s9, %s8347_s9   ;;  %s6231_s30 = sphi %s6315_s30, %s8342_s30   ;;  %s6227_s29 = sphi %s6313_s29, %s8346_s29   ;;  %s6223_s28 = sphi %s6311_s28, %s8345_s28   ;;  %s6219_s27 = sphi %s6309_s27, %s8344_s27  }
   0x6   : > { %s4516_s14 = sadd.s32 4294967294, %s6247_s12   ;;  %s30_s15 = sadd.s32 1, %s6239_s10 }
   0x7   : > { %p31_p0 = scmp.ge.s32.totalorder %s30_s15, 2  ;;  %s33_s16 = sadd.s32 1, %s6243_s11 }
   0x8   : > { %p225_p1 = scmp.ne.s32.totalorder %s6227_s29, %s6223_s28  ;;  %p226_p2 = scmp.eq.s32.totalorder %s4515_s13, 3 }
   0x9   : > { %s8350_s15 = smov (%p31_p0, %s30_s15), 0  ;;  %s8352_s16 = smov (!%p31_p0, %s33_s16), %s6243_s11 }
   0xa   : > { %8300 = sst [smem:[#allocation7_spill]] %s8350_s15  ;;  %s211_s17 = ssub.s32 %s6239_s10, %s8350_s15 }
   0xb   : > { %p6360_p3 = por %p226_p2, %p225_p1  ;;  %p35_p4 = scmp.ge.s32.totalorder %s8352_s16, 2 }
   0xc   : > { %p231_p5 = scmp.ne.s32.totalorder %s6223_s28, %s6219_s27  ;;  %p232_p6 = scmp.eq.s32.totalorder %s4516_s14, 3 }
   0xd   : > { %p4519_p7 = scmp.ge.s32.totalorder %s6247_s12, 1  ;;  %s8354_s16 = smov (%p35_p4, %s8352_s16), 0 }
   0xe   : > { %p6369_p8 = por %p232_p6, %p231_p5  ;;  %p279_p9 = scmp.lt.s32.totalorder %s6247_s12, 5 }
   0xf   : > { %s210_s20 = ssub.s32 %s6243_s11, %s8354_s16  ;;  %s215_s21 = sadd.s32 1, %s6227_s29 }
  0x10   : > { %s212_s22 = sor.u32 %s211_s17, %s210_s20  ;;  %p280_p10 = pnand %p4519_p7, %p279_p9 }
  0x11   : > { %p213_p11 = scmp.eq.s32.totalorder %s212_s22, 0 }
  0x12   : > { %283 = sbr.rel (%p280_p10) target bundleno = 1062 (0x426), region = 52 }
  0x13   : > { %s6378_s23 = scalar_select %p213_p11, %s6227_s29, %s215_s21  }
  0x19   : > { %p313_p12 = scmp.lt.s32.totalorder %s6235_s9, 1  ;;  %s323_s25 = smul.u32 144, %s6231_s30  ;;  %vm1552_vm0 = vcmask 1041408   ;;  %vm1284_vm1 = vcmask 31744   ;;  %vm1308_vm2 = vcmask 64512   ;;  %vm1332_vm3 = vcmask 97280  }
  0x1a   : > { %s8288_s17 = smov 8   ;;  %s6251_s20 = smov 12   ;;  %vm1356_vm4 = vcmask 130048   ;;  %vm1380_vm5 = vcmask 162816   ;;  %vm1404_vm6 = vcmask 195584   ;;  %vm1428_vm7 = vcmask 228352  }
  0x1b   : > { %s314_s24 = scalar_select %p313_p12, %s6235_s9, 1  ;;  %vm1452_vm8 = vcmask 261120   ;;  %vm1515_vm9 = vcmask 293888   ;;  %vm2169_vm10 = vcmask 1043456   ;;  %vm2170_vm11 = vsmask.f32 7938 }
  0x1c   : > { %s6254_s13 = smov 24   ;;  %s6255_s14 = smov 28   ;;  %vm1938_vm12 = vsmask.f32 256  ;;  %vm1939_vm13 = vsmask.f32 4368  ;;  %vm7127_vm14 = vmand %vm2169_vm10, %vm2170_vm11 }
  0x1d   : > { %s5514_s26 = smul.u32 368, %s314_s24  ;;  %s310_s24 = sand.u32 1, %s6223_s28   ;;  %vm7133_vm15 = vmor %vm1938_vm12, %vm1939_vm13 }
  0x1e   : > { %s6256_s21 = smov 32   ;;  %p4744_p13 = scmp.ne.s32.totalorder %s6231_s30, 0 }
  0x1f   : > { %s317_s15 = scalar_lea.vmem %s8277_s0, %s5514_s26  ;;  %s6252_s26 = smov 16  }
  0x20   : > { %s6386_s10 = scalar_lea.vmem %s317_s15, %s323_s25  ;;  %s6249_s15 = smov 4  }
  0x21   : > { %v4525_v0 = vld [vmem:[%s6386_s10 + $0x21] sm:$0xff]  ;;  %v4526_v1 = vld [vmem:[%s6386_s10 + $0x29] sm:$0xff]  ;;  %v4527_v5 = vld [vmem:[%s6386_s10 + $0x31] sm:$0xff]  ;;  %s6486_s25 = smul.u32 144, %s310_s24 }
  0x22   : > { %v4521_v2 = vld [vmem:[%s6386_s10 + $0x1] sm:$0xff]  ;;  %v5611_v3 = vpack.i.bf16 %v4526_v1, %v4525_v0  ;;  %v4522_v4 = vld [vmem:[%s6386_s10 + $0x9] sm:$0xff]  ;;  %v4528_v6 = vld [vmem:[%s6386_s10 + $0x39] sm:$0xff] }
  0x23   : > { %v5601_v7 = vpack.i.bf16 %v4522_v4, %v4521_v2  ;;  %v4523_v8 = vld [vmem:[%s6386_s10 + $0x11] sm:$0xff]  ;;  %v4524_v9 = vld [vmem:[%s6386_s10 + $0x19] sm:$0xff]  ;;  %v5616_v10 = vpack.i.bf16 %v4528_v6, %v4527_v5  ;;  %v4529_v14 = vld [vmem:[%s6386_s10 + $0x41] sm:$0xff] }
  0x24   : > { %5612 = vrot.lane.b32.xlu1 %v5611_v3, %s6249_s15  ;;  %v5606_v11 = vpack.i.bf16 %v4524_v9, %v4523_v8  ;;  %v4531_v12 = vld [vmem:[%s6386_s10 + $0x51] sm:$0xff]  ;;  %v4532_v13 = vld [vmem:[%s6386_s10 + $0x59] sm:$0xff]  ;;  %v4530_v15 = vld [vmem:[%s6386_s10 + $0x49] sm:$0xff] }
  0x25   : > { %5602 = vrot.lane.b32.xlu0 %v5601_v7, %s6249_s15  ;;  %v5626_v16 = vpack.i.bf16 %v4532_v13, %v4531_v12  ;;  %v5621_v17 = vpack.i.bf16 %v4530_v15, %v4529_v14  ;;  %v4535_v18 = vld [vmem:[%s6386_s10 + $0x71] sm:$0xff]  ;;  %v4536_v19 = vld [vmem:[%s6386_s10 + $0x79] sm:$0xff]  ;;  %v4533_v20 = vld [vmem:[%s6386_s10 + $0x61] sm:$0xff] }
  0x26   : > { %v4534_v21 = vld [vmem:[%s6386_s10 + $0x69] sm:$0xff]  ;;  %v5636_v22 = vpack.i.bf16 %v4536_v19, %v4535_v18  ;;  %v4539_v24 = vld [vmem:[%s6386_s10 + $0x91] sm:$0xff]  ;;  %v4540_v25 = vld [vmem:[%s6386_s10 + $0x99] sm:$0xff] }
  0x27   : > { %v5631_v23 = vpack.i.bf16 %v4534_v21, %v4533_v20  ;;  %v4537_v26 = vld [vmem:[%s6386_s10 + $0x81] sm:$0xff]  ;;  %v4538_v27 = vld [vmem:[%s6386_s10 + $0x89] sm:$0xff]  ;;  %v5646_v28 = vpack.i.bf16 %v4540_v25, %v4539_v24  ;;  %v4543_v32 = vld [vmem:[%s6386_s10 + $0xb1] sm:$0xf] }
  0x28   : > { %5617 = vrot.lane.b32.xlu1 %v5616_v10, %s6249_s15  ;;  %v5641_v29 = vpack.i.bf16 %v4538_v27, %v4537_v26  ;;  %v4541_v30 = vld [vmem:[%s6386_s10 + $0xa1] sm:$0xff]  ;;  %v4542_v31 = vld [vmem:[%s6386_s10 + $0xa9] sm:$0xff]  ;;  %v4546_v34 = vld [vmem:[%s6386_s10 + $0x12] sm:$0xff] }
  0x29   : > { %5607 = vrot.lane.b32.xlu0 %v5606_v11, %s6249_s15  ;;  %v5651_v33 = vpack.i.bf16 %v4542_v31, %v4541_v30  ;;  %v4547_v35 = vld [vmem:[%s6386_s10 + $0x1a] sm:$0xff]  ;;  %v4544_v36 = vld [vmem:[%s6386_s10 + $0x2] sm:$0xff]  ;;  %v4545_v37 = vld [vmem:[%s6386_s10 + $0xa] sm:$0xff] }
  0x2a   : > { %v5661_v38 = vpack.i.bf16 %v4547_v35, %v4546_v34  ;;  %v5656_v39 = vpack.i.bf16 %v4545_v37, %v4544_v36  ;;  %v4550_v40 = vld [vmem:[%s6386_s10 + $0x32] sm:$0xff]  ;;  %v4551_v41 = vld [vmem:[%s6386_s10 + $0x3a] sm:$0xff]  ;;  %v4548_v42 = vld [vmem:[%s6386_s10 + $0x22] sm:$0xff] }
  0x2b   : > { %v4549_v43 = vld [vmem:[%s6386_s10 + $0x2a] sm:$0xff]  ;;  %v5671_v44 = vpack.i.bf16 %v4551_v41, %v4550_v40  ;;  %v4554_v46 = vld [vmem:[%s6386_s10 + $0x52] sm:$0xff]  ;;  %v4555_v47 = vld [vmem:[%s6386_s10 + $0x5a] sm:$0xff] }
  0x2c   : > { %5627 = vrot.lane.b32.xlu1 %v5626_v16, %s6249_s15  ;;  %v5666_v45 = vpack.i.bf16 %v4549_v43, %v4548_v42  ;;  %v4552_v48 = vld [vmem:[%s6386_s10 + $0x42] sm:$0xff]  ;;  %v4553_v49 = vld [vmem:[%s6386_s10 + $0x4a] sm:$0xff]  ;;  %v5681_v50 = vpack.i.bf16 %v4555_v47, %v4554_v46  ;;  %v4558_v52 = vld [vmem:[%s6386_s10 + $0x72] sm:$0xff] }
  0x2d   : > { %5622 = vrot.lane.b32.xlu0 %v5621_v17, %s6249_s15  ;;  %v5676_v51 = vpack.i.bf16 %v4553_v49, %v4552_v48  ;;  %v4559_v53 = vld [vmem:[%s6386_s10 + $0x7a] sm:$0xff]  ;;  %v4556_v54 = vld [vmem:[%s6386_s10 + $0x62] sm:$0xff]  ;;  %v4557_v55 = vld [vmem:[%s6386_s10 + $0x6a] sm:$0xff] }
  0x2e   : > { %v5691_v56 = vpack.i.bf16 %v4559_v53, %v4558_v52  ;;  %v5686_v57 = vpack.i.bf16 %v4557_v55, %v4556_v54  ;;  %v4562_v58 = vld [vmem:[%s6386_s10 + $0x92] sm:$0xff]  ;;  %v4563_v59 = vld [vmem:[%s6386_s10 + $0x9a] sm:$0xff]  ;;  %v4560_v60 = vld [vmem:[%s6386_s10 + $0x82] sm:$0xff] }
  0x2f   : > { %v4561_v61 = vld [vmem:[%s6386_s10 + $0x8a] sm:$0xff]  ;;  %v6450_v62 = vpack.i.bf16 %v4563_v59, %v4562_v58  ;;  %v4564_v0 = vld [vmem:[%s6386_s10 + $0xa2] sm:$0xff]  ;;  %v4566_v2 = vld [vmem:[%s6386_s10 + $0xb2] sm:$0xf] }
  0x30   : > { %5637 = vrot.lane.b32.xlu1 %v5636_v22, %s6249_s15  ;;  %v5696_v63 = vpack.i.bf16 %v4561_v61, %v4560_v60  ;;  %v4565_v1 = vld [vmem:[%s6386_s10 + $0xaa] sm:$0xff]  ;;  %v4590_v6 = vld [vmem:[%s6386_s10 + $0x13] sm:$0xff]  ;;  %v4591_v7 = vld [vmem:[%s6386_s10 + $0x1b] sm:$0xff] }
  0x31   : > { %5632 = vrot.lane.b32.xlu0 %v5631_v23, %s6249_s15  ;;  %v6459_v3 = vpack.i.bf16 %v4565_v1, %v4564_v0  ;;  %v4592_v4 = vld [vmem:[%s6386_s10 + $0x23] sm:$0xff]  ;;  %v4593_v5 = vld [vmem:[%s6386_s10 + $0x2b] sm:$0xff]  ;;  %v5751_v10 = vpack.i.bf16 %v4591_v7, %v4590_v6  ;;  %v4613_v13 = vld [vmem:[%s6386_s10 + $0x14] sm:$0xff] }
  0x32   : > { %v5756_v8 = vpack.i.bf16 %v4593_v5, %v4592_v4  ;;  %v6043_v9 = vld [vmem:[%s8278_s1] sm:$0xff]   ;;  %v4616_v12 = vld [vmem:[%s6386_s10 + $0x2c] sm:$0xff]  ;;  %v4638_v18 = vld [vmem:[%s6386_s10 + $0x34] sm:$0xff] }
  0x33   : > { %v4615_v11 = vld [vmem:[%s6386_s10 + $0x24] sm:$0xff]  ;;  %v4614_v14 = vld [vmem:[%s6386_s10 + $0x1c] sm:$0xff]  ;;  %5232 = vmatprep.subr.bf16.mxu0 %v6043_v9  ;;  %v6045_v21 = vld [vmem:[%s8278_s1 + $0x10] ss:$0 sps:$4 sm:$0x33]  }
  0x34   : > { %5647 = vrot.lane.b32.xlu1 %v5646_v28, %s6249_s15  ;;  %5233 = vmatpush3.bf16.msra.mxu0 %v6043_v9  ;;  %v5766_v15 = vpack.i.bf16 %v4616_v12, %v4615_v11  ;;  %v6044_v16 = vld [vmem:[%s8278_s1 + $0x8] sm:$0xff]   ;;  %v5761_v17 = vpack.i.bf16 %v4614_v14, %v4613_v13  ;;  %v4639_v19 = vld [vmem:[%s6386_s10 + $0x3c] sm:$0xff]  ;;  %v1554_v26 = vsel %vm1552_vm0, %v6045_v21, 0  ;;  %v4594_v37 = vld [vmem:[%s6386_s10 + $0x33] sm:$0xff] }
  0x35   : > { %5642 = vrot.lane.b32.xlu0 %v5641_v29, %s6249_s15  ;;  %5234 = vmatprep.subr.bf16.mxu0 %v6044_v16  ;;  %v5776_v20 = vpack.i.bf16 %v4639_v19, %v4638_v18  ;;  %v4661_v22 = vld [vmem:[%s6386_s10 + $0x35] sm:$0xff]  ;;  %v4662_v23 = vld [vmem:[%s6386_s10 + $0x3d] sm:$0xff]  ;;  %v4659_v24 = vld [vmem:[%s6386_s10 + $0x25] sm:$0xff] }
  0x36   : > { %v4660_v25 = vld [vmem:[%s6386_s10 + $0x2d] sm:$0xff]  ;;  %v5786_v27 = vpack.i.bf16 %v4662_v23, %v4661_v22  ;;  %v4684_v29 = vld [vmem:[%s6386_s10 + $0x36] sm:$0xff]  ;;  %v4685_v30 = vld [vmem:[%s6386_s10 + $0x3e] sm:$0xff] }
  0x37   : > { %v5781_v28 = vpack.i.bf16 %v4660_v25, %v4659_v24  ;;  %v4682_v31 = vld [vmem:[%s6386_s10 + $0x26] sm:$0xff]  ;;  %v4665_v47 = vld [vmem:[%s6386_s10 + $0x55] sm:$0xff]  ;;  %v4666_v48 = vld [vmem:[%s6386_s10 + $0x5d] sm:$0xff] }
  0x38   : > { %615 = vrot.lane.b32.xlu1 %v4543_v32, %s6249_s15  ;;  %5235 = vmatpush3.bf16.msra.mxu0 %v6044_v16  ;;  %v4683_v32 = vld [vmem:[%s6386_s10 + $0x2e] sm:$0xff]  ;;  %v4596_v35 = vld [vmem:[%s6386_s10 + $0x43] sm:$0xff]  ;;  %v4688_v53 = vld [vmem:[%s6386_s10 + $0x56] sm:$0xff] }
  0x39   : > { %5652 = vrot.lane.b32.xlu0 %v5651_v33, %s6249_s15  ;;  %s6253_s15 = smov 20   ;;  %5512 = vmatprep.subr.msk.bf16.mxu0 %vm1552_vm0, %v6045_v21  ;;  %v5796_v33 = vpack.i.bf16 %v4685_v30, %v4684_v29  ;;  %v5791_v34 = vpack.i.bf16 %v4683_v32, %v4682_v31  ;;  %v4597_v36 = vld [vmem:[%s6386_s10 + $0x4b] sm:$0xff]  ;;  %v4689_v54 = vld [vmem:[%s6386_s10 + $0x5e] sm:$0xff]  ;;  %v4598_v61 = vld [vmem:[%s6386_s10 + $0x53] sm:$0xff] }
  0x3a   : > { %v4619_v41 = vld [vmem:[%s6386_s10 + $0x44] sm:$0xff]  ;;  %v4620_v42 = vld [vmem:[%s6386_s10 + $0x4c] sm:$0xff]  ;;  %v4646_v6 = vld [vmem:[%s6386_s10 + $0x74] sm:$0xff] }
  0x3b   : > { %v5816_v43 = vpack.i.bf16 %v4620_v42, %v4619_v41  ;;  %v4663_v49 = vld [vmem:[%s6386_s10 + $0x45] sm:$0xff]  ;;  %v4647_v7 = vld [vmem:[%s6386_s10 + $0x7c] sm:$0xff]  ;;  %v4668_v12 = vld [vmem:[%s6386_s10 + $0x6d] sm:$0xff] }
  0x3c   : > { %5662 = vrot.lane.b32.xlu1 %v5661_v38, %s8288_s17  ;;  %5237 = vmatpush3.bf16.msra.mxu0 %v1554_v26  ;;  %v4686_v55 = vld [vmem:[%s6386_s10 + $0x46] sm:$0xff]  ;;  %v4669_v9 = vld [vmem:[%s6386_s10 + $0x75] sm:$0xff]  ;;  %v4693_v16 = vld [vmem:[%s6386_s10 + $0x7e] sm:$0xff] }
  0x3d   : > { %5657 = vrot.lane.b32.xlu0 %v5656_v39, %s8288_s17  ;;  %v5806_v39 = vpack.i.bf16 %v4597_v36, %v4596_v35  ;;  %v4600_v59 = vld [vmem:[%s6386_s10 + $0x63] sm:$0xff]  ;;  %v4601_v60 = vld [vmem:[%s6386_s10 + $0x6b] sm:$0xff]  ;;  %v4602_v26 = vld [vmem:[%s6386_s10 + $0x73] sm:$0xff] }
  0x3e   : > { %v5856_v0 = vpack.i.bf16 %v4601_v60, %v4600_v59  ;;  %v4624_v4 = vld [vmem:[%s6386_s10 + $0x6c] sm:$0xff]  ;;  %v4604_v23 = vld [vmem:[%s6386_s10 + $0x83] sm:$0xff]  ;;  %v4650_v36 = vld [vmem:[%s6386_s10 + $0x94] sm:$0xff] }
  0x3f   : > { %v4667_v11 = vld [vmem:[%s6386_s10 + $0x65] sm:$0xff]  ;;  %v4691_v19 = vld [vmem:[%s6386_s10 + $0x6e] sm:$0xff]  ;;  %v4696_v60 = vld [vmem:[%s6386_s10 + $0x96] sm:$0xff] }
  0x40   : > { %5672 = vrot.lane.b32.xlu1 %v5671_v44, %s8288_s17  ;;  %v5881_v14 = vpack.i.bf16 %v4668_v12, %v4667_v11  ;;  %v4690_v18 = vld [vmem:[%s6386_s10 + $0x66] sm:$0xff]  ;;  %v343_v41 = vld [vmem:[%s6386_s10 + $0x90] sm:$0xff] }
  0x41   : > { %5667 = vrot.lane.b32.xlu0 %v5666_v45, %s8288_s17  ;;  %v5891_v22 = vpack.i.bf16 %v4691_v19, %v4690_v18  ;;  %v4605_v24 = vld [vmem:[%s6386_s10 + $0x8b] sm:$0xff]  ;;  %v4673_v42 = vld [vmem:[%s6386_s10 + $0x95] sm:$0xff]  ;;  %v4608_v18 = vld [vmem:[%s6386_s10 + $0xa3] sm:$0xff] }
  0x42   : > { %v5906_v29 = vpack.i.bf16 %v4605_v24, %v4604_v23  ;;  %v4627_v31 = vld [vmem:[%s6386_s10 + $0x84] sm:$0xff]  ;;  %v4628_v32 = vld [vmem:[%s6386_s10 + $0x8c] sm:$0xff]  ;;  %v4607_v23 = vld [vmem:[%s6386_s10 + $0x9b] sm:$0xff] }
  0x43   : > { %v5916_v35 = vpack.i.bf16 %v4628_v32, %v4627_v31  ;;  %v4609_v19 = vld [vmem:[%s6386_s10 + $0xab] sm:$0xff] }
  0x44   : > { %5682 = vrot.lane.b32.xlu1 %v5681_v50, %s8288_s17 }
  0x45   : > { %5677 = vrot.lane.b32.xlu0 %v5676_v51, %s8288_s17 }
  0x48   : > { %5692 = vrot.lane.b32.xlu1 %v5691_v56, %s8288_s17 }
  0x49   : > { %5687 = vrot.lane.b32.xlu0 %v5686_v57, %s8288_s17 }
  0x4c   : > { %5702 = vrot.lane.b32.xlu1 %v6450_v62, %s8288_s17 }
  0x4d   : > { %5697 = vrot.lane.b32.xlu0 %v5696_v63, %s8288_s17 }
  0x50   : > { %707 = vrot.lane.b32.xlu1 %v4566_v2, %s8288_s17  ;;  %v4623_v2 = vld [vmem:[%s6386_s10 + $0x64] sm:$0xff] }
  0x51   : > { %5707 = vrot.lane.b32.xlu0 %v6459_v3, %s8288_s17  ;;  %v5866_v5 = vpack.i.bf16 %v4624_v4, %v4623_v2  ;;  %v4694_v2 = vld [vmem:[%s6386_s10 + $0x86] sm:$0xff]  ;;  %v4695_v4 = vld [vmem:[%s6386_s10 + $0x8e] sm:$0xff] }
  0x52   : > { %v5941_v12 = vpack.i.bf16 %v4695_v4, %v4694_v2 }
  0x54   : > { %5717 = vrot.lane.b32.xlu1 %v5666_v45, %s6251_s20  ;;  %v4643_v45 = vld [vmem:[%s6386_s10 + $0x5c] sm:$0xff] }
  0x55   : > { %5712 = vrot.lane.b32.xlu0 %v5661_v38, %s6251_s20  ;;  %v4595_v38 = vld [vmem:[%s6386_s10 + $0x3b] sm:$0xff] }
  0x56   : > { %v5801_v40 = vpack.i.bf16 %v4595_v38, %v4594_v37  ;;  %v4651_v37 = vld [vmem:[%s6386_s10 + $0x9c] sm:$0xff] }
  0x58   : > { %5727 = vrot.lane.b32.xlu1 %v5676_v51, %s6251_s20  ;;  %v5836_v51 = vpack.i.bf16 %v4666_v48, %v4665_v47  ;;  %v4672_v47 = vld [vmem:[%s6386_s10 + $0x8d] sm:$0xff] }
  0x59   : > { %5722 = vrot.lane.b32.xlu0 %v5671_v44, %s6251_s20  ;;  %v4642_v44 = vld [vmem:[%s6386_s10 + $0x54] sm:$0xff] }
  0x5a   : > { %v5826_v46 = vpack.i.bf16 %v4643_v45, %v4642_v44  ;;  %v344_v45 = vld [vmem:[%s6386_s10 + $0x98] sm:$0xff] }
  0x5c   : > { %5737 = vrot.lane.b32.xlu1 %v5686_v57, %s6251_s20  ;;  %v5846_v57 = vpack.i.bf16 %v4689_v54, %v4688_v53 }
  0x5d   : > { %5732 = vrot.lane.b32.xlu0 %v5681_v50, %s6251_s20  ;;  %v4664_v50 = vld [vmem:[%s6386_s10 + $0x4d] sm:$0xff] }
  0x5e   : > { %v5831_v52 = vpack.i.bf16 %v4664_v50, %v4663_v49 }
  0x60   : > { %5747 = vrot.lane.b32.xlu1 %v5696_v63, %s6251_s20  ;;  %v4599_v63 = vld [vmem:[%s6386_s10 + $0x5b] sm:$0xff] }
  0x61   : > { %5742 = vrot.lane.b32.xlu0 %v5691_v56, %s6251_s20  ;;  %v4687_v56 = vld [vmem:[%s6386_s10 + $0x4e] sm:$0xff]  ;;  %v5851_v1 = vpack.i.bf16 %v4599_v63, %v4598_v61  ;;  %v4697_v61 = vld [vmem:[%s6386_s10 + $0x9e] sm:$0xff] }
  0x62   : > { %v5841_v58 = vpack.i.bf16 %v4687_v56, %v4686_v55  ;;  %v347_v55 = vld [vmem:[%s6386_s10 + $0xb0] sm:$0xf]  ;;  %v5946_v11 = vpack.i.bf16 %v4697_v61, %v4696_v60  ;;  %v4698_v61 = vld [vmem:[%s6386_s10 + $0xa6] sm:$0xff] }
  0x64   : > { %5757 = vrot.lane.b32.xlu1 %v5756_v8, %s6252_s26  ;;  %v5876_v8 = vpack.i.bf16 %v4647_v7, %v4646_v6  ;;  %v345_v7 = vld [vmem:[%s6386_s10 + $0xa0] sm:$0xff] }
  0x65   : > { %5752 = vrot.lane.b32.xlu0 %v5751_v10, %s6252_s26  ;;  %v4670_v10 = vld [vmem:[%s6386_s10 + $0x7d] sm:$0xff] }
  0x66   : > { %v5886_v13 = vpack.i.bf16 %v4670_v10, %v4669_v9 }
  0x68   : > { %5767 = vrot.lane.b32.xlu1 %v5766_v15, %s6253_s15 }
  0x69   : > { %5762 = vrot.lane.b32.xlu0 %v5761_v17, %s6253_s15 }
  0x6c   : > { %5777 = vrot.lane.b32.xlu1 %v5776_v20, %s6254_s13 }
  0x6d   : > { %5772 = vrot.lane.b32.xlu0 %v5766_v15, %s6254_s13  ;;  %v4692_v15 = vld [vmem:[%s6386_s10 + $0x76] sm:$0xff] }
  0x6e   : > { %v5896_v21 = vpack.i.bf16 %v4693_v16, %v4692_v15 }
  0x70   : > { %5787 = vrot.lane.b32.xlu1 %v5786_v27, %s6255_s14  ;;  %v4603_v27 = vld [vmem:[%s6386_s10 + $0x7b] sm:$0xff] }
  0x71   : > { %5782 = vrot.lane.b32.xlu0 %v5781_v28, %s6255_s14  ;;  %v5901_v30 = vpack.i.bf16 %v4603_v27, %v4602_v26  ;;  %v5966_v26 = vpack.i.bf16 %v4609_v19, %v4608_v18  ;;  %v4589_v18 = vld [vmem:[%s6386_s10 + $0xc2] sm:$0xf] }
  0x74   : > { %5797 = vrot.lane.b32.xlu1 %v5796_v33, %s6256_s21 }
  0x75   : > { %5792 = vrot.lane.b32.xlu0 %v5791_v34, %s6256_s21 }
  0x78   : > { %5807 = vrot.lane.b32.xlu1 %v5806_v39, %s6252_s26 }
  0x79   : > { %5802 = vrot.lane.b32.xlu0 %v5801_v40, %s6252_s26  ;;  %v6595_v40 = vpack.i.bf16 %v4651_v37, %v4650_v36  ;;  %v4655_v36 = vld [vmem:[%s6386_s10 + $0xbc] sm:$0xff] }
  0x7c   : > { %5817 = vrot.lane.b32.xlu1 %v5816_v43, %s6253_s15 }
  0x7d   : > { %5812 = vrot.lane.b32.xlu0 %v5776_v20, %s6253_s15 }
  0x80   : > { %5827 = vrot.lane.b32.xlu1 %v5826_v46, %s6254_s13 }
  0x81   : > { %5822 = vrot.lane.b32.xlu0 %v5816_v43, %s6254_s13  ;;  %v4674_v43 = vld [vmem:[%s6386_s10 + $0x9d] sm:$0xff] }
  0x82   : > { %v5936_v56 = vpack.i.bf16 %v4674_v43, %v4673_v42  ;;  %v4677_v42 = vld [vmem:[%s6386_s10 + $0xb5] sm:$0xff]  ;;  %v4678_v43 = vld [vmem:[%s6386_s10 + $0xbd] sm:$0xff] }
  0x84   : > { %5837 = vrot.lane.b32.xlu1 %v5836_v51, %s6255_s14  ;;  %v341_v51 = vld [vmem:[%s6386_s10 + $0x80] sm:$0xff] }
  0x85   : > { %5832 = vrot.lane.b32.xlu0 %v5831_v52, %s6255_s14  ;;  %v342_v52 = vld [vmem:[%s6386_s10 + $0x88] sm:$0xff] }
  0x88   : > { %5847 = vrot.lane.b32.xlu1 %v5846_v57, %s6256_s21 }
  0x89   : > { %5842 = vrot.lane.b32.xlu0 %v5841_v58, %s6256_s21 }
  0x8c   : > { %5857 = vrot.lane.b32.xlu1 %v5856_v0, %s6252_s26 }
  0x8d   : > { %5852 = vrot.lane.b32.xlu0 %v5851_v1, %s6252_s26 }
  0x90   : > { %5867 = vrot.lane.b32.xlu1 %v5866_v5, %s6253_s15 }
  0x91   : > { %5862 = vrot.lane.b32.xlu0 %v5826_v46, %s6253_s15  ;;  %v4671_v46 = vld [vmem:[%s6386_s10 + $0x85] sm:$0xff] }
  0x92   : > { %v5931_v59 = vpack.i.bf16 %v4672_v47, %v4671_v46  ;;  %v4676_v46 = vld [vmem:[%s6386_s10 + $0xad] sm:$0xff] }
  0x94   : > { %5877 = vrot.lane.b32.xlu1 %v5876_v8, %s6254_s13 }
  0x95   : > { %5872 = vrot.lane.b32.xlu0 %v5866_v5, %s6254_s13 }
  0x96   : > { %v6562_v17 = vpop.permute.xlu1 %5612 }
  0x97   : > { %v6566_v20 = vpop.permute.xlu0 %5602 }
  0x98   : > { %5887 = vrot.lane.b32.xlu1 %v5886_v13, %s6255_s14 }
  0x99   : > { %5882 = vrot.lane.b32.xlu0 %v5881_v14, %s6255_s14 }
  0x9a   : > { %v6572_v25 = vpop.permute.xlu1 %5617 }
  0x9b   : > { %v6576_v28 = vpop.permute.xlu0 %5607 }
  0x9c   : > { %5897 = vrot.lane.b32.xlu1 %v5896_v21, %s6256_s21 }
  0x9d   : > { %5892 = vrot.lane.b32.xlu0 %v5891_v22, %s6256_s21  ;;  %v4606_v22 = vld [vmem:[%s6386_s10 + $0x93] sm:$0xff] }
  0x9e   : > { %v6582_v33 = vpop.permute.xlu1 %5627  ;;  %v5961_v27 = vpack.i.bf16 %v4607_v23, %v4606_v22  ;;  %v4610_v22 = vld [vmem:[%s6386_s10 + $0xb3] sm:$0xff] }
  0x9f   : > { %v6584_v34 = vpop.permute.xlu0 %5622 }
  0xa0   : > { %5907 = vrot.lane.b32.xlu1 %v5906_v29, %s6252_s26  ;;  %v4631_v29 = vld [vmem:[%s6386_s10 + $0xa4] sm:$0xff] }
  0xa1   : > { %5902 = vrot.lane.b32.xlu0 %v5901_v30, %s6252_s26  ;;  %v4632_v30 = vld [vmem:[%s6386_s10 + $0xac] sm:$0xff] }
  0xa2   : > { %v6590_v38 = vpop.permute.xlu1 %5637 }
  0xa3   : > { %v6592_v39 = vpop.permute.xlu0 %5632 }
  0xa4   : > { %5917 = vrot.lane.b32.xlu1 %v5916_v35, %s6253_s15 }
  0xa5   : > { %5912 = vrot.lane.b32.xlu0 %v5876_v8, %s6253_s15  ;;  %v346_v8 = vld [vmem:[%s6386_s10 + $0xa8] sm:$0xff] }
  0xa6   : > { %v5648_v44 = vpop.permute.xlu1 %5647 }
  0xa7   : > { %v5650_v48 = vunpack.i.h.bf16 %v5648_v44  ;;  %v5649_v49 = vunpack.i.l.bf16 %v5648_v44  ;;  %v5643_v50 = vpop.permute.xlu0 %5642 }
  0xa8   : > { %v5645_v53 = vunpack.i.h.bf16 %v5643_v50  ;;  %v5644_v54 = vunpack.i.l.bf16 %v5643_v50  ;;  %5927 = vrot.lane.b32.xlu1 %v6595_v40, %s6254_s13 }
  0xa9   : > { %v6610_v57 = vsel %vm1284_vm1, %v343_v41, %v5649_v49  ;;  %v6613_v58 = vsel %vm1284_vm1, %v344_v45, %v5650_v48  ;;  %5922 = vrot.lane.b32.xlu0 %v5916_v35, %s6254_s13  ;;  %v5976_v35 = vpack.i.bf16 %v4632_v30, %v4631_v29  ;;  %v4675_v45 = vld [vmem:[%s6386_s10 + $0xa5] sm:$0xff]  ;;  %v5640_v29 = vunpack.i.h.bf16 %v6590_v38 }
  0xaa   : > { %v6619_v63 = vsel %vm1284_vm1, %v341_v51, %v5644_v54  ;;  %v6622_v0 = vsel %vm1284_vm1, %v342_v52, %v5645_v53  ;;  %v616_v1 = vpop.permute.xlu1 %615  ;;  %v5996_v52 = vpack.i.bf16 %v4678_v43, %v4677_v42  ;;  %v5991_v54 = vpack.i.bf16 %v4676_v46, %v4675_v45  ;;  %v4656_v45 = vld [vmem:[%s6386_s10 + $0xc4] sm:$0xff]  ;;  %v4657_v46 = vld [vmem:[%s6386_s10 + $0xcc] sm:$0xff] }
  0xab   : > { %v6627_v5 = vsel %vm1284_vm1, %v347_v55, %v616_v1  ;;  %v5653_v6 = vpop.permute.xlu0 %5652  ;;  %v4700_v55 = vld [vmem:[%s6386_s10 + $0xb6] sm:$0xff]  ;;  %v4699_v1 = vld [vmem:[%s6386_s10 + $0xae] sm:$0xff]  ;;  %v5639_v30 = vunpack.i.l.bf16 %v6590_v38  ;;  %v5635_v42 = vunpack.i.h.bf16 %v6592_v39  ;;  %v5634_v43 = vunpack.i.l.bf16 %v6592_v39 }
  0xac   : > { %v5655_v9 = vunpack.i.h.bf16 %v5653_v6  ;;  %v5654_v10 = vunpack.i.l.bf16 %v5653_v6  ;;  %5937 = vrot.lane.b32.xlu1 %v5936_v56, %s6255_s14  ;;  %v4701_v56 = vld [vmem:[%s6386_s10 + $0xbe] sm:$0xff] }
  0xad   : > { %5932 = vrot.lane.b32.xlu0 %v5931_v59, %s6255_s14  ;;  %v6257_v59 = vmov 0  }
  0xae   : > { %v6634_v13 = vsel %vm1284_vm1, %v345_v7, %v5654_v10  ;;  %v6637_v14 = vsel %vm1284_vm1, %v346_v8, %v5655_v9  ;;  %v6639_v15 = vpop.permute.xlu1 %5662  ;;  %6042 = vset.pattern.permute.xlu1 %v6257_v59  ;;  %321 = vst [vmem:[#allocation2] sm:$0xf] %v6257_v59  ;;  %322 = vst [vmem:[#allocation2 + $0x58] sm:$0xf] %v6257_v59  ;;  %6041 = vset.pattern.permute.xlu0 %v6257_v59  ;;  %v4587_v10 = vld [vmem:[%s6386_s10 + $0xb2] sm:$0xff] }
  0xaf   : > { %v6641_v16 = vpop.permute.xlu0 %5657 }
  0xb0   : > { %5947 = vrot.lane.b32.xlu1 %v5946_v11, %s6256_s21  ;;  %v4588_v11 = vld [vmem:[%s6386_s10 + $0xba] sm:$0xff] }
  0xb1   : > { %5942 = vrot.lane.b32.xlu0 %v5941_v12, %s6256_s21 }
  0xb2   : > { %v6647_v21 = vpop.permute.xlu1 %5672 }
  0xb3   : > { %v6651_v24 = vpop.permute.xlu0 %5667 }
  0xb4   : > { %5957 = vrot.lane.b32.xlu1 %v6459_v3, %s6251_s20  ;;  %v4654_v3 = vld [vmem:[%s6386_s10 + $0xb4] sm:$0xff] }
  0xb5   : > { %5952 = vrot.lane.b32.xlu0 %v6450_v62, %s6251_s20  ;;  %v6672_v41 = vpack.i.bf16 %v4655_v36, %v4654_v3  ;;  %v340_v36 = vld [vmem:[%s6386_s10 + $0x78] sm:$0xff] }
  0xb6   : > { %v6659_v31 = vpop.permute.xlu1 %5682 }
  0xb7   : > { %v6661_v32 = vpop.permute.xlu0 %5677 }
  0xb8   : > { %5967 = vrot.lane.b32.xlu1 %v5966_v26, %s6252_s26  ;;  %v4612_v26 = vld [vmem:[%s6386_s10 + $0xc3] sm:$0xf] }
  0xb9   : > { %5962 = vrot.lane.b32.xlu0 %v5961_v27, %s6252_s26 }
  0xba   : > { %v6667_v37 = vpop.permute.xlu1 %5692 }
  0xbb   : > { %v6669_v62 = vpop.permute.xlu0 %5687 }
  0xbc   : > { %5977 = vrot.lane.b32.xlu1 %v5976_v35, %s6253_s15  ;;  %v5690_v38 = vunpack.i.h.bf16 %v6669_v62 }
  0xbd   : > { %5972 = vrot.lane.b32.xlu0 %v6595_v40, %s6253_s15 }
  0xbe   : > { %v5703_v44 = vpop.permute.xlu1 %5702 }
  0xbf   : > { %v5705_v47 = vunpack.i.h.bf16 %v5703_v44  ;;  %v5704_v48 = vunpack.i.l.bf16 %v5703_v44  ;;  %v5698_v49 = vpop.permute.xlu0 %5697 }
  0xc0   : > { %v5700_v50 = vunpack.i.h.bf16 %v5698_v49  ;;  %v5699_v51 = vunpack.i.l.bf16 %v5698_v49  ;;  %5987 = vrot.lane.b32.xlu1 %v6672_v41, %s6254_s13  ;;  %v5695_v49 = vunpack.i.h.bf16 %v6667_v37 }
  0xc1   : > { %v6684_v40 = vsel %vm1308_vm2, %v6610_v57, %v5704_v48  ;;  %v6688_v53 = vsel %vm1308_vm2, %v6613_v58, %v5705_v47  ;;  %5982 = vrot.lane.b32.xlu0 %v5976_v35, %s6254_s13  ;;  %v339_v35 = vld [vmem:[%s6386_s10 + $0x70] sm:$0xff]  ;;  %v337_v47 = vld [vmem:[%s6386_s10 + $0x60] sm:$0xff]  ;;  %v338_v48 = vld [vmem:[%s6386_s10 + $0x68] sm:$0xff] }
  0xc2   : > { %v6695_v60 = vsel %vm1308_vm2, %v6619_v63, %v5699_v51  ;;  %v6699_v57 = vsel %vm1308_vm2, %v6622_v0, %v5700_v50  ;;  %v708_v58 = vpop.permute.xlu1 %707  ;;  %v6006_v63 = vpack.i.bf16 %v4701_v56, %v4700_v55  ;;  %v6001_v0 = vpack.i.bf16 %v4699_v1, %v4698_v61 }
  0xc3   : > { %v6705_v2 = vsel %vm1308_vm2, %v6627_v5, %v708_v58  ;;  %v5708_v4 = vpop.permute.xlu0 %5707  ;;  %v5694_v50 = vunpack.i.l.bf16 %v6667_v37  ;;  %v5689_v51 = vunpack.i.l.bf16 %v6669_v62  ;;  %v1299_v39 = vsel %vm1284_vm1, %v339_v35, %v5639_v30  ;;  %v4681_v35 = vld [vmem:[%s6386_s10 + $0xd5] sm:$0xf] }
  0xc4   : > { %v5710_v6 = vunpack.i.h.bf16 %v5708_v4  ;;  %v5709_v7 = vunpack.i.l.bf16 %v5708_v4  ;;  %5997 = vrot.lane.b32.xlu1 %v5996_v52, %s6255_s14  ;;  %v4635_v52 = vld [vmem:[%s6386_s10 + $0xc4] sm:$0xf]  ;;  %v6026_v56 = vpack.i.bf16 %v4657_v46, %v4656_v45  ;;  %v1297_v59 = vsel %vm1284_vm1, %v337_v47, %v5634_v43  ;;  %v4703_v43 = vld [vmem:[%s6386_s10 + $0xce] sm:$0xff] }
  0xc5   : > { %5992 = vrot.lane.b32.xlu0 %v5991_v54, %s6255_s14  ;;  %v1300_v54 = vsel %vm1284_vm1, %v340_v36, %v5640_v29  ;;  %v1298_v37 = vsel %vm1284_vm1, %v338_v48, %v5635_v42  ;;  %v1323_v62 = vsel %vm1308_vm2, %v1299_v39, %v5694_v50  ;;  %v5609_v30 = vunpack.i.l.bf16 %v6576_v28  ;;  %v4702_v42 = vld [vmem:[%s6386_s10 + $0xc6] sm:$0xff]  ;;  %v327_v47 = vld [vmem:[%s6386_s10 + $0x10] sm:$0xff]  ;;  %v328_v48 = vld [vmem:[%s6386_s10 + $0x18] sm:$0xff] }
  0xc6   : > { %v6711_v8 = vsel %vm1308_vm2, %v6634_v13, %v5709_v7  ;;  %v6715_v5 = vsel %vm1308_vm2, %v6637_v14, %v5710_v6  ;;  %v6717_v9 = vpop.permute.xlu1 %5717  ;;  %v6011_v13 = vpack.i.bf16 %v4588_v11, %v4587_v10  ;;  %v4611_v14 = vld [vmem:[%s6386_s10 + $0xbb] sm:$0xff]  ;;  %v1324_v4 = vsel %vm1308_vm2, %v1300_v54, %v5695_v49 }
  0xc7   : > { %v6721_v12 = vpop.permute.xlu0 %5712  ;;  %v6016_v27 = vpack.i.bf16 %v4611_v14, %v4610_v22  ;;  %v5605_v45 = vunpack.i.h.bf16 %v6566_v20  ;;  %v5604_v46 = vunpack.i.l.bf16 %v6566_v20  ;;  %v5665_v49 = vunpack.i.h.bf16 %v6639_v15 }
  0xc8   : > { %6007 = vrot.lane.b32.xlu1 %v6006_v63, %s6256_s21  ;;  %v1321_v63 = vsel %vm1308_vm2, %v1297_v59, %v5689_v51  ;;  %v5664_v50 = vunpack.i.l.bf16 %v6639_v15  ;;  %v325_v51 = vld [vmem:[%s6386_s10] sm:$0xff]  ;;  %v5659_v39 = vunpack.i.l.bf16 %v6641_v16  ;;  %v5719_v20 = vunpack.i.l.bf16 %v6717_v9 }
  0xc9   : > { %6002 = vrot.lane.b32.xlu0 %v6001_v0, %s6256_s21  ;;  %v1322_v0 = vsel %vm1308_vm2, %v1298_v37, %v5690_v38  ;;  %v1287_v15 = vsel %vm1284_vm1, %v327_v47, %v5609_v30  ;;  %v5715_v37 = vunpack.i.h.bf16 %v6721_v12 }
  0xca   : > { %v6726_v19 = vpop.permute.xlu1 %5727 }
  0xcb   : > { %v6730_v23 = vpop.permute.xlu0 %5722 }
  0xcc   : > { %799 = vrot.lane.b32.xlu1 %v4589_v18, %s6251_s20  ;;  %v4658_v18 = vld [vmem:[%s6386_s10 + $0xd4] sm:$0xf] }
  0xcd   : > { %6012 = vrot.lane.b32.xlu0 %v6011_v13, %s6251_s20 }
  0xce   : > { %v6738_v3 = vpop.permute.xlu1 %5737 }
  0xcf   : > { %v6743_v44 = vpop.permute.xlu0 %5732 }
  0xd0   : > { %891 = vrot.lane.b32.xlu1 %v4612_v26, %s6252_s26  ;;  %v4679_v26 = vld [vmem:[%s6386_s10 + $0xc5] sm:$0xff] }
  0xd1   : > { %6017 = vrot.lane.b32.xlu0 %v6016_v27, %s6252_s26  ;;  %v4680_v27 = vld [vmem:[%s6386_s10 + $0xcd] sm:$0xff] }
  0xd2   : > { %v5748_v55 = vpop.permute.xlu1 %5747  ;;  %v6031_v36 = vpack.i.bf16 %v4680_v27, %v4679_v26 }
  0xd3   : > { %v5750_v58 = vunpack.i.h.bf16 %v5748_v55  ;;  %v5749_v61 = vunpack.i.l.bf16 %v5748_v55  ;;  %v5743_v1 = vpop.permute.xlu0 %5742  ;;  %v5720_v55 = vunpack.i.h.bf16 %v6717_v9 }
  0xd4   : > { %v5745_v6 = vunpack.i.h.bf16 %v5743_v1  ;;  %v5744_v7 = vunpack.i.l.bf16 %v5743_v1  ;;  %983 = vrot.lane.b32.xlu1 %v4635_v52, %s6253_s15  ;;  %v326_v52 = vld [vmem:[%s6386_s10 + $0x8] sm:$0xff]  ;;  %v1311_v1 = vsel %vm1308_vm2, %v1287_v15, %v5664_v50 }
  0xd5   : > { %v6766_v10 = vsel %vm1332_vm3, %v1323_v62, %v5749_v61  ;;  %v6769_v11 = vsel %vm1332_vm3, %v1324_v4, %v5750_v58  ;;  %6022 = vrot.lane.b32.xlu0 %v6672_v41, %s6253_s15  ;;  %v5610_v41 = vunpack.i.h.bf16 %v6576_v28  ;;  %v5660_v28 = vunpack.i.h.bf16 %v6641_v16  ;;  %v4704_v16 = vld [vmem:[%s6386_s10 + $0xd6] sm:$0xf] }
  0xd6   : > { %v6775_v13 = vsel %vm1332_vm3, %v1321_v63, %v5744_v7  ;;  %v6778_v22 = vsel %vm1332_vm3, %v1322_v0, %v5745_v6  ;;  %v6780_v14 = vpop.permute.xlu1 %5757  ;;  %v5714_v58 = vunpack.i.l.bf16 %v6721_v12  ;;  %v1285_v61 = vsel %vm1284_vm1, %v325_v51, %v5604_v46 }
  0xd7   : > { %v6784_v29 = vpop.permute.xlu0 %5752  ;;  %v1288_v59 = vsel %vm1284_vm1, %v328_v48, %v5610_v41  ;;  %v1286_v9 = vsel %vm1284_vm1, %v326_v52, %v5605_v45  ;;  %v1309_v6 = vsel %vm1308_vm2, %v1285_v61, %v5659_v39  ;;  %v5760_v12 = vunpack.i.h.bf16 %v6780_v14 }
  0xd8   : > { %1075 = vrot.lane.b32.xlu1 %v4658_v18, %s6254_s13  ;;  %v1312_v62 = vsel %vm1308_vm2, %v1288_v59, %v5665_v49  ;;  %v1310_v7 = vsel %vm1308_vm2, %v1286_v9, %v5660_v28  ;;  %v5759_v63 = vunpack.i.l.bf16 %v6780_v14  ;;  %v1335_v18 = vsel %vm1332_vm3, %v1311_v1, %v5719_v20  ;;  %v1708_v14 = vld [vmem:[%s8282_s5 + $0x8] sm:$0xff] }
  0xd9   : > { %6027 = vrot.lane.b32.xlu0 %v6026_v56, %s6254_s13  ;;  %v6036_v56 = vpack.i.bf16 %v4703_v43, %v4702_v42  ;;  %v1336_v26 = vsel %vm1332_vm3, %v1312_v62, %v5720_v55  ;;  %v5755_v27 = vunpack.i.h.bf16 %v6784_v29  ;;  %v5754_v41 = vunpack.i.l.bf16 %v6784_v29  ;;  %v1707_v29 = vld [vmem:[%s8282_s5] sm:$0xff]  ;;  %v1710_v62 = vld [vmem:[%s8282_s5 + $0x18] sm:$0xff] }
  0xda   : > { %v5768_v38 = vpop.permute.xlu1 %5767  ;;  %v1333_v30 = vsel %vm1332_vm3, %v1309_v6, %v5714_v58  ;;  %v1359_v49 = vsel %vm1356_vm4, %v1335_v18, %v5759_v63  ;;  %v1360_v50 = vsel %vm1356_vm4, %v1336_v26, %v5760_v12 }
  0xdb   : > { %v5763_v54 = vpop.permute.xlu0 %5762  ;;  %v5769_v42 = vunpack.i.l.bf16 %v5768_v38  ;;  %v1357_v28 = vsel %vm1356_vm4, %v1333_v30, %v5754_v41 }
  0xdc   : > { %1167 = vrot.lane.b32.xlu1 %v4681_v35, %s6255_s14  ;;  %v1334_v35 = vsel %vm1332_vm3, %v1310_v7, %v5715_v37  ;;  %v5765_v43 = vunpack.i.h.bf16 %v5763_v54  ;;  %v5764_v45 = vunpack.i.l.bf16 %v5763_v54  ;;  %v1709_v37 = vld [vmem:[%s8282_s5 + $0x10] sm:$0xff] }
  0xdd   : > { %6032 = vrot.lane.b32.xlu0 %v6031_v36, %s6255_s14  ;;  %v5770_v36 = vunpack.i.h.bf16 %v5768_v38  ;;  %v1358_v39 = vsel %vm1356_vm4, %v1334_v35, %v5755_v27  ;;  %v1383_v20 = vsel %vm1380_vm5, %v1359_v49, %v5769_v42  ;;  %v1728_v42 = vld [vmem:[%s8282_s5 + $0xa8] sm:$0xff]  ;;  %v5620_v49 = vunpack.i.h.bf16 %v6572_v25 }
  0xde   : > { %v5778_v4 = vpop.permute.xlu1 %5777  ;;  %v1381_v58 = vsel %vm1380_vm5, %v1357_v28, %v5764_v45  ;;  %v331_v28 = vld [vmem:[%s6386_s10 + $0x30] sm:$0xff] }
  0xdf   : > { %v5773_v0 = vpop.permute.xlu0 %5772  ;;  %v5780_v46 = vunpack.i.h.bf16 %v5778_v4  ;;  %v5779_v47 = vunpack.i.l.bf16 %v5778_v4 }
  0xe0   : > { %1259 = vrot.lane.b32.xlu1 %v4704_v16, %s6256_s21  ;;  %v5775_v38 = vunpack.i.h.bf16 %v5773_v0  ;;  %v5774_v51 = vunpack.i.l.bf16 %v5773_v0  ;;  %v1382_v16 = vsel %vm1380_vm5, %v1358_v39, %v5765_v43  ;;  %v332_v39 = vld [vmem:[%s6386_s10 + $0x38] sm:$0xff] }
  0xe1   : > { %6037 = vrot.lane.b32.xlu0 %v6036_v56, %s6256_s21  ;;  %v1384_v56 = vsel %vm1380_vm5, %v1360_v50, %v5770_v36  ;;  %v1407_v61 = vsel %vm1404_vm6, %v1383_v20, %v5779_v47  ;;  %v1729_v47 = vld [vmem:[%s8282_s5 + $0xb0] sm:$0xf]  ;;  %v5619_v50 = vunpack.i.l.bf16 %v6572_v25  ;;  %v1712_v20 = vld [vmem:[%s8282_s5 + $0x28] sm:$0xff]  ;;  %s7219_s21 = scalar_lea.vmem [#allocation3], %s6486_s25 }
  0xe2   : > { %v5788_v48 = vpop.permute.xlu1 %5787  ;;  %v1408_v9 = vsel %vm1404_vm6, %v1384_v56, %v5780_v46  ;;  %v1405_v4 = vsel %vm1404_vm6, %v1381_v58, %v5774_v51  ;;  %v1406_v6 = vsel %vm1404_vm6, %v1382_v16, %v5775_v38  ;;  %v1711_v38 = vld [vmem:[%s8282_s5 + $0x20] sm:$0xff]  ;;  %v5615_v51 = vunpack.i.h.bf16 %v6562_v17 }
  0xe3   : > { %v5783_v52 = vpop.permute.xlu0 %5782  ;;  %v5790_v55 = vunpack.i.h.bf16 %v5788_v48  ;;  %v5789_v54 = vunpack.i.l.bf16 %v5788_v48  ;;  %v329_v56 = vld [vmem:[%s6386_s10 + $0x20] sm:$0xff]  ;;  %v5730_v58 = vunpack.i.h.bf16 %v6726_v19  ;;  %v5729_v16 = vunpack.i.l.bf16 %v6726_v19 }
  0xe4   : > { %1737 = vperm.xlu1 %6042, %v1708_v14   ;;  %v5785_v15 = vunpack.i.h.bf16 %v5783_v52  ;;  %v5784_v59 = vunpack.i.l.bf16 %v5783_v52  ;;  %v5614_v52 = vunpack.i.l.bf16 %v6562_v17 }
  0xe5   : > { %1732 = vperm.xlu0 %6041, %v1707_v29   ;;  %v1431_v0 = vsel %vm1428_vm7, %v1407_v61, %v5789_v54  ;;  %v1432_v18 = vsel %vm1428_vm7, %v1408_v9, %v5790_v55  ;;  %v5675_v55 = vunpack.i.h.bf16 %v6647_v21  ;;  %v5674_v54 = vunpack.i.l.bf16 %v6647_v21 }
  0xe6   : > { %v5798_v1 = vpop.permute.xlu1 %5797  ;;  %v1429_v35 = vsel %vm1428_vm7, %v1405_v4, %v5784_v59  ;;  %v1430_v36 = vsel %vm1428_vm7, %v1406_v6, %v5785_v15  ;;  %v330_v15 = vld [vmem:[%s6386_s10 + $0x28] sm:$0xff]  ;;  %v5670_v59 = vunpack.i.h.bf16 %v6651_v24  ;;  %v1291_v21 = vsel %vm1284_vm1, %v331_v28, %v5619_v50 }
  0xe7   : > { %v5800_v7 = vunpack.i.h.bf16 %v5798_v1  ;;  %v5799_v12 = vunpack.i.l.bf16 %v5798_v1  ;;  %v5793_v63 = vpop.permute.xlu0 %5792  ;;  %v1292_v61 = vsel %vm1284_vm1, %v332_v39, %v5620_v49  ;;  %v5725_v9 = vunpack.i.h.bf16 %v6730_v23 }
  0xe8   : > { %v5795_v26 = vunpack.i.h.bf16 %v5793_v63  ;;  %v5794_v27 = vunpack.i.l.bf16 %v5793_v63  ;;  %1742 = vperm.xlu1 %6042, %v1709_v37   ;;  %v5669_v37 = vunpack.i.l.bf16 %v6651_v24  ;;  %v5724_v1 = vunpack.i.l.bf16 %v6730_v23 }
  0xe9   : > { %v1455_v41 = vsel %vm1452_vm8, %v1431_v0, %v5799_v12  ;;  %v1456_v30 = vsel %vm1452_vm8, %v1432_v18, %v5800_v7  ;;  %1747 = vperm.xlu0 %6041, %v1710_v62   ;;  %v1713_v62 = vld [vmem:[%s8282_s5 + $0x30] sm:$0xff]  ;;  %v1289_v24 = vsel %vm1284_vm1, %v329_v56, %v5614_v52  ;;  %v1290_v4 = vsel %vm1284_vm1, %v330_v15, %v5615_v51  ;;  %v1714_v12 = vld [vmem:[%s8282_s5 + $0x38] sm:$0xff] }
  0xea   : > { %v1477_v14 = vpack.c.bf16 %v1456_v30, %v1455_v41  ;;  %v6861_v43 = vpop.permute.xlu1 %5807  ;;  %v1453_v45 = vsel %vm1452_vm8, %v1429_v35, %v5794_v27  ;;  %v1454_v46 = vsel %vm1452_vm8, %v1430_v36, %v5795_v26  ;;  %v1315_v19 = vsel %vm1308_vm2, %v1291_v21, %v5674_v54 }
  0xeb   : > { %v6868_v48 = vpop.permute.xlu0 %5802  ;;  %v1476_v29 = vpack.c.bf16 %v1454_v46, %v1453_v45  ;;  %v1316_v6 = vsel %vm1308_vm2, %v1292_v61, %v5675_v55  ;;  %v1313_v23 = vsel %vm1308_vm2, %v1289_v24, %v5669_v37  ;;  %v1314_v63 = vsel %vm1308_vm2, %v1290_v4, %v5670_v59 }
  0xec   : > { %1837 = vperm.xlu1 %6042, %v1728_v42   ;;  %v5810_v0 = vunpack.i.h.bf16 %v6861_v43  ;;  %v5809_v18 = vunpack.i.l.bf16 %v6861_v43  ;;  %v1339_v27 = vsel %vm1332_vm3, %v1315_v19, %v5729_v16  ;;  %v1340_v41 = vsel %vm1332_vm3, %v1316_v6, %v5730_v58  ;;  %v1715_v43 = vld [vmem:[%s8282_s5 + $0x40] sm:$0xff] }
  0xed   : > { %5238 = vmatprep.mubr.msk.bf16.mxu0 %vm1515_vm9, %v1476_v29  ;;  %1842 = vperm.xlu0 %6041, %v1729_v47   ;;  %v5805_v30 = vunpack.i.h.bf16 %v6868_v48  ;;  %v5804_v35 = vunpack.i.l.bf16 %v6868_v48  ;;  %v1337_v36 = vsel %vm1332_vm3, %v1313_v23, %v5724_v1  ;;  %v1338_v42 = vsel %vm1332_vm3, %v1314_v63, %v5725_v9  ;;  %v1716_v48 = vld [vmem:[%s8282_s5 + $0x48] sm:$0xff]  ;;  %v1718_v1 = vld [vmem:[%s8282_s5 + $0x58] sm:$0xff] }
  0xee   : > { %5239 = vmatmul.mubr.msk.bf16.vlgmr.msra.gmra.mrb[0].mxu0 %vm1515_vm9, %v1477_v14  ;;  %v5818_v25 = vpop.permute.xlu1 %5817  ;;  %v1364_v51 = vsel %vm1356_vm4, %v1340_v41, %v5810_v0  ;;  %v1719_v41 = vld [vmem:[%s8282_s5 + $0x60] sm:$0xff] }
  0xef   : > { %v5813_v17 = vpop.permute.xlu0 %5812  ;;  %v5820_v14 = vunpack.i.h.bf16 %v5818_v25  ;;  %v5819_v45 = vunpack.i.l.bf16 %v5818_v25  ;;  %v1361_v55 = vsel %vm1356_vm4, %v1337_v36, %v5804_v35  ;;  %v1362_v54 = vsel %vm1356_vm4, %v1338_v42, %v5805_v30 }
  0xf0   : > { %1752 = vperm.xlu1 %6042, %v1711_v38   ;;  %v5815_v46 = vunpack.i.h.bf16 %v5813_v17  ;;  %v5814_v47 = vunpack.i.l.bf16 %v5813_v17  ;;  %v1363_v38 = vsel %vm1356_vm4, %v1339_v27, %v5809_v18  ;;  %v1717_v17 = vld [vmem:[%s8282_s5 + $0x50] sm:$0xff] }
  0xf1   : > { %1757 = vperm.xlu0 %6041, %v1712_v20   ;;  %v1387_v56 = vsel %vm1380_vm5, %v1363_v38, %v5819_v45  ;;  %v1388_v15 = vsel %vm1380_vm5, %v1364_v51, %v5820_v14  ;;  %v1720_v14 = vld [vmem:[%s8282_s5 + $0x68] sm:$0xff]  ;;  %v5624_v38 = vunpack.i.l.bf16 %v6584_v34  ;;  %v5685_v51 = vunpack.i.h.bf16 %v6659_v31 }
  0xf2   : > { %v5828_v7 = vpop.permute.xlu1 %5827  ;;  %v1385_v58 = vsel %vm1380_vm5, %v1361_v55, %v5814_v47  ;;  %v1386_v16 = vsel %vm1380_vm5, %v1362_v54, %v5815_v46  ;;  %v5630_v46 = vunpack.i.h.bf16 %v6582_v33  ;;  %v5629_v47 = vunpack.i.l.bf16 %v6582_v33  ;;  %v334_v55 = vld [vmem:[%s6386_s10 + $0x48] sm:$0xff] }
  0xf3   : > { %v5823_v26 = vpop.permute.xlu0 %5822  ;;  %v5830_v29 = vunpack.i.h.bf16 %v5828_v7  ;;  %v5829_v49 = vunpack.i.l.bf16 %v5828_v7  ;;  %v5680_v54 = vunpack.i.h.bf16 %v6661_v32 }
  0xf4   : > { %1762 = vperm.xlu1 %6042, %v1713_v62   ;;  %v5825_v52 = vunpack.i.h.bf16 %v5823_v26  ;;  %v5824_v28 = vunpack.i.l.bf16 %v5823_v26 }
  0xf5   : > { %1767 = vperm.xlu0 %6041, %v1714_v12   ;;  %v1411_v21 = vsel %vm1404_vm6, %v1387_v56, %v5829_v49  ;;  %v1412_v61 = vsel %vm1404_vm6, %v1388_v15, %v5830_v29  ;;  %v1721_v29 = vld [vmem:[%s8282_s5 + $0x70] sm:$0xff]  ;;  %v5739_v56 = vunpack.i.l.bf16 %v6738_v3 }
  0xf6   : > { %v5838_v50 = vpop.permute.xlu1 %5837  ;;  %v1409_v62 = vsel %vm1404_vm6, %v1385_v58, %v5824_v28  ;;  %v1410_v24 = vsel %vm1404_vm6, %v1386_v16, %v5825_v52  ;;  %v335_v49 = vld [vmem:[%s6386_s10 + $0x50] sm:$0xff]  ;;  %v5684_v52 = vunpack.i.l.bf16 %v6659_v31  ;;  %v1722_v28 = vld [vmem:[%s8282_s5 + $0x78] sm:$0xff] }
  0xf7   : > { %v5833_v39 = vpop.permute.xlu0 %5832  ;;  %v5840_v25 = vunpack.i.h.bf16 %v5838_v50  ;;  %v5839_v20 = vunpack.i.l.bf16 %v5838_v50  ;;  %v336_v50 = vld [vmem:[%s6386_s10 + $0x58] sm:$0xff]  ;;  %v1295_v31 = vsel %vm1284_vm1, %v335_v49, %v5629_v47 }
  0xf8   : > { %1772 = vperm.xlu1 %6042, %v1715_v43   ;;  %v5835_v59 = vunpack.i.h.bf16 %v5833_v39  ;;  %v5834_v37 = vunpack.i.l.bf16 %v5833_v39  ;;  %v333_v39 = vld [vmem:[%s6386_s10 + $0x40] sm:$0xff]  ;;  %v1296_v15 = vsel %vm1284_vm1, %v336_v50, %v5630_v46 }
  0xf9   : > { %1777 = vperm.xlu0 %6041, %v1716_v48   ;;  %v1435_v7 = vsel %vm1428_vm7, %v1411_v21, %v5839_v20  ;;  %v1436_v12 = vsel %vm1428_vm7, %v1412_v61, %v5840_v25  ;;  %v5625_v48 = vunpack.i.h.bf16 %v6584_v34  ;;  %v5679_v25 = vunpack.i.l.bf16 %v6661_v32  ;;  %v1724_v61 = vld [vmem:[%s8282_s5 + $0x88] sm:$0xff] }
  0xfa   : > { %v5848_v9 = vpop.permute.xlu1 %5847  ;;  %v1433_v0 = vsel %vm1428_vm7, %v1409_v62, %v5834_v37  ;;  %v1434_v18 = vsel %vm1428_vm7, %v1410_v24, %v5835_v59  ;;  %v5740_v34 = vunpack.i.h.bf16 %v6738_v3  ;;  %v5735_v59 = vunpack.i.h.bf16 %v6743_v44 }
  0xfb   : > { %v5850_v4 = vunpack.i.h.bf16 %v5848_v9  ;;  %v5849_v19 = vunpack.i.l.bf16 %v5848_v9  ;;  %v5843_v6 = vpop.permute.xlu0 %5842  ;;  %v5734_v37 = vunpack.i.l.bf16 %v6743_v44  ;;  %v1293_v32 = vsel %vm1284_vm1, %v333_v39, %v5624_v38 }
  0xfc   : > { %v5845_v23 = vunpack.i.h.bf16 %v5843_v6  ;;  %v5844_v63 = vunpack.i.l.bf16 %v5843_v6  ;;  %1782 = vperm.xlu1 %6042, %v1717_v17   ;;  %v1723_v17 = vld [vmem:[%s8282_s5 + $0x80] sm:$0xff]  ;;  %v1294_v58 = vsel %vm1284_vm1, %v334_v55, %v5625_v48  ;;  %v1319_v3 = vsel %vm1308_vm2, %v1295_v31, %v5684_v52 }
  0xfd   : > { %v1459_v26 = vsel %vm1452_vm8, %v1435_v7, %v5849_v19  ;;  %v1460_v27 = vsel %vm1452_vm8, %v1436_v12, %v5850_v4  ;;  %1787 = vperm.xlu0 %6041, %v1718_v1   ;;  %v1320_v16 = vsel %vm1308_vm2, %v1296_v15, %v5685_v51  ;;  %v1317_v44 = vsel %vm1308_vm2, %v1293_v32, %v5679_v25 }
  0xfe   : > { %v1479_v30 = vpack.c.bf16 %v1460_v27, %v1459_v26  ;;  %v1457_v35 = vsel %vm1452_vm8, %v1433_v0, %v5844_v63  ;;  %v1458_v36 = vsel %vm1452_vm8, %v1434_v18, %v5845_v23  ;;  %v6951_v42 = vpop.permute.xlu1 %5857  ;;  %v1318_v9 = vsel %vm1308_vm2, %v1294_v58, %v5680_v54  ;;  %v1725_v18 = vld [vmem:[%s8282_s5 + $0x90] sm:$0xff] }
  0xff   : > { %v1478_v45 = vpack.c.bf16 %v1458_v36, %v1457_v35  ;;  %v6956_v43 = vpop.permute.xlu0 %5852  ;;  %v5860_v1 = vunpack.i.h.bf16 %v6951_v42  ;;  %v5859_v62 = vunpack.i.l.bf16 %v6951_v42  ;;  %v1343_v4 = vsel %vm1332_vm3, %v1319_v3, %v5739_v56  ;;  %v1726_v36 = vld [vmem:[%s8282_s5 + $0x98] sm:$0xff] }
 0x100   : > { %1792 = vperm.xlu1 %6042, %v1719_v41   ;;  %v1344_v19 = vsel %vm1332_vm3, %v1320_v16, %v5740_v34  ;;  %v5855_v6 = vunpack.i.h.bf16 %v6956_v43  ;;  %v5854_v7 = vunpack.i.l.bf16 %v6956_v43  ;;  %v1341_v12 = vsel %vm1332_vm3, %v1317_v44, %v5734_v37 }
 0x101   : > { %5242 = vmatprep.mubr.msk.bf16.mxu0 %vm1515_vm9, %v1478_v45  ;;  %1797 = vperm.xlu0 %6041, %v1720_v14   ;;  %v1342_v23 = vsel %vm1332_vm3, %v1318_v9, %v5735_v59  ;;  %v1367_v42 = vsel %vm1356_vm4, %v1343_v4, %v5859_v62  ;;  %v1368_v14 = vsel %vm1356_vm4, %v1344_v19, %v5860_v1  ;;  %vm2196_vm2 = vcmask 1042432  }
 0x102   : > { %5243 = vmatmul.mubr.msk.bf16.gmra.mrb[4].mxu0 %vm1515_vm9, %v1479_v30  ;;  %v5868_v33 = vpop.permute.xlu1 %5867  ;;  %v1365_v47 = vsel %vm1356_vm4, %v1341_v12, %v5854_v7 }
 0x103   : > { %v5863_v20 = vpop.permute.xlu0 %5862  ;;  %v5870_v63 = vunpack.i.h.bf16 %v5868_v33  ;;  %v5869_v0 = vunpack.i.l.bf16 %v5868_v33  ;;  %v1727_v33 = vld [vmem:[%s8282_s5 + $0xa0] sm:$0xff] }
 0x104   : > { %1802 = vperm.xlu1 %6042, %v1721_v29   ;;  %v5865_v26 = vunpack.i.h.bf16 %v5863_v20  ;;  %v5864_v27 = vunpack.i.l.bf16 %v5863_v20  ;;  %v1366_v29 = vsel %vm1356_vm4, %v1342_v23, %v5855_v6 }
 0x105   : > { %1807 = vperm.xlu0 %6041, %v1722_v28   ;;  %v1391_v48 = vsel %vm1380_vm5, %v1367_v42, %v5869_v0  ;;  %v1392_v38 = vsel %vm1380_vm5, %v1368_v14, %v5870_v63 }
 0x106   : > { %v5878_v21 = vpop.permute.xlu1 %5877  ;;  %v1389_v28 = vsel %vm1380_vm5, %v1365_v47, %v5864_v27  ;;  %v1390_v39 = vsel %vm1380_vm5, %v1366_v29, %v5865_v26 }
 0x107   : > { %v5873_v24 = vpop.permute.xlu0 %5872  ;;  %v5880_v41 = vunpack.i.h.bf16 %v5878_v21  ;;  %v5879_v30 = vunpack.i.l.bf16 %v5878_v21 }
 0x108   : > { %1812 = vperm.xlu1 %6042, %v1723_v17   ;;  %v5875_v45 = vunpack.i.h.bf16 %v5873_v24  ;;  %v5874_v43 = vunpack.i.l.bf16 %v5873_v24 }
 0x109   : > { %1817 = vperm.xlu0 %6041, %v1724_v61   ;;  %v1415_v55 = vsel %vm1404_vm6, %v1391_v48, %v5879_v30  ;;  %v1416_v54 = vsel %vm1404_vm6, %v1392_v38, %v5880_v41 }
 0x10a   : > { %v5888_v35 = vpop.permute.xlu1 %5887  ;;  %v1413_v20 = vsel %vm1404_vm6, %v1389_v28, %v5874_v43  ;;  %v1414_v34 = vsel %vm1404_vm6, %v1390_v39, %v5875_v45 }
 0x10b   : > { %v5883_v46 = vpop.permute.xlu0 %5882  ;;  %v5890_v49 = vunpack.i.h.bf16 %v5888_v35  ;;  %v5889_v50 = vunpack.i.l.bf16 %v5888_v35 }
 0x10c   : > { %1822 = vperm.xlu1 %6042, %v1725_v18   ;;  %v5885_v51 = vunpack.i.h.bf16 %v5883_v46  ;;  %v5884_v52 = vunpack.i.l.bf16 %v5883_v46 }
 0x10d   : > { %1827 = vperm.xlu0 %6041, %v1726_v36   ;;  %v1439_v59 = vsel %vm1428_vm7, %v1415_v55, %v5889_v50  ;;  %v1440_v37 = vsel %vm1428_vm7, %v1416_v54, %v5890_v49 }
 0x10e   : > { %v5898_v25 = vpop.permute.xlu1 %5897  ;;  %v1437_v58 = vsel %vm1428_vm7, %v1413_v20, %v5884_v52  ;;  %v1438_v3 = vsel %vm1428_vm7, %v1414_v34, %v5885_v51 }
 0x10f   : > { %v5900_v56 = vunpack.i.h.bf16 %v5898_v25  ;;  %v5899_v31 = vunpack.i.l.bf16 %v5898_v25  ;;  %v5893_v15 = vpop.permute.xlu0 %5892 }
 0x110   : > { %v5895_v17 = vunpack.i.h.bf16 %v5893_v15  ;;  %v5894_v32 = vunpack.i.l.bf16 %v5893_v15  ;;  %1832 = vperm.xlu1 %6042, %v1727_v33  }
 0x111   : > { %v1463_v16 = vsel %vm1452_vm8, %v1439_v59, %v5899_v31  ;;  %v1464_v21 = vsel %vm1452_vm8, %v1440_v37, %v5900_v56 }
 0x112   : > { %v1481_v61 = vpack.c.bf16 %v1464_v21, %v1463_v16  ;;  %v1461_v44 = vsel %vm1452_vm8, %v1437_v58, %v5894_v32  ;;  %v1462_v9 = vsel %vm1452_vm8, %v1438_v3, %v5895_v17  ;;  %v5908_v1 = vpop.permute.xlu1 %5907 }
 0x113   : > { %v1480_v62 = vpack.c.bf16 %v1462_v9, %v1461_v44  ;;  %v5903_v24 = vpop.permute.xlu0 %5902  ;;  %v5910_v7 = vunpack.i.h.bf16 %v5908_v1  ;;  %v5909_v12 = vunpack.i.l.bf16 %v5908_v1 }
 0x114   : > { %v5905_v63 = vunpack.i.h.bf16 %v5903_v24  ;;  %v5904_v0 = vunpack.i.l.bf16 %v5903_v24 }
 0x115   : > { %5246 = vmatprep.mubr.msk.bf16.mxu0 %vm1515_vm9, %v1480_v62  ;;  %v1371_v42 = vsel %vm1356_vm4, %v6766_v10, %v5909_v12  ;;  %v1372_v14 = vsel %vm1356_vm4, %v6769_v11, %v5910_v7 }
 0x116   : > { %5247 = vmatmul.mubr.msk.bf16.gmra.mrb[8].mxu0 %vm1515_vm9, %v1481_v61  ;;  %v5918_v4 = vpop.permute.xlu1 %5917  ;;  %v1369_v47 = vsel %vm1356_vm4, %v6775_v13, %v5904_v0  ;;  %v1370_v29 = vsel %vm1356_vm4, %v6778_v22, %v5905_v63 }
 0x117   : > { %v5913_v19 = vpop.permute.xlu0 %5912  ;;  %v5920_v18 = vunpack.i.h.bf16 %v5918_v4  ;;  %v5919_v26 = vunpack.i.l.bf16 %v5918_v4 }
 0x118   : > { %v5915_v27 = vunpack.i.h.bf16 %v5913_v19  ;;  %v5914_v41 = vunpack.i.l.bf16 %v5913_v19 }
 0x119   : > { %v1395_v48 = vsel %vm1380_vm5, %v1371_v42, %v5919_v26  ;;  %v1396_v38 = vsel %vm1380_vm5, %v1372_v14, %v5920_v18 }
 0x11a   : > { %v5928_v6 = vpop.permute.xlu1 %5927  ;;  %v1393_v52 = vsel %vm1380_vm5, %v1369_v47, %v5914_v41  ;;  %v1394_v11 = vsel %vm1380_vm5, %v1370_v29, %v5915_v27 }
 0x11b   : > { %v5923_v23 = vpop.permute.xlu0 %5922  ;;  %v5930_v30 = vunpack.i.h.bf16 %v5928_v6  ;;  %v5929_v35 = vunpack.i.l.bf16 %v5928_v6 }
 0x11c   : > { %v5925_v45 = vunpack.i.h.bf16 %v5923_v23  ;;  %v5924_v43 = vunpack.i.l.bf16 %v5923_v23 }
 0x11d   : > { %v1419_v33 = vsel %vm1404_vm6, %v1395_v48, %v5929_v35  ;;  %v1420_v28 = vsel %vm1404_vm6, %v1396_v38, %v5930_v30 }
 0x11e   : > { %v5938_v36 = vpop.permute.xlu1 %5937  ;;  %v1417_v39 = vsel %vm1404_vm6, %v1393_v52, %v5924_v43  ;;  %v1418_v22 = vsel %vm1404_vm6, %v1394_v11, %v5925_v45 }
 0x11f   : > { %v5933_v46 = vpop.permute.xlu0 %5932  ;;  %v5940_v49 = vunpack.i.h.bf16 %v5938_v36  ;;  %v5939_v50 = vunpack.i.l.bf16 %v5938_v36 }
 0x120   : > { %v5935_v51 = vunpack.i.h.bf16 %v5933_v46  ;;  %v5934_v10 = vunpack.i.l.bf16 %v5933_v46 }
 0x121   : > { %v1443_v20 = vsel %vm1428_vm7, %v1419_v33, %v5939_v50  ;;  %v1444_v34 = vsel %vm1428_vm7, %v1420_v28, %v5940_v49 }
 0x122   : > { %v5948_v13 = vpop.permute.xlu1 %5947  ;;  %v1441_v15 = vsel %vm1428_vm7, %v1417_v39, %v5934_v10  ;;  %v1442_v59 = vsel %vm1428_vm7, %v1418_v22, %v5935_v51 }
 0x123   : > { %v5950_v55 = vunpack.i.h.bf16 %v5948_v13  ;;  %v5949_v54 = vunpack.i.l.bf16 %v5948_v13  ;;  %v5943_v25 = vpop.permute.xlu0 %5942 }
 0x124   : > { %v5945_v56 = vunpack.i.h.bf16 %v5943_v25  ;;  %v5944_v31 = vunpack.i.l.bf16 %v5943_v25 }
 0x125   : > { %v1467_v37 = vsel %vm1452_vm8, %v1443_v20, %v5949_v54  ;;  %v1468_v17 = vsel %vm1452_vm8, %v1444_v34, %v5950_v55 }
 0x126   : > { %v1483_v32 = vpack.c.bf16 %v1468_v17, %v1467_v37  ;;  %v1465_v58 = vsel %vm1452_vm8, %v1441_v15, %v5944_v31  ;;  %v1466_v3 = vsel %vm1452_vm8, %v1442_v59, %v5945_v56  ;;  %v5958_v16 = vpop.permute.xlu1 %5957 }
 0x127   : > { %v1482_v21 = vpack.c.bf16 %v1466_v3, %v1465_v58  ;;  %v5953_v61 = vpop.permute.xlu0 %5952  ;;  %v5960_v24 = vunpack.i.h.bf16 %v5958_v16  ;;  %v5959_v4 = vunpack.i.l.bf16 %v5958_v16 }
 0x128   : > { %v5955_v19 = vunpack.i.h.bf16 %v5953_v61  ;;  %v5954_v6 = vunpack.i.l.bf16 %v5953_v61 }
 0x129   : > { %5250 = vmatprep.mubr.msk.bf16.mxu0 %vm1515_vm9, %v1482_v21  ;;  %v1351_v0 = vsel %vm1332_vm3, %v6684_v40, %v5959_v4  ;;  %v1352_v18 = vsel %vm1332_vm3, %v6688_v53, %v5960_v24 }
 0x12a   : > { %5251 = vmatmul.mubr.msk.bf16.gmra.mrb[12].mxu0 %vm1515_vm9, %v1483_v32  ;;  %v5968_v44 = vpop.permute.xlu1 %5967  ;;  %v1349_v41 = vsel %vm1332_vm3, %v6695_v60, %v5954_v6  ;;  %v1350_v30 = vsel %vm1332_vm3, %v6699_v57, %v5955_v19 }
 0x12b   : > { %v5963_v9 = vpop.permute.xlu0 %5962  ;;  %v5970_v12 = vunpack.i.h.bf16 %v5968_v44  ;;  %v5969_v23 = vunpack.i.l.bf16 %v5968_v44 }
 0x12c   : > { %v5965_v26 = vunpack.i.h.bf16 %v5963_v9  ;;  %v5964_v27 = vunpack.i.l.bf16 %v5963_v9 }
 0x12d   : > { %v1375_v40 = vsel %vm1356_vm4, %v1351_v0, %v5969_v23  ;;  %v1376_v47 = vsel %vm1356_vm4, %v1352_v18, %v5970_v12 }
 0x12e   : > { %v5978_v1 = vpop.permute.xlu1 %5977  ;;  %v1373_v50 = vsel %vm1356_vm4, %v1349_v41, %v5964_v27  ;;  %v1374_v60 = vsel %vm1356_vm4, %v1350_v30, %v5965_v26 }
 0x12f   : > { %v5973_v62 = vpop.permute.xlu0 %5972  ;;  %v5980_v35 = vunpack.i.h.bf16 %v5978_v1  ;;  %v5979_v36 = vunpack.i.l.bf16 %v5978_v1 }
 0x130   : > { %v5975_v42 = vunpack.i.h.bf16 %v5973_v62  ;;  %v5974_v14 = vunpack.i.l.bf16 %v5973_v62 }
 0x131   : > { %v1399_v38 = vsel %vm1380_vm5, %v1375_v40, %v5979_v36  ;;  %v1400_v51 = vsel %vm1380_vm5, %v1376_v47, %v5980_v35 }
 0x132   : > { %v5988_v7 = vpop.permute.xlu1 %5987  ;;  %v1397_v11 = vsel %vm1380_vm5, %v1373_v50, %v5974_v14  ;;  %v1398_v33 = vsel %vm1380_vm5, %v1374_v60, %v5975_v42 }
 0x133   : > { %v5983_v63 = vpop.permute.xlu0 %5982  ;;  %v5990_v45 = vunpack.i.h.bf16 %v5988_v7  ;;  %v5989_v43 = vunpack.i.l.bf16 %v5988_v7 }
 0x134   : > { %v5985_v53 = vunpack.i.h.bf16 %v5983_v63  ;;  %v5984_v29 = vunpack.i.l.bf16 %v5983_v63 }
 0x135   : > { %v1423_v28 = vsel %vm1404_vm6, %v1399_v38, %v5989_v43  ;;  %v1424_v13 = vsel %vm1404_vm6, %v1400_v51, %v5990_v45 }
 0x136   : > { %v5998_v46 = vpop.permute.xlu1 %5997  ;;  %v1421_v22 = vsel %vm1404_vm6, %v1397_v11, %v5984_v29  ;;  %v1422_v55 = vsel %vm1404_vm6, %v1398_v33, %v5985_v53 }
 0x137   : > { %v5993_v49 = vpop.permute.xlu0 %5992  ;;  %v6000_v48 = vunpack.i.h.bf16 %v5998_v46  ;;  %v5999_v57 = vunpack.i.l.bf16 %v5998_v46 }
 0x138   : > { %v5995_v10 = vunpack.i.h.bf16 %v5993_v49  ;;  %v5994_v52 = vunpack.i.l.bf16 %v5993_v49 }
 0x139   : > { %v1447_v34 = vsel %vm1428_vm7, %v1423_v28, %v5999_v57  ;;  %v1448_v56 = vsel %vm1428_vm7, %v1424_v13, %v6000_v48  ;;  %v7117_v13 = vld [vmem:[%s8279_s2] ss:$0 sm:$0xff] }
 0x13a   : > { %v6008_v39 = vpop.permute.xlu1 %6007  ;;  %v1445_v59 = vsel %vm1428_vm7, %v1421_v22, %v5994_v52  ;;  %v1446_v37 = vsel %vm1428_vm7, %v1422_v55, %v5995_v10 }
 0x13b   : > { %v6010_v54 = vunpack.i.h.bf16 %v6008_v39  ;;  %v6009_v25 = vunpack.i.l.bf16 %v6008_v39  ;;  %v6003_v20 = vpop.permute.xlu0 %6002 }
 0x13c   : > { %v6005_v31 = vunpack.i.h.bf16 %v6003_v20  ;;  %v6004_v15 = vunpack.i.l.bf16 %v6003_v20 }
 0x13d   : > { %v1471_v17 = vsel %vm1452_vm8, %v1447_v34, %v6009_v25  ;;  %v1472_v32 = vsel %vm1452_vm8, %v1448_v56, %v6010_v54 }
 0x13e   : > { %v1485_v58 = vpack.c.bf16 %v1472_v32, %v1471_v17  ;;  %v1469_v3 = vsel %vm1452_vm8, %v1445_v59, %v6004_v15  ;;  %v1470_v16 = vsel %vm1452_vm8, %v1446_v37, %v6005_v31  ;;  %v800_v21 = vpop.permute.xlu1 %799 }
 0x13f   : > { %v1484_v61 = vpack.c.bf16 %v1470_v16, %v1469_v3  ;;  %v6013_v44 = vpop.permute.xlu0 %6012  ;;  %v1355_v41 = vsel %vm1332_vm3, %v6705_v2, %v800_v21 }
 0x140   : > { %v6015_v6 = vunpack.i.h.bf16 %v6013_v44  ;;  %v6014_v7 = vunpack.i.l.bf16 %v6013_v44 }
 0x141   : > { %5254 = vmatprep.mubr.msk.bf16.mxu0 %vm1515_vm9, %v1484_v61 }
 0x142   : > { %5255 = vmatmul.mubr.msk.bf16.gmra.mrb[16].mxu0 %vm1515_vm9, %v1485_v58  ;;  %v892_v9 = vpop.permute.xlu1 %891  ;;  %v1353_v30 = vsel %vm1332_vm3, %v6711_v8, %v6014_v7  ;;  %v1354_v35 = vsel %vm1332_vm3, %v6715_v5, %v6015_v6  ;;  %vm2197_vm3 = vsmask.f32 2304 }
 0x143   : > { %v6018_v1 = vpop.permute.xlu0 %6017  ;;  %v1379_v42 = vsel %vm1356_vm4, %v1355_v41, %v892_v9 }
 0x144   : > { %v6019_v12 = vunpack.i.l.bf16 %v6018_v1  ;;  %v6020_v23 = vunpack.i.h.bf16 %v6018_v1 }
 0x146   : > { %v984_v62 = vpop.permute.xlu1 %983  ;;  %v1377_v14 = vsel %vm1356_vm4, %v1353_v30, %v6019_v12  ;;  %v1378_v46 = vsel %vm1356_vm4, %v1354_v35, %v6020_v23  ;;  %vm2198_vm4 = vmand %vm2196_vm2, %vm2197_vm3 }
 0x147   : > { %v6023_v24 = vpop.permute.xlu0 %6022  ;;  %v1403_v40 = vsel %vm1380_vm5, %v1379_v42, %v984_v62 }
 0x148   : > { %v6024_v63 = vunpack.i.l.bf16 %v6023_v24  ;;  %v6025_v18 = vunpack.i.h.bf16 %v6023_v24 }
 0x14a   : > { %v1076_v4 = vpop.permute.xlu1 %1075  ;;  %v1401_v47 = vsel %vm1380_vm5, %v1377_v14, %v6024_v63  ;;  %v1402_v53 = vsel %vm1380_vm5, %v1378_v46, %v6025_v18 }
 0x14b   : > { %v6028_v19 = vpop.permute.xlu0 %6027  ;;  %v1427_v8 = vsel %vm1404_vm6, %v1403_v40, %v1076_v4 }
 0x14c   : > { %v6029_v26 = vunpack.i.l.bf16 %v6028_v19  ;;  %v6030_v36 = vunpack.i.h.bf16 %v6028_v19 }
 0x14e   : > { %v1168_v0 = vpop.permute.xlu1 %1167  ;;  %v1425_v5 = vsel %vm1404_vm6, %v1401_v47, %v6029_v26  ;;  %v1426_v49 = vsel %vm1404_vm6, %v1402_v53, %v6030_v36  ;;  %v2172_v26 = vld [vmem:[#allocation2] sm:$0xf] }
 0x14f   : > { %v6033_v27 = vpop.permute.xlu0 %6032  ;;  %v1451_v50 = vsel %vm1428_vm7, %v1427_v8, %v1168_v0 }
 0x150   : > { %v6035_v45 = vunpack.i.h.bf16 %v6033_v27  ;;  %v6034_v43 = vunpack.i.l.bf16 %v6033_v27 }
 0x152   : > { %v1260_v2 = vpop.permute.xlu1 %1259  ;;  %v1449_v57 = vsel %vm1428_vm7, %v1425_v5, %v6034_v43  ;;  %v1450_v38 = vsel %vm1428_vm7, %v1426_v49, %v6035_v45 }
 0x153   : > { %v6038_v29 = vpop.permute.xlu0 %6037  ;;  %v1475_v51 = vsel %vm1452_vm8, %v1451_v50, %v1260_v2 }
 0x154   : > { %v6040_v60 = vunpack.i.h.bf16 %v6038_v29  ;;  %v6039_v48 = vunpack.i.l.bf16 %v6038_v29  ;;  %v1487_v33 = vpack.c.bf16 %v1475_v51, %v1475_v51 }
 0x156   : > { %v1473_v10 = vsel %vm1452_vm8, %v1449_v57, %v6039_v48  ;;  %v1474_v52 = vsel %vm1452_vm8, %v1450_v38, %v6040_v60 }
 0x157   : > { %v1486_v11 = vpack.c.bf16 %v1474_v52, %v1473_v10 }
 0x159   : > { %5258 = vmatprep.mubr.msk.bf16.mxu0 %vm1515_vm9, %v1486_v11 }
 0x15a   : > { %5259 = vmatmul.mubr.msk.bf16.gmra.mrb[20].mxu0 %vm1515_vm9, %v1487_v33 }
 0x163   : > { %v1738_v28 = vpop.permute.xlu1 %1737 }
 0x164   : > { %v1733_v39 = vpop.permute.xlu0 %1732 }
 0x167   : > { %v1743_v34 = vpop.permute.xlu1 %1742 }
 0x168   : > { %v1748_v17 = vpop.permute.xlu0 %1747 }
 0x16b   : > { %v7123_v19 = vpop.permute.xlu1 %1837 }
 0x16c   : > { %v7125_v0 = vpop.permute.xlu0 %1842 }
 0x16f   : > { %v1753_v8 = vpop.permute.xlu1 %1752 }
 0x170   : > { %v1758_v50 = vpop.permute.xlu0 %1757 }
 0x173   : > { %v1763_v10 = vpop.permute.xlu1 %1762 }
 0x1c1   : > { %v5240_v22 = vpop.f32.mrb[0].mxu0 }
 0x1c2   : > { %v1599_v55 = vadd.f32 %v5240_v22, %v7117_v13  ;;  %v1590_v54 = vpop.f32.mrb[1].mxu0  ;;  %v1768_v22 = vpop.permute.xlu0 %1767 }
 0x1c3   : > { %v1591_v25 = vadd.f32 %v7117_v13, %v1590_v54  ;;  %v5241_v20 = vpop.f32.mrb[2].mxu0 }
 0x1c4   : > { %v1686_v56 = vmax.f32 %v1599_v55, 0.0  ;;  %v1602_v31 = vadd.f32 %v5241_v20, %v7117_v13  ;;  %v1593_v15 = vpop.f32.mrb[3].mxu0 }
 0x1c5   : > { %v1684_v59 = vmax.f32 %v1591_v25, 0.0  ;;  %v1594_v37 = vadd.f32 %v7117_v13, %v1593_v15 }
 0x1c6   : > { %v1687_v32 = vmax.f32 %v1602_v31, 0.0  ;;  %v1847_v58 = vmul.f32 %v1743_v34, %v1686_v56 }
 0x1c7   : > { %v1845_v3 = vmul.f32 %v1733_v39, %v1684_v59  ;;  %v1685_v16 = vmax.f32 %v1594_v37, 0.0 }
 0x1c8   : > { %v4889_v21 = vpack.c.bf16 %v1847_v58, %v1847_v58  ;;  %v1848_v61 = vmul.f32 %v1748_v17, %v1687_v32 }
 0x1c9   : > { %v4887_v44 = vpack.c.bf16 %v1845_v3, %v1845_v3  ;;  %v1846_v9 = vmul.f32 %v1738_v28, %v1685_v16 }
 0x1ca   : > { %v1959_v1 = vshrl.u32 %v4889_v21, 16  ;;  %v4890_v62 = vpack.c.bf16 %v1848_v61, %v1848_v61  ;;  %v1962_v27 = vshll.u32 %v4889_v21, 16 }
 0x1cb   : > { %v1942_v24 = vshrl.u32 %v4887_v44, 16  ;;  %v4888_v4 = vpack.c.bf16 %v1846_v9, %v1846_v9  ;;  %v1945_v23 = vshll.u32 %v4887_v44, 16 }
 0x1cc   : > { %v1961_v6 = vrot.slane %v1959_v1, 7  ;;  %v1968_v7 = vshrl.u32 %v4890_v62, 16  ;;  %v1971_v30 = vshll.u32 %v4890_v62, 16 }
 0x1cd   : > { %v1944_v12 = vrot.slane %v1942_v24, 7  ;;  %v1950_v63 = vshrl.u32 %v4888_v4, 16  ;;  %v1953_v14 = vshll.u32 %v4888_v4, 16 }
 0x1ce   : > { %v7131_v41 = vrot.slane %v1968_v7, 7  ;;  %v1964_v45 = vor.u32 %v1962_v27, %v1961_v6  ;;  %v1966_v43 = vrot.slane %v1961_v6, 4 }
 0x1cf   : > { %v1947_v35 = vor.u32 %v1945_v23, %v1944_v12  ;;  %v1952_v42 = vrot.slane %v1950_v63, 7  ;;  %v1948_v40 = vrot.slane %v1944_v12, 4 }
 0x1d0   : > { %v1973_v46 = vor.u32 %v1971_v30, %v7131_v41  ;;  %v1975_v62 = vrot.slane %v7131_v41, 4  ;;  %v1773_v30 = vpop.permute.xlu1 %1772 }
 0x1d1   : > { %v2173_v47 = vsel %vm7127_vm14, %v1947_v35, %v2172_v26  ;;  %v1955_v2 = vor.u32 %v1953_v14, %v1952_v42  ;;  %v1957_v53 = vrot.slane %v1952_v42, 4  ;;  %v1778_v14 = vpop.permute.xlu0 %1777 }
 0x1d2   : > { %2174 = vst [vmem:[#allocation2] sm:$0xf] %v2173_v47  ;;  %v1974_v5 = vsel %vm7133_vm15, %v1966_v43, %v1973_v46 }
 0x1d3   : > { %v1956_v29 = vsel %vm7133_vm15, %v1948_v40, %v1955_v2  ;;  %v1965_v49 = vsel %vm7133_vm15, %v1957_v53, %v1964_v45  ;;  %2177 = vst [vmem:[#allocation2 + $0xc] sm:$0xf] %v1974_v5 }
 0x1d4   : > { %2175 = vst [vmem:[#allocation2 + $0x4] sm:$0xf] %v1956_v29  ;;  %2176 = vst [vmem:[#allocation2 + $0x8] sm:$0xf] %v1965_v49  ;;  %v1783_v2 = vpop.permute.xlu1 %1782 }
 0x1d5   : > { %v5244_v60 = vpop.f32.mrb[4].mxu0 }
 0x1d6   : > { %v1615_v48 = vadd.f32 %v5244_v60, %v7117_v13  ;;  %v1606_v57 = vpop.f32.mrb[5].mxu0 }
 0x1d7   : > { %v1607_v38 = vadd.f32 %v7117_v13, %v1606_v57  ;;  %v5245_v51 = vpop.f32.mrb[6].mxu0 }
 0x1d8   : > { %v1690_v52 = vmax.f32 %v1615_v48, 0.0  ;;  %v1618_v11 = vadd.f32 %v5245_v51, %v7117_v13  ;;  %v1609_v33 = vpop.f32.mrb[7].mxu0 }
 0x1d9   : > { %v1688_v28 = vmax.f32 %v1607_v38, 0.0  ;;  %v1610_v39 = vadd.f32 %v7117_v13, %v1609_v33 }
 0x1da   : > { %v1691_v55 = vmax.f32 %v1618_v11, 0.0  ;;  %v1851_v54 = vmul.f32 %v1763_v10, %v1690_v52 }
 0x1db   : > { %v1849_v25 = vmul.f32 %v1753_v8, %v1688_v28  ;;  %v1689_v20 = vmax.f32 %v1610_v39, 0.0 }
 0x1dc   : > { %v4893_v34 = vpack.c.bf16 %v1851_v54, %v1851_v54  ;;  %v1852_v56 = vmul.f32 %v1768_v22, %v1691_v55 }
 0x1dd   : > { %v4891_v31 = vpack.c.bf16 %v1849_v25, %v1849_v25  ;;  %v1850_v15 = vmul.f32 %v1758_v50, %v1689_v20  ;;  %v1788_v50 = vpop.permute.xlu0 %1787 }
 0x1de   : > { %v1995_v59 = vshrl.u32 %v4893_v34, 16  ;;  %v4894_v37 = vpack.c.bf16 %v1852_v56, %v1852_v56  ;;  %v1998_v44 = vshll.u32 %v4893_v34, 16 }
 0x1df   : > { %v1977_v17 = vshrl.u32 %v4891_v31, 16  ;;  %v4892_v32 = vpack.c.bf16 %v1850_v15, %v1850_v15  ;;  %v1980_v21 = vshll.u32 %v4891_v31, 16 }
 0x1e0   : > { %v1997_v58 = vrot.slane %v1995_v59, 7  ;;  %v2004_v3 = vshrl.u32 %v4894_v37, 16  ;;  %v2007_v1 = vshll.u32 %v4894_v37, 16 }
 0x1e1   : > { %v1979_v16 = vrot.slane %v1977_v17, 7  ;;  %v1986_v61 = vshrl.u32 %v4892_v32, 16  ;;  %v1989_v6 = vshll.u32 %v4892_v32, 16 }
 0x1e2   : > { %v7150_v9 = vrot.slane %v2004_v3, 7  ;;  %v2000_v7 = vor.u32 %v1998_v44, %v1997_v58  ;;  %v2002_v12 = vrot.slane %v1997_v58, 4 }
 0x1e3   : > { %v1982_v24 = vor.u32 %v1980_v21, %v1979_v16  ;;  %v1988_v4 = vrot.slane %v1986_v61, 7  ;;  %v1984_v18 = vrot.slane %v1979_v16, 4 }
 0x1e4   : > { %v2009_v23 = vor.u32 %v2007_v1, %v7150_v9  ;;  %v2011_v59 = vrot.slane %v7150_v9, 4 }
 0x1e5   : > { %v1983_v63 = vsel %vm7133_vm15, %v1975_v62, %v1982_v24  ;;  %v1991_v26 = vor.u32 %v1989_v6, %v1988_v4  ;;  %v1993_v27 = vrot.slane %v1988_v4, 4  ;;  %v1793_v4 = vpop.permute.xlu1 %1792  ;;  %v1798_v6 = vpop.permute.xlu0 %1797 }
 0x1e6   : > { %2178 = vst [vmem:[#allocation2 + $0x10] sm:$0xf] %v1983_v63  ;;  %v2010_v35 = vsel %vm7133_vm15, %v2002_v12, %v2009_v23 }
 0x1e7   : > { %v1992_v41 = vsel %vm7133_vm15, %v1984_v18, %v1991_v26  ;;  %v2001_v42 = vsel %vm7133_vm15, %v1993_v27, %v2000_v7  ;;  %2181 = vst [vmem:[#allocation2 + $0x1c] sm:$0xf] %v2010_v35 }
 0x1e8   : > { %2179 = vst [vmem:[#allocation2 + $0x14] sm:$0xf] %v1992_v41  ;;  %2180 = vst [vmem:[#allocation2 + $0x18] sm:$0xf] %v2001_v42 }
 0x1e9   : > { %v5248_v45 = vpop.f32.mrb[8].mxu0  ;;  %v1803_v35 = vpop.permute.xlu1 %1802 }
 0x1ea   : > { %v1631_v43 = vadd.f32 %v5248_v45, %v7117_v13  ;;  %v1622_v46 = vpop.f32.mrb[9].mxu0 }
 0x1eb   : > { %v1623_v40 = vadd.f32 %v7117_v13, %v1622_v46  ;;  %v5249_v47 = vpop.f32.mrb[10].mxu0 }
 0x1ec   : > { %v1694_v53 = vmax.f32 %v1631_v43, 0.0  ;;  %v1634_v8 = vadd.f32 %v5249_v47, %v7117_v13  ;;  %v1625_v5 = vpop.f32.mrb[11].mxu0 }
 0x1ed   : > { %v1692_v29 = vmax.f32 %v1623_v40, 0.0  ;;  %v1626_v49 = vadd.f32 %v7117_v13, %v1625_v5 }
 0x1ee   : > { %v1695_v60 = vmax.f32 %v1634_v8, 0.0  ;;  %v1855_v48 = vmul.f32 %v1783_v2, %v1694_v53 }
 0x1ef   : > { %v1853_v57 = vmul.f32 %v1773_v30, %v1692_v29  ;;  %v1693_v38 = vmax.f32 %v1626_v49, 0.0 }
 0x1f0   : > { %v4897_v51 = vpack.c.bf16 %v1855_v48, %v1855_v48  ;;  %v1856_v10 = vmul.f32 %v1788_v50, %v1695_v60 }
 0x1f1   : > { %v4895_v52 = vpack.c.bf16 %v1853_v57, %v1853_v57  ;;  %v1854_v11 = vmul.f32 %v1778_v14, %v1693_v38  ;;  %v1808_v14 = vpop.permute.xlu0 %1807 }
 0x1f2   : > { %v2031_v33 = vshrl.u32 %v4897_v51, 16  ;;  %v4898_v28 = vpack.c.bf16 %v1856_v10, %v1856_v10  ;;  %v2034_v56 = vshll.u32 %v4897_v51, 16 }
 0x1f3   : > { %v2013_v39 = vshrl.u32 %v4895_v52, 16  ;;  %v4896_v22 = vpack.c.bf16 %v1854_v11, %v1854_v11  ;;  %v2016_v20 = vshll.u32 %v4895_v52, 16 }
 0x1f4   : > { %v2033_v55 = vrot.slane %v2031_v33, 7  ;;  %v2040_v54 = vshrl.u32 %v4898_v28, 16  ;;  %v2043_v15 = vshll.u32 %v4898_v28, 16 }
 0x1f5   : > { %v2015_v25 = vrot.slane %v2013_v39, 7  ;;  %v2022_v34 = vshrl.u32 %v4896_v22, 16  ;;  %v2025_v32 = vshll.u32 %v4896_v22, 16 }
 0x1f6   : > { %v7166_v31 = vrot.slane %v2040_v54, 7  ;;  %v2036_v58 = vor.u32 %v2034_v56, %v2033_v55  ;;  %v2038_v3 = vrot.slane %v2033_v55, 4 }
 0x1f7   : > { %v2018_v37 = vor.u32 %v2016_v20, %v2015_v25  ;;  %v2024_v17 = vrot.slane %v2022_v34, 7  ;;  %v2020_v61 = vrot.slane %v2015_v25, 4 }
 0x1f8   : > { %v2045_v16 = vor.u32 %v2043_v15, %v7166_v31  ;;  %v2047_v33 = vrot.slane %v7166_v31, 4 }
 0x1f9   : > { %v2019_v21 = vsel %vm7133_vm15, %v2011_v59, %v2018_v37  ;;  %v2027_v44 = vor.u32 %v2025_v32, %v2024_v17  ;;  %v2029_v1 = vrot.slane %v2024_v17, 4  ;;  %v1813_v17 = vpop.permute.xlu1 %1812  ;;  %v1818_v32 = vpop.permute.xlu0 %1817 }
 0x1fa   : > { %2182 = vst [vmem:[#allocation2 + $0x20] sm:$0xf] %v2019_v21  ;;  %v2046_v62 = vsel %vm7133_vm15, %v2038_v3, %v2045_v16 }
 0x1fb   : > { %v2028_v9 = vsel %vm7133_vm15, %v2020_v61, %v2027_v44  ;;  %v2037_v24 = vsel %vm7133_vm15, %v2029_v1, %v2036_v58  ;;  %2185 = vst [vmem:[#allocation2 + $0x2c] sm:$0xf] %v2046_v62 }
 0x1fc   : > { %2183 = vst [vmem:[#allocation2 + $0x24] sm:$0xf] %v2028_v9  ;;  %2184 = vst [vmem:[#allocation2 + $0x28] sm:$0xf] %v2037_v24 }
 0x1fd   : > { %v5252_v7 = vpop.f32.mrb[12].mxu0  ;;  %v1823_v9 = vpop.permute.xlu1 %1822 }
 0x1fe   : > { %v1647_v12 = vadd.f32 %v5252_v7, %v7117_v13  ;;  %v1638_v23 = vpop.f32.mrb[13].mxu0 }
 0x1ff   : > { %v1639_v63 = vadd.f32 %v7117_v13, %v1638_v23  ;;  %v5253_v18 = vpop.f32.mrb[14].mxu0 }
 0x200   : > { %v1698_v26 = vmax.f32 %v1647_v12, 0.0  ;;  %v1650_v27 = vadd.f32 %v5253_v18, %v7117_v13  ;;  %v1641_v30 = vpop.f32.mrb[15].mxu0  ;;  %v1828_v12 = vpop.permute.xlu0 %1827 }
 0x201   : > { %v1696_v41 = vmax.f32 %v1639_v63, 0.0  ;;  %v1642_v42 = vadd.f32 %v7117_v13, %v1641_v30 }
 0x202   : > { %v1859_v45 = vmul.f32 %v1803_v35, %v1698_v26  ;;  %v1699_v43 = vmax.f32 %v1650_v27, 0.0 }
 0x203   : > { %v1857_v46 = vmul.f32 %v1793_v4, %v1696_v41  ;;  %v1697_v40 = vmax.f32 %v1642_v42, 0.0 }
 0x204   : > { %v4901_v47 = vpack.c.bf16 %v1859_v45, %v1859_v45  ;;  %v1860_v2 = vmul.f32 %v1808_v14, %v1699_v43 }
 0x205   : > { %v4899_v53 = vpack.c.bf16 %v1857_v46, %v1857_v46  ;;  %v1858_v8 = vmul.f32 %v1798_v6, %v1697_v40 }
 0x206   : > { %v2067_v5 = vshrl.u32 %v4901_v47, 16  ;;  %v4902_v29 = vpack.c.bf16 %v1860_v2, %v1860_v2  ;;  %v2070_v10 = vshll.u32 %v4901_v47, 16 }
 0x207   : > { %v2049_v49 = vshrl.u32 %v4899_v53, 16  ;;  %v4900_v50 = vpack.c.bf16 %v1858_v8, %v1858_v8  ;;  %v2052_v38 = vshll.u32 %v4899_v53, 16 }
 0x208   : > { %v2069_v60 = vrot.slane %v2067_v5, 7  ;;  %v2076_v48 = vshrl.u32 %v4902_v29, 16  ;;  %v2079_v11 = vshll.u32 %v4902_v29, 16 }
 0x209   : > { %v2051_v57 = vrot.slane %v2049_v49, 7  ;;  %v2058_v51 = vshrl.u32 %v4900_v50, 16  ;;  %v2061_v22 = vshll.u32 %v4900_v50, 16 }
 0x20a   : > { %v7182_v52 = vrot.slane %v2076_v48, 7  ;;  %v2072_v55 = vor.u32 %v2070_v10, %v2069_v60  ;;  %v2074_v54 = vrot.slane %v2069_v60, 4 }
 0x20b   : > { %v2054_v28 = vor.u32 %v2052_v38, %v2051_v57  ;;  %v2060_v39 = vrot.slane %v2058_v51, 7  ;;  %v2056_v34 = vrot.slane %v2051_v57, 4 }
 0x20c   : > { %v2081_v25 = vor.u32 %v2079_v11, %v7182_v52  ;;  %v2083_v5 = vrot.slane %v7182_v52, 4 }
 0x20d   : > { %v2055_v20 = vsel %vm7133_vm15, %v2047_v33, %v2054_v28  ;;  %v2063_v56 = vor.u32 %v2061_v22, %v2060_v39  ;;  %v2065_v15 = vrot.slane %v2060_v39, 4 }
 0x20e   : > { %2186 = vst [vmem:[#allocation2 + $0x30] sm:$0xf] %v2055_v20  ;;  %v2082_v59 = vsel %vm7133_vm15, %v2074_v54, %v2081_v25 }
 0x20f   : > { %v2064_v31 = vsel %vm7133_vm15, %v2056_v34, %v2063_v56  ;;  %v2073_v37 = vsel %vm7133_vm15, %v2065_v15, %v2072_v55  ;;  %2189 = vst [vmem:[#allocation2 + $0x3c] sm:$0xf] %v2082_v59  ;;  %v1833_v59 = vpop.permute.xlu1 %1832 }
 0x210   : > { %2187 = vst [vmem:[#allocation2 + $0x34] sm:$0xf] %v2064_v31  ;;  %2188 = vst [vmem:[#allocation2 + $0x38] sm:$0xf] %v2073_v37 }
 0x215   : > { %v5256_v58 = vpop.f32.mrb[16].mxu0 }
 0x216   : > { %v1663_v3 = vadd.f32 %v5256_v58, %v7117_v13  ;;  %v1654_v16 = vpop.f32.mrb[17].mxu0 }
 0x217   : > { %v1655_v21 = vadd.f32 %v7117_v13, %v1654_v16  ;;  %v5257_v61 = vpop.f32.mrb[18].mxu0 }
 0x218   : > { %v1702_v44 = vmax.f32 %v1663_v3, 0.0  ;;  %v1666_v1 = vadd.f32 %v5257_v61, %v7117_v13  ;;  %v1657_v62 = vpop.f32.mrb[19].mxu0 }
 0x219   : > { %v1700_v24 = vmax.f32 %v1655_v21, 0.0  ;;  %v1658_v4 = vadd.f32 %v7117_v13, %v1657_v62 }
 0x21a   : > { %v1863_v6 = vmul.f32 %v1823_v9, %v1702_v44  ;;  %v1703_v7 = vmax.f32 %v1666_v1, 0.0 }
 0x21b   : > { %v1861_v23 = vmul.f32 %v1813_v17, %v1700_v24  ;;  %v1701_v63 = vmax.f32 %v1658_v4, 0.0 }
 0x21c   : > { %v4905_v18 = vpack.c.bf16 %v1863_v6, %v1863_v6  ;;  %v1864_v26 = vmul.f32 %v1828_v12, %v1703_v7 }
 0x21d   : > { %v4903_v27 = vpack.c.bf16 %v1861_v23, %v1861_v23  ;;  %v1862_v30 = vmul.f32 %v1818_v32, %v1701_v63 }
 0x21e   : > { %v2103_v35 = vshrl.u32 %v4905_v18, 16  ;;  %v4906_v41 = vpack.c.bf16 %v1864_v26, %v1864_v26  ;;  %v2106_v2 = vshll.u32 %v4905_v18, 16  ;;  %v2199_v18 = vld [vmem:[#allocation2 + $0x58] sm:$0x7] }
 0x21f   : > { %v2085_v42 = vshrl.u32 %v4903_v27, 16  ;;  %v4904_v14 = vpack.c.bf16 %v1862_v30, %v1862_v30  ;;  %v2088_v40 = vshll.u32 %v4903_v27, 16 }
 0x220   : > { %v2105_v45 = vrot.slane %v2103_v35, 7  ;;  %v2112_v43 = vshrl.u32 %v4906_v41, 16  ;;  %v2115_v8 = vshll.u32 %v4906_v41, 16  ;;  %v6258_v35 = vmov (!%p4744_p13), 0  }
 0x221   : > { %v2087_v46 = vrot.slane %v2085_v42, 7  ;;  %v2094_v47 = vshrl.u32 %v4904_v14, 16  ;;  %v2097_v50 = vshll.u32 %v4904_v14, 16  ;;  %2206 = vst [vmem:[#allocation2] sm:$0xf] (!%p4744_p13), %v6258_v35 }
 0x222   : > { %v2114_v53 = vrot.slane %v2112_v43, 7  ;;  %v2108_v60 = vor.u32 %v2106_v2, %v2105_v45  ;;  %v2110_v48 = vrot.slane %v2105_v45, 4  ;;  %2207 = vst [vmem:[#allocation2 + $0x4] sm:$0xf] (!%p4744_p13), %v6258_v35  ;;  %2208 = vst [vmem:[#allocation2 + $0x8] sm:$0x1] (!%p4744_p13), %v6258_v35 }
 0x223   : > { %v2090_v29 = vor.u32 %v2088_v40, %v2087_v46  ;;  %v2096_v49 = vrot.slane %v2094_v47, 7  ;;  %v2092_v51 = vrot.slane %v2087_v46, 4 }
 0x224   : > { %v2117_v57 = vor.u32 %v2115_v8, %v2114_v53 }
 0x225   : > { %v2091_v38 = vsel %vm7133_vm15, %v2083_v5, %v2090_v29  ;;  %v2099_v10 = vor.u32 %v2097_v50, %v2096_v49  ;;  %v2101_v11 = vrot.slane %v2096_v49, 4 }
 0x226   : > { %2190 = vst [vmem:[#allocation2 + $0x40] sm:$0xf] %v2091_v38  ;;  %v2118_v33 = vsel %vm7133_vm15, %v2110_v48, %v2117_v57 }
 0x227   : > { %2193 = vst [vmem:[#allocation2 + $0x4c] sm:$0xf] %v2118_v33  ;;  %v2100_v52 = vsel %vm7133_vm15, %v2092_v51, %v2099_v10  ;;  %v2109_v28 = vsel %vm7133_vm15, %v2101_v11, %v2108_v60 }
 0x228   : > { %2191 = vst [vmem:[#allocation2 + $0x44] sm:$0xf] %v2100_v52  ;;  %2192 = vst [vmem:[#allocation2 + $0x48] sm:$0xf] %v2109_v28 }
 0x22d   : > { %v5260_v39 = vpop.f32.mrb[20].mxu0 }
 0x22e   : > { %v1679_v22 = vadd.f32 %v5260_v39, %v7117_v13  ;;  %v1670_v55 = vpop.f32.mrb[21].mxu0 }
 0x22f   : > { %v1671_v54 = vadd.f32 %v7117_v13, %v1670_v55  ;;  %v5261_v25 = vpop.f32.mrb[22].mxu0 }
 0x230   : > { %v1706_v20 = vmax.f32 %v1679_v22, 0.0  ;;  %v1673_v34 = vpop.f32.mrb[23].mxu0 }
 0x231   : > { %v1704_v56 = vmax.f32 %v1671_v54, 0.0  ;;  %v1674_v15 = vadd.f32 %v7117_v13, %v1673_v34  ;;  %v2119_v13 = vrot.slane %v2114_v53, 4 }
 0x232   : > { %v1867_v31 = vmul.f32 %v7125_v0, %v1706_v20 }
 0x233   : > { %v1865_v37 = vmul.f32 %v1833_v59, %v1704_v56  ;;  %v1705_v17 = vmax.f32 %v1674_v15, 0.0 }
 0x234   : > { %v4909_v32 = vpack.c.bf16 %v1867_v31, %v1867_v31 }
 0x235   : > { %v4907_v58 = vpack.c.bf16 %v1865_v37, %v1865_v37  ;;  %v1866_v3 = vmul.f32 %v7123_v19, %v1705_v17 }
 0x236   : > { %v2139_v16 = vshrl.u32 %v4909_v32, 16  ;;  %v2142_v24 = vshll.u32 %v4909_v32, 16 }
 0x237   : > { %v2121_v21 = vshrl.u32 %v4907_v58, 16  ;;  %v4908_v61 = vpack.c.bf16 %v1866_v3, %v1866_v3  ;;  %v2124_v62 = vshll.u32 %v4907_v58, 16 }
 0x238   : > { %v2141_v44 = vrot.slane %v2139_v16, 7 }
 0x239   : > { %v2123_v1 = vrot.slane %v2121_v21, 7  ;;  %v2130_v9 = vshrl.u32 %v4908_v61, 16  ;;  %v2133_v6 = vshll.u32 %v4908_v61, 16 }
 0x23a   : > { %v2144_v7 = vor.u32 %v2142_v24, %v2141_v44 }
 0x23b   : > { %v2126_v4 = vor.u32 %v2124_v62, %v2123_v1  ;;  %v2132_v0 = vrot.slane %v2130_v9, 7  ;;  %v2128_v19 = vrot.slane %v2123_v1, 4  ;;  %2205 = sbr.rel (%p4744_p13) target bundleno = 578 (0x242), region = 56 }
 0x23d   : > { %v2127_v12 = vsel %vm7133_vm15, %v2119_v13, %v2126_v4  ;;  %v2135_v23 = vor.u32 %v2133_v6, %v2132_v0  ;;  %v2137_v63 = vrot.slane %v2132_v0, 4 }
 0x23e   : > { %2194 = vst [vmem:[#allocation2 + $0x50] sm:$0xf] %v2127_v12 }
 0x23f   : > { %v2136_v26 = vsel %vm7133_vm15, %v2128_v19, %v2135_v23  ;;  %v2145_v27 = vsel %vm7133_vm15, %v2137_v63, %v2144_v7 }
 0x240   : > { %2195 = vst [vmem:[#allocation2 + $0x54] sm:$0xf] %v2136_v26  ;;  %v2200_v30 = vsel %vm2198_vm4, %v2145_v27, %v2199_v18 }
 0x241   : > { %2201 = vst [vmem:[#allocation2 + $0x58] sm:$0x7] %v2200_v30 }
 0x242 PF: > { %p4745_p0 = scmp.ne.s32.totalorder %s6231_s30, 1 }
 0x243   : > { %v6259_v41 = vmov (!%p4745_p0), 0  }
 0x244   : > { %2212 = sbr.rel (%p4745_p0) target bundleno = 587 (0x24b), region = 60  ;;  %2213 = vst [vmem:[#allocation2 + $0x50] sm:$0xe] (!%p4745_p0), %v6259_v41  ;;  %2214 = vst [vmem:[#allocation2 + $0x54] sm:$0xf] (!%p4745_p0), %v6259_v41 }
 0x245   : > { %2215 = vst [vmem:[#allocation2 + $0x58] sm:$0x3] (!%p4745_p0), %v6259_v41 }
 0x24b PF: > { %v2247_v36 = vld [vmem:[%s8283_s6] sm:$0x3]  ;;  %v8293_v14 = vmov 0.0   ;;  %v4748_v46 = vld [vmem:[%s6386_s10 + $0x25] sm:$0xff]  ;;  %vm6261_vm5 = vmmov 0   ;;  %v4749_v40 = vld [vmem:[%s6386_s10 + $0x2d] sm:$0xff] }
 0x24c   : > { %v6046_v42 = vld [vmem:[%s8280_s3 + $0x40] sm:$0xff]   ;;  %5262 = vmatprep.subr.bf16.mxu1 %v8293_v14  ;;  %v2283_v45 = vsel %vm1552_vm0, %v2247_v36, 0  ;;  %5264 = vmatprep.mubr.msk.bf16.mxu1 %vm6261_vm5, %v8293_v14  ;;  %v2238_v47 = vpack.c.bf16 %v4749_v40, %v4748_v46  ;;  %v6049_v53 = vld [vmem:[%s8280_s3 + $0x48] sm:$0xff]   ;;  %v6051_v5 = vld [vmem:[%s8280_s3 + $0x50] sm:$0xff]   ;;  %vm2501_vm0 = vsmask.f32 7424 }
 0x24d   : > { %5263 = vmatpush3.bf16.msra.mxu1 %v2283_v45  ;;  %4935 = vmatprep.subr.bf16.mxu0 %v6046_v42  ;;  %v6047_v43 = vld [vmem:[%s8280_s3] sm:$0xff]   ;;  %v6050_v8 = vld [vmem:[%s8280_s3 + $0x8] sm:$0xff]   ;;  %v6052_v29 = vld [vmem:[%s8280_s3 + $0x10] sm:$0xff]   ;;  %vm3153_vm6 = vcmask 1046528   ;;  %vm2868_vm7 = vcmask 1044480   ;;  %vm4038_vm8 = vcmask 1045504  }
 0x24e   : > { %5300 = vmatprep.subr.bf16.mxu1 %v8293_v14  ;;  %4936 = vmatpush3.bf16.msra.mxu0 %v6047_v43  ;;  %v6048_v2 = vld [vmem:[%s8280_s3 + $0x200] sm:$0xff]   ;;  %v4750_v49 = vld [vmem:[%s6386_s10 + $0x35] sm:$0xff]  ;;  %v6054_v57 = vld [vmem:[%s8280_s3 + $0x208] sm:$0xff]   ;;  %s4401_s14 = smul.u32 18, %s6231_s30  ;;  %s8224_s15 = scalar_lea.sflag [#allocation4], %s310_s24 }
 0x24f   : > { %4937 = vmatprep.subr.bf16.mxu0 %v6049_v53  ;;  %v4751_v50 = vld [vmem:[%s6386_s10 + $0x3d] sm:$0xff]  ;;  %v4752_v11 = vld [vmem:[%s6386_s10 + $0x45] sm:$0xff]  ;;  %v4753_v33 = vld [vmem:[%s6386_s10 + $0x4d] sm:$0xff]  ;;  %s5515_s20 = smul.u32 36, %s6235_s9  ;;  %s4409_s9 = sshll.u32 %s7219_s21, 4  ;;  %s8219_s9 = int_to_ptr.vmem [resolvable:$true] %s4409_s9 }
 0x250   : > { %5265 = vmatmul.mubr.msk.bf16.vlgmr.msra.gmra.mrb[0].mxu1 %vm1284_vm1, %v2238_v47  ;;  %v6053_v60 = vld [vmem:[%s8280_s3 + $0x58] sm:$0xff]   ;;  %v2239_v48 = vpack.c.bf16 %v4751_v50, %v4750_v49  ;;  %v6056_v51 = vld [vmem:[%s8280_s3 + $0x60] sm:$0xff]   ;;  %v6058_v52 = vld [vmem:[%s8280_s3 + $0x68] sm:$0xff]   ;;  %v2240_v39 = vpack.c.bf16 %v4753_v33, %v4752_v11  ;;  %s6153_s22 = scalar_lea.vmem %s8219_s9, 2304  ;;  %s6262_s13 = smov [#allocation3]  }
 0x251   : > { %5301 = vmatpush3.bf16.msra.mxu1 %v6048_v2  ;;  %5268 = vmatprep.mubr.msk.bf16.mxu1 %vm6261_vm5, %v8293_v14  ;;  %v6055_v38 = vld [vmem:[%s8280_s3 + $0x18] sm:$0xff]   ;;  %v6057_v10 = vld [vmem:[%s8280_s3 + $0x20] sm:$0xff]   ;;  %v6060_v28 = vld [vmem:[%s8280_s3 + $0x210] sm:$0xff]   ;;  %p6154_p1 = scmp.ne.s32.totalorder %s8219_s9, %s6153_s22 }
 0x252   : > { %4938 = vmatpush3.bf16.msra.mxu0 %v6050_v8  ;;  %5302 = vmatprep.subr.bf16.mxu1 %v8293_v14  ;;  %v6059_v22 = vld [vmem:[%s8280_s3 + $0x28] sm:$0xff]   ;;  %v6061_v55 = vld [vmem:[%s8280_s3 + $0x70] sm:$0xff]   ;;  %v4755_v20 = vld [vmem:[%s6386_s10 + $0x5d] sm:$0xff] }
 0x253   : > { %4939 = vmatprep.subr.bf16.mxu0 %v6051_v5  ;;  %v4754_v54 = vld [vmem:[%s6386_s10 + $0x55] sm:$0xff]  ;;  %v2425_v56 = vld [vmem:[#allocation2] sm:$0xf]  ;;  %v7305_v15 = vld [vmem:[#allocation2 + $0x4] sm:$0xf]  ;;  %p6155_p2 = pnand %p6154_p1, %p6360_p3 }
 0x254   : > { %v6062_v25 = vld [vmem:[%s8280_s3 + $0x30] sm:$0xff]   ;;  %v6065_v34 = vld [vmem:[%s8280_s3 + $0x218] sm:$0xff]   ;;  %v4776_v59 = vcombine.low %v2425_v56, %v7305_v15  ;;  %v7308_v31 = vld [vmem:[#allocation2 + $0x8] sm:$0xff]   ;;  %v2241_v17 = vpack.c.bf16 %v4755_v20, %v4754_v54 }
 0x255   : > { %5303 = vmatpush3.bf16.msra.mxu1 %v6054_v57  ;;  %v6063_v37 = vld [vmem:[%s8280_s3 + $0x78] sm:$0xff]   ;;  %v2510_v3 = vshll.u32 %v7308_v31, 16  ;;  %v7315_v16 = vld [vmem:[#allocation2 + $0x10] sm:$0xff]   ;;  %v2514_v21 = vshrl.u32 %v7308_v31, 16  ;;  %v6069_v61 = vld [vmem:[%s8280_s3 + $0x220] sm:$0xff]   ;;  %v3155_v26 = vrot.slane %v7308_v31, 1  ;;  %p6156_p4 = pneg %p6155_p2 }
 0x256   : > { %4940 = vmatpush3.bf16.msra.mxu0 %v6052_v29  ;;  %5304 = vmatprep.subr.bf16.mxu1 %v8293_v14  ;;  %v2503_v32 = vshrl.u32 %v4776_v59, 16  ;;  %v2505_v58 = vshll.u32 %v4776_v59, 16  ;;  %v6064_v44 = vld [vmem:[%s8280_s3 + $0x38] sm:$0xff]   ;;  %v2518_v9 = vshll.u32 %v7315_v16, 16  ;;  %v6071_v13 = vld [vmem:[%s8280_s3 + $0x228] sm:$0xff]   ;;  %v2522_v19 = vshrl.u32 %v7315_v16, 16 }
 0x257   : > { %4941 = vmatprep.subr.bf16.mxu0 %v6053_v60  ;;  %v2512_v62 = vrot.slane %v2510_v3, 1  ;;  %v7325_v24 = vld [vmem:[#allocation2 + $0x18] sm:$0xff]   ;;  %v4756_v7 = vld [vmem:[%s6386_s10 + $0x65] sm:$0xff]  ;;  %v4757_v12 = vld [vmem:[%s6386_s10 + $0x6d] sm:$0xff]  ;;  %v3160_v35 = vrot.slane %v7315_v16, 1 }
 0x258   : > { %5269 = vmatmul.mubr.msk.bf16.gmra.mrb[4].mxu1 %vm1284_vm1, %v2239_v48  ;;  %v2507_v1 = vrot.slane %v2505_v58, 1  ;;  %v2520_v6 = vrot.slane %v2518_v9, 1  ;;  %v2526_v23 = vshll.u32 %v7325_v24, 16  ;;  %v6072_v18 = vld [vmem:[%s8280_s3 + $0xc0] sm:$0xff]   ;;  %v2242_v41 = vpack.c.bf16 %v4757_v12, %v4756_v7  ;;  %v6075_v42 = vld [vmem:[%s8280_s3 + $0x230] sm:$0xff]   ;;  %v6076_v2 = vld [vmem:[%s8280_s3 + $0xc8] sm:$0xff]  }
 0x259   : > { %5272 = vmatprep.mubr.msk.bf16.mxu1 %vm6261_vm5, %v8293_v14  ;;  %5305 = vmatpush3.bf16.msra.mxu1 %v6060_v28  ;;  %v2516_v0 = vor.u32 %v2514_v21, %v2512_v62  ;;  %v6073_v30 = vld [vmem:[%s8280_s3 + $0x80] sm:$0xff]   ;;  %v3164_v36 = vrot.slane %v7325_v24, 1  ;;  %v7356_v45 = vsel %vm3153_vm6, %v3155_v26, %v3160_v35  ;;  %v6077_v53 = vld [vmem:[%s8280_s3 + $0x88] sm:$0xff]   ;;  %v4758_v8 = vld [vmem:[%s6386_s10 + $0x75] sm:$0xff]  ;;  %v2530_v49 = vshrl.u32 %v7325_v24, 16 }
 0x25a   : > { %4942 = vmatpush3.bf16.msra.mxu0 %v6055_v38  ;;  %5306 = vmatprep.subr.bf16.mxu1 %v8293_v14  ;;  %v2508_v4 = vor.u32 %v2507_v1, %v2503_v32  ;;  %v7358_v43 = vld [vmem:[#allocation2 + $0x20] sm:$0xff]   ;;  %v2524_v40 = vor.u32 %v2522_v19, %v2520_v6  ;;  %v2528_v47 = vrot.slane %v2526_v23, 1  ;;  %v6079_v50 = vld [vmem:[%s8280_s3 + $0x238] sm:$0xff]   ;;  %v6080_v57 = vld [vmem:[%s8280_s3 + $0xd0] sm:$0xff]  }
 0x25b   : > { %4943 = vmatprep.subr.bf16.mxu0 %v6056_v51  ;;  %v2521_v27 = vsel %vm2501_vm0, %v2516_v0, %v2520_v6  ;;  %v7361_v46 = vsel %vm3153_vm6, %v3160_v35, %v3164_v36  ;;  %v4759_v5 = vld [vmem:[%s6386_s10 + $0x7d] sm:$0xff]  ;;  %v3168_v29 = vrot.slane %v7358_v43, 1  ;;  %v2534_v48 = vshll.u32 %v7358_v43, 16  ;;  %v7392_v11 = vld [vmem:[#allocation2 + $0x28] sm:$0xff]   ;;  %v4762_v3 = vld [vmem:[%s6386_s10 + $0x95] sm:$0xff] }
 0x25c   : > { %v2513_v63 = vsel %vm2501_vm0, %v2508_v4, %v2512_v62  ;;  %v2529_v60 = vsel %vm2501_vm0, %v2524_v40, %v2528_v47  ;;  %v2243_v51 = vpack.c.bf16 %v4759_v5, %v4758_v8  ;;  %v4760_v33 = vld [vmem:[%s6386_s10 + $0x85] sm:$0xff]  ;;  %v2542_v54 = vshll.u32 %v7392_v11, 16  ;;  %v4763_v21 = vld [vmem:[%s6386_s10 + $0x9d] sm:$0xff]  ;;  %v7454_v35 = vld [vmem:[#allocation2 + $0x14] sm:$0xf] }
 0x25d   : > { %5307 = vmatpush3.bf16.msra.mxu1 %v6065_v34  ;;  %2747 = vmatprep.mubr.bf16.mxu0 %v2513_v63  ;;  %v7386_v38 = vsel %vm3153_vm6, %v3164_v36, %v3168_v29  ;;  %v2536_v28 = vrot.slane %v2534_v48, 1  ;;  %v6088_v34 = vld [vmem:[%s8280_s3 + $0xd8] sm:$0xff]   ;;  %v3172_v56 = vrot.slane %v7392_v11, 1  ;;  %v2546_v62 = vshrl.u32 %v7392_v11, 16  ;;  %v6096_v4 = vld [vmem:[%s8280_s3 + $0xa0] sm:$0xff]   ;;  %v6098_v7 = vld [vmem:[%s8280_s3 + $0xe8] sm:$0xff]  }
 0x25e   : > { %4944 = vmatpush3.bf16.msra.mxu0 %v6057_v10  ;;  %5308 = vmatprep.subr.bf16.mxu1 %v8293_v14  ;;  %v6081_v10 = vld [vmem:[%s8280_s3 + $0x90] sm:$0xff]   ;;  %v7425_v1 = vld [vmem:[#allocation2 + $0x38] sm:$0xff]   ;;  %v2245_v6 = vpack.c.bf16 %v4763_v21, %v4762_v3  ;;  %v7446_v23 = vld [vmem:[#allocation2 + $0x40] sm:$0xff]  }
 0x25f   : > { %4945 = vmatprep.subr.bf16.mxu0 %v6058_v52  ;;  %v2532_v52 = vor.u32 %v2530_v49, %v2528_v47  ;;  %v7417_v32 = vsel %vm3153_vm6, %v3168_v29, %v3172_v56  ;;  %v3180_v0 = vrot.slane %v7425_v1, 1  ;;  %v6100_v63 = vld [vmem:[%s8280_s3 + $0xa8] sm:$0xff]   ;;  %v6103_v36 = vld [vmem:[%s8280_s3 + $0xf0] sm:$0xff]   ;;  %v6106_v49 = vld [vmem:[%s8280_s3 + $0xf8] sm:$0xff]  }
 0x260   : > { %5273 = vmatmul.mubr.msk.bf16.gmra.mrb[8].mxu1 %vm1284_vm1, %v2240_v39  ;;  %v6086_v39 = vld [vmem:[%s8280_s3 + $0x140] sm:$0xff]   ;;  %v6104_v47 = vld [vmem:[%s8280_s3 + $0xb0] sm:$0xff]  }
 0x261   : > { %5276 = vmatprep.mubr.msk.bf16.mxu1 %vm6261_vm5, %v8293_v14  ;;  %5309 = vmatpush3.bf16.msra.mxu1 %v6069_v61  ;;  %v2537_v20 = vsel %vm2501_vm0, %v2532_v52, %v2536_v28  ;;  %v3050_v52 = vld [vmem:[#allocation2] sm:$0xe]  ;;  %v6099_v21 = vld [vmem:[%s8280_s3 + $0x150] sm:$0xff]  }
 0x262   : > { %4946 = vmatpush3.bf16.msra.mxu0 %v6059_v22  ;;  %5310 = vmatprep.subr.bf16.mxu1 %v8293_v14  ;;  %v4761_v22 = vld [vmem:[%s6386_s10 + $0x8d] sm:$0xff] }
 0x263   : > { %4947 = vmatprep.subr.bf16.mxu0 %v6061_v55  ;;  %v2538_v55 = vshrl.u32 %v7358_v43, 16 }
 0x265   : > { %5311 = vmatpush3.bf16.msra.mxu1 %v6071_v13  ;;  %v2540_v61 = vor.u32 %v2538_v55, %v2536_v28  ;;  %v6087_v55 = vld [vmem:[%s8280_s3 + $0x100] sm:$0xff]  }
 0x266   : > { %4948 = vmatpush3.bf16.msra.mxu0 %v6062_v25  ;;  %5312 = vmatprep.subr.bf16.mxu1 %v8293_v14  ;;  %v7404_v25 = vld [vmem:[#allocation2 + $0x30] sm:$0xff]  }
 0x267   : > { %4949 = vmatprep.subr.bf16.mxu0 %v6063_v37  ;;  %v6089_v37 = vld [vmem:[%s8280_s3 + $0x98] sm:$0xff]   ;;  %v2550_v9 = vshll.u32 %v7404_v25, 16  ;;  %v2554_v40 = vshrl.u32 %v7404_v25, 16 }
 0x268   : > { %5277 = vmatmul.mubr.msk.bf16.gmra.mrb[12].mxu1 %vm1284_vm1, %v2241_v17  ;;  %v3176_v17 = vrot.slane %v7404_v25, 1 }
 0x269   : > { %5280 = vmatprep.mubr.msk.bf16.mxu1 %vm6261_vm5, %v8293_v14  ;;  %5313 = vmatpush3.bf16.msra.mxu1 %v6075_v42  ;;  %v2552_v19 = vrot.slane %v2550_v9, 1  ;;  %v3184_v42 = vrot.slane %v7446_v23, 1  ;;  %v7532_v9 = vld [vmem:[%s8280_s3 + $0x1c0] sm:$0xff]  }
 0x26a   : > { %4950 = vmatpush3.bf16.msra.mxu0 %v6064_v44  ;;  %5314 = vmatprep.subr.bf16.mxu1 %v8293_v14  ;;  %v7420_v58 = vsel %vm3153_vm6, %v3172_v56, %v3176_v17  ;;  %v2544_v44 = vrot.slane %v2542_v54, 1  ;;  %v7444_v12 = vsel %vm3153_vm6, %v3176_v17, %v3180_v0  ;;  %v4820_v54 = vcombine.low %v3050_v52, %v7305_v15  ;;  %v6092_v56 = vld [vmem:[%s8280_s3 + $0x148] sm:$0xff]  }
 0x26b   : > { %5022 = vmatprep.subr.bf16.mxu0 %v6072_v18  ;;  %v4764_v18 = vld [vmem:[%s6386_s10 + $0xa5] sm:$0xff]  ;;  %v7471_v8 = vsel %vm3153_vm6, %v3180_v0, %v3184_v42 }
 0x26c   : > { %v2545_v13 = vsel %vm2501_vm0, %v2540_v61, %v2544_v44  ;;  %v7521_v61 = vld [vmem:[#allocation2 + $0x28] sm:$0xff]  }
 0x26d   : > { %2748 = vmatmul.mubr.bf16.vlgmr.msra.gmra.mrb[24].mxu0 %v4776_v59  ;;  %5315 = vmatpush3.bf16.msra.mxu1 %v6079_v50  ;;  %v2244_v59 = vpack.c.bf16 %v4761_v22, %v4760_v33  ;;  %v2566_v22 = vshll.u32 %v7446_v23, 16  ;;  %8307 = vst [vmem:[#allocation8_spill] sm:$0xff] %v7521_v61 }
 0x26e   : > { %2755 = vmatprep.mubr.bf16.mxu0 %v2521_v27  ;;  %5023 = vmatpush3.bf16.msra.mxu0 %v6073_v30  ;;  %v2548_v27 = vor.u32 %v2546_v62, %v2544_v44  ;;  %v2390_v30 = vld [vmem:[#allocation2 + $0x10] sm:$0x8]  ;;  %v2570_v44 = vshrl.u32 %v7446_v23, 16 }
 0x26f   : > { %5024 = vmatprep.subr.bf16.mxu0 %v6076_v2  ;;  %5092 = vmatprep.subr.bf16.mxu1 %v6086_v39  ;;  %v4802_v50 = vcombine.low %v2390_v30, %v7454_v35  ;;  %v2562_v39 = vshrl.u32 %v7425_v1, 16  ;;  %v2568_v17 = vrot.slane %v2566_v22, 1  ;;  %v7552_v30 = vld [vmem:[#allocation2 + $0x30] sm:$0xff]  }
 0x270   : > { %5281 = vmatmul.mubr.msk.bf16.gmra.mrb[16].mxu1 %vm1284_vm1, %v2242_v41  ;;  %v7456_v41 = vld [vmem:[#allocation2 + $0x48] ss:$0 sps:$4 sm:$0x11]   ;;  %v2553_v2 = vsel %vm2501_vm0, %v2548_v27, %v2552_v19  ;;  %8308 = vst [vmem:[#allocation9_spill] sm:$0xff] %v7552_v30 }
 0x271   : > { %5284 = vmatprep.mubr.msk.bf16.mxu1 %vm6261_vm5, %v8293_v14  ;;  %v3188_v5 = vrot.slane %v7456_v41, 1  ;;  %v2572_v0 = vor.u32 %v2570_v44, %v2568_v17 }
 0x272   : > { %5025 = vmatpush3.bf16.msra.mxu0 %v6077_v53  ;;  %v2558_v53 = vshll.u32 %v7425_v1, 16 }
 0x273   : > { %5026 = vmatprep.subr.bf16.mxu0 %v6080_v57  ;;  %v7482_v48 = vsel %vm3153_vm6, %v3184_v42, %v3188_v5  ;;  %v6107_v57 = vld [vmem:[%s8280_s3 + $0xb8] sm:$0xff]   ;;  %v6120_v42 = vld [vmem:[%s8280_s3 + $0x168] sm:$0xff]  }
 0x275   : > { %2756 = vmatmul.mubr.bf16.gmra.mrb[28].mxu0 %v7308_v31  ;;  %v2574_v31 = vshll.u32 %v7456_v41, 16 }
 0x276   : > { %2763 = vmatprep.mubr.bf16.mxu0 %v2529_v60  ;;  %5027 = vmatpush3.bf16.msra.mxu0 %v6081_v10  ;;  %v7479_v60 = vld [vmem:[#allocation2 + $0x18] sm:$0xff]   ;;  %v2560_v10 = vrot.slane %v2558_v53, 1  ;;  %v6126_v53 = vld [vmem:[%s8280_s3 + $0x170] sm:$0xff]  }
 0x277   : > { %5028 = vmatprep.subr.bf16.mxu0 %v6088_v34  ;;  %v2870_v33 = vrot.slane %v7479_v60, 3  ;;  %v7500_v34 = vld [vmem:[#allocation2 + $0x20] sm:$0xff]  }
 0x278   : > { %5285 = vmatmul.mubr.msk.bf16.gmra.mrb[20].mxu1 %vm1284_vm1, %v2243_v51  ;;  %v2556_v51 = vor.u32 %v2554_v40, %v2552_v19  ;;  %v2872_v15 = vrot.slane %v7500_v34, 3  ;;  %v6109_v19 = vld [vmem:[%s8280_s3 + $0x118] sm:$0xff]  }
 0x279   : > { %5288 = vmatprep.mubr.msk.bf16.mxu1 %vm6261_vm5, %v8293_v14 }
 0x27a   : > { %5029 = vmatpush3.bf16.msra.mxu0 %v6089_v37  ;;  %v2561_v28 = vsel %vm2501_vm0, %v2556_v51, %v2560_v10  ;;  %v2564_v37 = vor.u32 %v2562_v39, %v2560_v10  ;;  %v2873_v62 = vsel %vm2868_vm7, %v2870_v33, %v2872_v15  ;;  %v3430_v51 = vld [vmem:[#allocation2 + $0x8] sm:$0xc]  ;;  %v6132_v10 = vld [vmem:[%s8280_s3 + $0x178] sm:$0xff]   ;;  %v7598_v39 = vld [vmem:[%s8280_s3 + $0x180] sm:$0xff]  }
 0x27d   : > { %2764 = vmatmul.mubr.bf16.gmra.mrb[32].mxu0 %v7315_v16  ;;  %v6094_v16 = vld [vmem:[%s8280_s3 + $0xe0] sm:$0xff]  }
 0x27e   : > { %2771 = vmatprep.mubr.bf16.mxu0 %v2537_v20  ;;  %5030 = vmatprep.subr.bf16.mxu0 %v6094_v16  ;;  %v6101_v16 = vld [vmem:[%s8280_s3 + $0x110] sm:$0xff]  }
 0x27f   : > { %5031 = vmatpush3.bf16.msra.mxu0 %v6096_v4  ;;  %v6108_v4 = vld [vmem:[%s8280_s3 + $0x158] sm:$0xff]  }
 0x280   : > { %5289 = vmatmul.mubr.msk.bf16.gmra.mrb[24].mxu1 %vm1284_vm1, %v2244_v59  ;;  %5032 = vmatprep.subr.bf16.mxu0 %v6098_v7  ;;  %v3154_v59 = vrot.slane %v4820_v54, 1  ;;  %v2874_v7 = vrot.slane %v7521_v61, 3 }
 0x281   : > { %5292 = vmatprep.mubr.msk.bf16.mxu1 %vm6261_vm5, %v8293_v14 }
 0x282   : > { %v7508_v3 = vsel %vm3153_vm6, %v3154_v59, %v3155_v26  ;;  %v2569_v26 = vsel %vm2501_vm0, %v2564_v37, %v2568_v17  ;;  %v2875_v41 = vsel %vm2868_vm7, %v2872_v15, %v2874_v7  ;;  %v7614_v59 = vld [vmem:[%s8280_s3 + $0x188] sm:$0xff]   ;;  %v3919_v15 = vld [vmem:[#allocation2 + $0x10] sm:$0xc] }
 0x283   : > { %5033 = vmatpush3.bf16.msra.mxu0 %v6100_v63  ;;  %v6115_v63 = vld [vmem:[%s8280_s3 + $0x160] sm:$0xff]  }
 0x284   : > { %5034 = vmatprep.subr.bf16.mxu0 %v6103_v36  ;;  %v6117_v36 = vld [vmem:[%s8280_s3 + $0x120] sm:$0xff]  }
 0x285   : > { %2772 = vmatmul.mubr.bf16.gmra.mrb[36].mxu0 %v7325_v24  ;;  %v4765_v24 = vld [vmem:[%s6386_s10 + $0xad] sm:$0xff]  ;;  %s4406_s10 = sadd.s32 %s5515_s20, %s4401_s14  ;;  %s6157_s14 = sshll.u32 %s6262_s13, 4  ;;  %s6158_s14 = int_to_ptr.vmem [resolvable:$false] %s6157_s14 }
 0x286   : > { %2779 = vmatprep.mubr.bf16.mxu0 %v2545_v13  ;;  %v2246_v29 = vpack.c.bf16 %v4765_v24, %v4764_v18  ;;  %v2576_v13 = vrot.slane %v2574_v31, 1  ;;  %v7550_v24 = vld [vmem:[#allocation2 + $0x10] sm:$0xff]   ;;  %s4884_s30 = sshll.u32 %s4406_s10, 7  ;;  %s6159_s20 = scalar_lea.vmem %s6158_s14, 4608 }
 0x287   : > { %5035 = vmatpush3.bf16.msra.mxu0 %v6104_v47  ;;  %v3158_v47 = vrot.slane %v7550_v24, 1  ;;  %v3445_v37 = vshll.u32 %v7550_v24, 16  ;;  %s8216_s17 = scalar_lea.hbm %s8285_s8, %s4884_s30  ;;  %p6160_p5 = scmp.lt.s32.totalorder %s8219_s9, %s6158_s14 }
 0x288   : > { %5293 = vmatmul.mubr.msk.bf16.gmra.mrb[28].mxu1 %vm1284_vm1, %v2245_v6  ;;  %5036 = vmatprep.subr.bf16.mxu0 %v6106_v49  ;;  %v3051_v6 = vld [vmem:[#allocation2 + $0x8] sm:$0xe]  ;;  %v2577_v18 = vsel %vm2501_vm0, %v2572_v0, %v2576_v13  ;;  %v7576_v49 = vld [vmem:[#allocation2 + $0x38] sm:$0xff]   ;;  %v7648_v0 = vcombine.low %v3919_v15, %v7454_v35  ;;  %p6161_p6 = scmp.lt.s32.totalorder %s6159_s20, %s6153_s22 }
 0x289   : > { %5296 = vmatprep.mubr.msk.bf16.mxu1 %vm6261_vm5, %v8293_v14  ;;  %v2878_v52 = vrot.slane %v7576_v49, 3  ;;  %v3447_v13 = vrot.slane %v3445_v37, 1 }
 0x28a   : > { %p6162_p7 = por %p6161_p6, %p6160_p5 }
 0x28b   : > { %5037 = vmatpush3.bf16.msra.mxu0 %v6107_v57 }
 0x28c   : > { %5162 = vmatprep.subr.bf16.mxu0 %v7532_v9  ;;  %p6163_p9 = pnand %p6162_p7, %p6156_p4 }
 0x28d   : > { %2780 = vmatmul.mubr.bf16.gmra.mrb[40].mxu0 %v7358_v43  ;;  %v2869_v43 = vrot.slane %v4802_v50, 3  ;;  %v6127_v50 = vld [vmem:[%s8280_s3 + $0x130] sm:$0xff]  }
 0x28e   : > { %2787 = vmatprep.mubr.bf16.mxu0 %v2553_v2  ;;  %v2876_v2 = vrot.slane %v7552_v30, 3 }
 0x28f   : > { %v2871_v20 = vsel %vm2868_vm7, %v2869_v43, %v2870_v33 }
 0x290   : > { %5297 = vmatmul.mubr.msk.bf16.gmra.mrb[32].mxu1 %vm1284_vm1, %v2246_v29  ;;  %v7574_v29 = vld [vmem:[#allocation2 + $0x18] sm:$0xff]   ;;  %v2877_v57 = vsel %vm2868_vm7, %v2874_v7, %v2876_v2  ;;  %vm3548_vm1 = vsmask.f32 6400 }
 0x291   : > { %5316 = vmatprep.mubr.msk.bf16.mxu1 %vm6261_vm5, %v8293_v14  ;;  %v3162_v43 = vrot.slane %v7574_v29, 1  ;;  %v8290_v44 = vshll.u32 %v7574_v29, 16 }
 0x293   : > { %v3163_v22 = vsel %vm3153_vm6, %v3158_v47, %v3162_v43 }
 0x295   : > { %2788 = vmatmul.mubr.bf16.gmra.mrb[44].mxu0 %v7392_v11  ;;  %v6093_v11 = vld [vmem:[%s8280_s3 + $0x108] sm:$0xff]  }
 0x296   : > { %2795 = vmatprep.mubr.bf16.mxu0 %v2561_v28  ;;  %v7593_v28 = vld [vmem:[#allocation2 + $0x20] sm:$0xff]  }
 0x297   : > { %v3166_v17 = vrot.slane %v7593_v28, 1 }
 0x298   : > { %5317 = vmatmul.mubr.bf16.vlgmr.msra.gmra.mrb[0].mxu1 %v2871_v20  ;;  %v2879_v20 = vsel %vm2868_vm7, %v2876_v2, %v2878_v52  ;;  %v7684_v2 = vld [vmem:[%s8280_s3 + $0x1a0] sm:$0xff]  }
 0x299   : > { %5093 = vmatpush3.bf16.msra.mxu1 %v6087_v55  ;;  %5320 = vmatprep.mubr.msk.bf16.mxu1 %vm6261_vm5, %v8293_v14  ;;  %v7604_v55 = vld [vmem:[%s8280_s3 + $0x1c8] sm:$0xff]  }
 0x29a   : > { %5094 = vmatprep.subr.bf16.mxu1 %v6092_v56  ;;  %v7608_v56 = vld [vmem:[#allocation2 + $0x40] sm:$0xff]  }
 0x29b   : > { %v2880_v31 = vrot.slane %v7608_v56, 3 }
 0x29d   : > { %2796 = vmatmul.mubr.bf16.gmra.mrb[48].mxu0 %v7404_v25  ;;  %5095 = vmatpush3.bf16.msra.mxu1 %v6093_v11  ;;  %v3052_v25 = vld [vmem:[#allocation2 + $0xc] sm:$0xf] }
 0x29e   : > { %2803 = vmatprep.mubr.bf16.mxu0 %v2569_v26  ;;  %5096 = vmatprep.subr.bf16.mxu1 %v6099_v21  ;;  %v7548_v27 = vcombine.low %v3051_v6, %v3052_v25  ;;  %v4848_v33 = vcombine.low %v3430_v51, %v3052_v25  ;;  %v3449_v26 = vshrl.u32 %v7550_v24, 16  ;;  %v2881_v6 = vsel %vm2868_vm7, %v2878_v52, %v2880_v31  ;;  %v7652_v25 = vld [vmem:[#allocation2 + $0x48] sm:$0xff]  }
 0x2a0   : > { %5321 = vmatmul.mubr.bf16.gmra.mrb[4].mxu1 %v2873_v62  ;;  %v3157_v40 = vrot.slane %v7548_v27, 1  ;;  %v3440_v54 = vshll.u32 %v4848_v33, 16  ;;  %v3438_v11 = vshrl.u32 %v4848_v33, 16  ;;  %v7636_v62 = vld [vmem:[%s8280_s3 + $0x190] sm:$0xff]   ;;  %v3451_v35 = vor.u32 %v3449_v26, %v3447_v13 }
 0x2a1   : > { %5324 = vmatprep.mubr.msk.bf16.mxu1 %vm6261_vm5, %v8293_v14  ;;  %5097 = vmatpush3.bf16.msra.mxu1 %v6101_v16  ;;  %v7630_v16 = vld [vmem:[#allocation2 + $0x28] sm:$0xff]  }
 0x2a2   : > { %5098 = vmatprep.subr.bf16.mxu1 %v6108_v4  ;;  %v3159_v5 = vsel %vm3153_vm6, %v3157_v40, %v3158_v47  ;;  %v3442_v21 = vrot.slane %v3440_v54, 1  ;;  %v7645_v4 = vld [vmem:[%s8280_s3 + $0x1d8] sm:$0xff]   ;;  %v8291_v40 = vshrl.u32 %v7574_v29, 16  ;;  %v8289_v47 = vshll.u32 %v7593_v28, 16 }
 0x2a4   : > { %v3443_v7 = vor.u32 %v3442_v21, %v3438_v11  ;;  %v7718_v21 = vld [vmem:[%s8280_s3 + $0x1f0] sm:$0xff]  }
 0x2a5   : > { %2804 = vmatmul.mubr.bf16.gmra.mrb[52].mxu0 %v7425_v1  ;;  %5099 = vmatpush3.bf16.msra.mxu1 %v6109_v19  ;;  %v6121_v1 = vld [vmem:[%s8280_s3 + $0x128] sm:$0xff]   ;;  %v7658_v19 = vld [vmem:[%s8280_s3 + $0x198] sm:$0xff]  }
 0x2a6   : > { %2811 = vmatprep.mubr.bf16.mxu0 %v2577_v18  ;;  %5100 = vmatprep.subr.bf16.mxu1 %v6115_v63  ;;  %v3170_v63 = vrot.slane %v7630_v16, 1  ;;  %v7669_v18 = vld [vmem:[%s8280_s3 + $0x1e0] sm:$0xff]  }
 0x2a8   : > { %5325 = vmatmul.mubr.bf16.gmra.mrb[8].mxu1 %v2875_v41  ;;  %v2882_v41 = vrot.slane %v7652_v25, 3 }
 0x2a9   : > { %5328 = vmatprep.mubr.msk.bf16.mxu1 %vm6261_vm5, %v8293_v14  ;;  %5101 = vmatpush3.bf16.msra.mxu1 %v6117_v36  ;;  %v3448_v36 = vsel %vm2501_vm0, %v3443_v7, %v3447_v13 }
 0x2aa   : > { %5102 = vmatprep.subr.bf16.mxu1 %v6120_v42  ;;  %v3930_v42 = vshll.u32 %v7648_v0, 16  ;;  %v3562_v51 = vshrl.u32 %v3448_v36, 16 }
 0x2ac   : > { %v7699_v52 = vrot.slane %v3930_v42, 1  ;;  %v7725_v7 = vrot.slane %v3562_v51, 1  ;;  %v3550_v42 = vshrl.u32 %v7548_v27, 16 }
 0x2ad   : > { %2812 = vmatmul.mubr.bf16.gmra.mrb[56].mxu0 %v7446_v23  ;;  %5103 = vmatpush3.bf16.msra.mxu1 %v6121_v1  ;;  %v6134_v23 = vld [vmem:[%s8280_s3 + $0x138] sm:$0xff]   ;;  %v7678_v1 = vld [vmem:[#allocation2 + $0x50] sm:$0xff]  }
 0x2ae   : > { %3338 = vmatprep.mubr.bf16.mxu0 %v3159_v5  ;;  %5104 = vmatprep.subr.bf16.mxu1 %v6126_v53  ;;  %v3171_v53 = vsel %vm3153_vm6, %v3166_v17, %v3170_v63  ;;  %v7687_v5 = vld [vmem:[#allocation2 + $0x30] sm:$0xff]  }
 0x2af   : > { %v3174_v15 = vrot.slane %v7687_v5, 1 }
 0x2b0   : > { %5329 = vmatmul.mubr.bf16.gmra.mrb[12].mxu1 %v2877_v57  ;;  %v7694_v57 = vld [vmem:[%s8280_s3 + $0x1e8] sm:$0xff]  }
 0x2b1   : > { %5332 = vmatprep.mubr.msk.bf16.mxu1 %vm6261_vm5, %v8293_v14  ;;  %5105 = vmatpush3.bf16.msra.mxu1 %v6127_v50 }
 0x2b2   : > { %5106 = vmatprep.subr.bf16.mxu1 %v6132_v10  ;;  %v3565_v10 = vshll.u32 %v3448_v36, 16  ;;  %v3967_v36 = vshll.u32 %v7576_v49, 16 }
 0x2b5   : > { %3339 = vmatmul.mubr.bf16.vlgmr.msra.gmra.mrb[60].mxu0 %v7508_v3  ;;  %5107 = vmatpush3.bf16.msra.mxu1 %v6134_v23  ;;  %v7622_v3 = vld [vmem:[%s8280_s3 + $0x1d0] sm:$0xff]   ;;  %v3951_v23 = vshll.u32 %v7521_v61, 16 }
 0x2b6   : > { %3346 = vmatprep.mubr.bf16.mxu0 %v3163_v22  ;;  %5163 = vmatpush3.bf16.msra.mxu0 %v7598_v39  ;;  %v8292_v22 = vrot.slane %v7678_v1, 3 }
 0x2b7   : > { %5164 = vmatprep.subr.bf16.mxu0 %v7604_v55  ;;  %5352 = vmatprep.subr.bf16.mxu1 %v7532_v9  ;;  %v3167_v9 = vsel %vm3153_vm6, %v3162_v43, %v3166_v17  ;;  %v2883_v43 = vsel %vm2868_vm7, %v2880_v31, %v2882_v41  ;;  %v3463_v17 = vrot.slane %v8289_v47, 1  ;;  %v3955_v31 = vshrl.u32 %v7521_v61, 16 }
 0x2b8   : > { %5333 = vmatmul.mubr.bf16.gmra.mrb[16].mxu1 %v2879_v20  ;;  %v2885_v51 = vsel %vm2868_vm7, %v2882_v41, %v8292_v22  ;;  %v7755_v41 = vld [vmem:[%s8280_s3 + $0x1f8] sm:$0xff]   ;;  %v8311_v61 = vmov 0.0  }
 0x2b9   : > { %5336 = vmatprep.mubr.msk.bf16.mxu1 %vm6261_vm5, %v8293_v14 }
 0x2ba   : > { %5165 = vmatpush3.bf16.msra.mxu0 %v7614_v59 }
 0x2bb   : > { %5166 = vmatprep.subr.bf16.mxu0 %v7622_v3 }
 0x2bd   : > { %3347 = vmatmul.mubr.bf16.gmra.mrb[64].mxu0 %v7356_v45  ;;  %v3455_v45 = vrot.slane %v8290_v44, 1  ;;  %v3557_v44 = vrot.slane %v3449_v26, 1 }
 0x2be   : > { %3354 = vmatprep.mubr.bf16.mxu0 %v3167_v9  ;;  %5167 = vmatpush3.bf16.msra.mxu0 %v7636_v62  ;;  %v3959_v9 = vshll.u32 %v7552_v30, 16 }
 0x2bf   : > { %5168 = vmatprep.subr.bf16.mxu0 %v7645_v4  ;;  %v3456_v50 = vsel %vm2501_vm0, %v3451_v35, %v3455_v45  ;;  %v3459_v20 = vor.u32 %v8291_v40, %v3455_v45  ;;  %v7727_v35 = vrot.slane %v3565_v10, 2  ;;  %v7741_v10 = vld [vmem:[#allocation2 + $0x58] ss:$0 sps:$4 sm:$0x77]   ;;  %v7748_v45 = vld [vmem:[%s8280_s3 + $0x1b0] sm:$0xff]   ;;  %v3552_v40 = vrot.slane %v3550_v42, 1 }
 0x2c0   : > { %5337 = vmatmul.mubr.bf16.gmra.mrb[20].mxu1 %v2881_v6  ;;  %v3570_v54 = vshrl.u32 %v3456_v50, 16  ;;  %v3573_v11 = vshll.u32 %v3456_v50, 16  ;;  %v7723_v6 = vld [vmem:[#allocation2 + $0x38] sm:$0xff]   ;;  %v7735_v50 = vrot.slane %v3951_v23, 1 }
 0x2c1   : > { %5340 = vmatprep.mubr.msk.bf16.mxu1 %vm6261_vm5, %v8293_v14  ;;  %v3464_v47 = vsel %vm2501_vm0, %v3459_v20, %v3463_v17  ;;  %v3961_v20 = vrot.slane %v3959_v9, 1  ;;  %v2886_v9 = vrot.slane %v7741_v10, 3  ;;  %v3568_v26 = vor.u32 %v7727_v35, %v7725_v7  ;;  %v7785_v35 = vld [vmem:[#allocation2 + $0x40] sm:$0xff]  }
 0x2c2   : > { %5169 = vmatpush3.bf16.msra.mxu0 %v7658_v19  ;;  %v3572_v33 = vrot.slane %v3570_v54, 1  ;;  %v3575_v23 = vrot.slane %v3573_v11, 2  ;;  %v3957_v54 = vor.u32 %v3955_v31, %v7735_v50  ;;  %v3963_v11 = vshrl.u32 %v7552_v30, 16 }
 0x2c3   : > { %5170 = vmatprep.subr.bf16.mxu0 %v7669_v18  ;;  %v3586_v13 = vshll.u32 %v3464_v47, 16 }
 0x2c4   : > { %v3576_v24 = vor.u32 %v3575_v23, %v3572_v33  ;;  %v3965_v42 = vor.u32 %v3963_v11, %v3961_v20  ;;  %v8310_v33 = vshll.u32 %v7630_v16, 16  ;;  %v8297_v11 = vrot.slane %v7552_v30, 2 }
 0x2c5   : > { %3355 = vmatmul.mubr.bf16.gmra.mrb[68].mxu0 %v7361_v46  ;;  %v7711_v46 = vld [vmem:[%s8280_s3 + $0x1a8] sm:$0xff]  }
 0x2c6   : > { %3362 = vmatprep.mubr.bf16.mxu0 %v3171_v53  ;;  %5171 = vmatpush3.bf16.msra.mxu0 %v7684_v2  ;;  %v3553_v53 = vshll.u32 %v7548_v27, 16  ;;  %v3175_v27 = vsel %vm3153_vm6, %v3170_v63, %v3174_v15  ;;  %v3558_v63 = vrot.slane %v3445_v37, 2  ;;  %v7778_v37 = vsel %vm2501_vm0, %v3957_v54, %v3961_v20 }
 0x2c7   : > { %5172 = vmatprep.subr.bf16.mxu0 %v7694_v57  ;;  %v3471_v23 = vrot.slane %v8310_v33, 1  ;;  %v3971_v20 = vshrl.u32 %v7576_v49, 16  ;;  %v8312_v33 = vrot.slane %v7678_v1, 3 }
 0x2c8   : > { %5341 = vmatmul.mubr.bf16.gmra.mrb[24].mxu1 %v2883_v43  ;;  %v8296_v43 = vrot.slane %v7723_v6, 1  ;;  %v3555_v22 = vrot.slane %v3553_v53, 2  ;;  %v3969_v53 = vrot.slane %v3967_v36, 1  ;;  %v7783_v7 = vor.u32 %v3558_v63, %v3557_v44 }
 0x2c9   : > { %5344 = vmatprep.mubr.msk.bf16.mxu1 %vm6261_vm5, %v8293_v14  ;;  %v3583_v14 = vshrl.u32 %v3464_v47, 16  ;;  %v8295_v44 = vrot.slane %v7778_v37, 2 }
 0x2ca   : > { %5173 = vmatpush3.bf16.msra.mxu0 %v7711_v46  ;;  %v3179_v47 = vsel %vm3153_vm6, %v3174_v15, %v8296_v43  ;;  %v3556_v54 = vor.u32 %v3555_v22, %v3552_v40  ;;  %v3588_v15 = vrot.slane %v3586_v13, 2 }
 0x2cb   : > { %5174 = vmatprep.subr.bf16.mxu0 %v7718_v21  ;;  %v3585_v36 = vrot.slane %v3583_v14, 1  ;;  %v3979_v14 = vshrl.u32 %v7608_v56, 16 }
 0x2cd   : > { %3363 = vmatmul.mubr.bf16.gmra.mrb[72].mxu0 %v7386_v38  ;;  %v7774_v38 = vld [vmem:[%s8280_s3 + $0x1b8] sm:$0xff]  }
 0x2ce   : > { %3370 = vmatprep.mubr.bf16.mxu0 %v3175_v27  ;;  %5175 = vmatpush3.bf16.msra.mxu0 %v7748_v45  ;;  %v8309_v27 = vshrl.u32 %v7593_v28, 16 }
 0x2cf   : > { %5176 = vmatprep.subr.bf16.mxu0 %v7755_v41 }
 0x2d0   : > { %5345 = vmatmul.mubr.bf16.gmra.mrb[28].mxu1 %v2885_v51  ;;  %v3467_v31 = vor.u32 %v8309_v27, %v3463_v17  ;;  %v3970_v51 = vsel %vm2501_vm0, %v3965_v42, %v3969_v53  ;;  %v3975_v17 = vshll.u32 %v7608_v56, 16  ;;  %v3973_v27 = vor.u32 %v3971_v20, %v3969_v53 }
 0x2d1   : > { %5348 = vmatprep.mubr.msk.bf16.mxu1 %vm6261_vm5, %v8311_v61  ;;  %v4055_v63 = vrot.slane %v3970_v51, 2  ;;  %v4057_v61 = vrot.slane %v7576_v49, 2  ;;  %v2887_v53 = vsel %vm2868_vm7, %v8312_v33, %v2886_v9  ;;  %v7813_v51 = vld [vmem:[#allocation2 + $0x48] sm:$0xff]   ;;  %v3577_v20 = vsel %vm3548_vm1, %v3568_v26, %v3576_v24 }
 0x2d2   : > { %5177 = vmatpush3.bf16.msra.mxu0 %v7774_v38  ;;  %v3472_v40 = vsel %vm2501_vm0, %v3467_v31, %v3471_v23  ;;  %v3977_v13 = vrot.slane %v3975_v17, 1  ;;  %v7821_v17 = vor.u32 %v3588_v15, %v3585_v36  ;;  %v8315_v9 = vshll.u32 %v7574_v29, 16 }
 0x2d3   : > { %v7805_v22 = vsel %vm4038_vm8, %v8295_v44, %v4055_v63  ;;  %v7818_v31 = vsel %vm4038_vm8, %v8297_v11, %v4057_v61  ;;  %v3596_v49 = vshrl.u32 %v3472_v40, 16  ;;  %v8316_v26 = vrot.slane %v7785_v35, 1 }
 0x2d4   : > { %8313 = vst [vmem:[#allocation10_spill] sm:$0xff] %v7818_v31  ;;  %v3978_v42 = vsel %vm2501_vm0, %v3973_v27, %v3977_v13  ;;  %v3579_v33 = vrot.slane %v8315_v9, 2  ;;  %v8317_v36 = vrot.slane %v7723_v6, 1  ;;  %v3983_v27 = vshll.u32 %v7652_v25, 16 }
 0x2d5   : > { %3371 = vmatmul.mubr.bf16.gmra.mrb[76].mxu0 %v7417_v32  ;;  %v8314_v32 = vshrl.u32 %v7574_v29, 16  ;;  %v4059_v43 = vrot.slane %v3978_v42, 2  ;;  %v3981_v9 = vor.u32 %v3979_v14, %v3977_v13  ;;  %v8318_v11 = vshrl.u32 %v7630_v16, 16 }
 0x2d6   : > { %3378 = vmatprep.mubr.bf16.mxu0 %v3179_v47  ;;  %v3560_v47 = vsel %vm3548_vm1, %v3556_v54, %v7783_v7  ;;  %v3183_v15 = vsel %vm3153_vm6, %v8317_v36, %v8316_v26  ;;  %v3590_v54 = vsel %vm3548_vm1, %v3576_v24, %v7821_v17  ;;  %v8319_v26 = vshll.u32 %v7687_v5, 16 }
 0x2d7   : > { %v3578_v44 = vrot.slane %v8314_v32, 1  ;;  %v3599_v32 = vshll.u32 %v3472_v40, 16  ;;  %v7839_v42 = vsel %vm4038_vm8, %v4055_v63, %v4059_v43  ;;  %v3475_v31 = vor.u32 %v8318_v11, %v3471_v23  ;;  %v6152_v23 = vld [vmem:[#allocation2 + $0x58] ss:$0 sps:$4 sm:$0x33]  }
 0x2d8   : > { %5349 = vmatmul.mubr.bf16.gmra.mrb[32].mxu1 %v2887_v53  ;;  %v4061_v53 = vrot.slane %v7608_v56, 2  ;;  %v3479_v40 = vrot.slane %v8319_v26, 1  ;;  %v3985_v36 = vrot.slane %v3983_v27, 1  ;;  %v3598_v30 = vrot.slane %v3596_v49, 1 }
 0x2d9   : > { %3828 = vmatprep.mubr.bf16.mxu1 %v3577_v20  ;;  %v3987_v63 = vshrl.u32 %v7652_v25, 16  ;;  %v3991_v14 = vshll.u32 %v7678_v1, 16  ;;  %v3601_v13 = vrot.slane %v3599_v32, 2  ;;  %v4065_v24 = vrot.slane %v7652_v25, 2 }
 0x2da   : > { %v7849_v20 = vsel %vm4038_vm8, %v4057_v61, %v4061_v53  ;;  %v3986_v56 = vsel %vm2501_vm0, %v3981_v9, %v3985_v36  ;;  %v3995_v29 = vshrl.u32 %v7678_v1, 16  ;;  %v3999_v61 = vshll.u32 %v7741_v10, 16 }
 0x2db   : > { %8320 = vst [vmem:[#allocation11_spill] sm:$0xff] %v7849_v20  ;;  %v4063_v11 = vrot.slane %v3986_v56, 2  ;;  %v3989_v27 = vor.u32 %v3987_v63, %v3985_v36  ;;  %v3993_v49 = vrot.slane %v3991_v14, 1  ;;  %v3480_v26 = vsel %vm2501_vm0, %v3475_v31, %v3479_v40 }
 0x2dc   : > { %v7860_v20 = vsel %vm4038_vm8, %v4061_v53, %v4065_v24  ;;  %v4069_v32 = vrot.slane %v7678_v1, 2  ;;  %v4003_v25 = vshrl.u32 %v7741_v10, 16  ;;  %v4001_v36 = vrot.slane %v3999_v61, 1 }
 0x2dd   : > { %3379 = vmatmul.mubr.bf16.gmra.mrb[80].mxu0 %v7420_v58  ;;  %v7865_v9 = vsel %vm4038_vm8, %v4059_v43, %v4063_v11  ;;  %v3994_v58 = vsel %vm2501_vm0, %v3989_v27, %v3993_v49  ;;  %v3997_v56 = vor.u32 %v3995_v29, %v3993_v49  ;;  %v3580_v63 = vor.u32 %v3579_v33, %v3578_v44 }
 0x2de   : > { %3386 = vmatprep.mubr.bf16.mxu0 %v3183_v15  ;;  %v4067_v14 = vrot.slane %v3994_v58, 2  ;;  %v7869_v15 = vsel %vm4038_vm8, %v4065_v24, %v4069_v32  ;;  %v4073_v31 = vrot.slane %v6152_v23, 2  ;;  %v3602_v1 = vor.u32 %v3601_v13, %v3598_v30 }
 0x2df   : > { %v3609_v53 = vshrl.u32 %v3480_v26, 16  ;;  %v4002_v10 = vsel %vm2501_vm0, %v3997_v56, %v4001_v36  ;;  %v4005_v43 = vor.u32 %v4003_v25, %v4001_v36  ;;  %v3612_v27 = vshll.u32 %v3480_v26, 16 }
 0x2e0   : > { %3829 = vmatmul.mubr.bf16.vlgmr.msra.gmra.mrb[36].mxu1 %v3560_v47  ;;  %v7875_v29 = vsel %vm4038_vm8, %v4063_v11, %v4067_v14  ;;  %v4071_v44 = vrot.slane %v4002_v10, 2  ;;  %v7878_v33 = vsel %vm4038_vm8, %v4069_v32, %v4073_v31  ;;  %v8321_v47 = vrot.slane %v7813_v51, 1 }
 0x2e1   : > { %5360 = vmatpush3.bf16.msra.mxu1 %v7598_v39  ;;  %3836 = vmatprep.mubr.bf16.mxu1 %v3590_v54  ;;  %v8322_v39 = vrot.slane %v7785_v35, 1  ;;  %v6146_v54 = vld [vmem:[#allocation2 + $0x50] ss:$0 sps:$4 sm:$0x11]   ;;  %v8323_v13 = vshrl.u32 %v7687_v5, 16  ;;  %v4075_v49 = vrot.slane %v4005_v43, 2  ;;  %v3581_v58 = vsel %vm3548_vm1, %v7783_v7, %v3580_v63 }
 0x2e2   : > { %5353 = vmatprep.subr.bf16.mxu1 %v7604_v55  ;;  %v8324_v55 = vshll.u32 %v7723_v6, 16  ;;  %v8325_v11 = vshll.u32 %v7479_v60, 16  ;;  %v3939_v26 = vshrl.u32 %v7479_v60, 16  ;;  %v3943_v32 = vshll.u32 %v7500_v34, 16 }
 0x2e3   : > { %v3187_v30 = vsel %vm3153_vm6, %v8322_v39, %v8321_v47  ;;  %v3483_v24 = vor.u32 %v8323_v13, %v3479_v40  ;;  %v7894_v25 = vsel %vm4038_vm8, %v4067_v14, %v4071_v44  ;;  %v8326_v40 = vshrl.u32 %v7593_v28, 16 }
 0x2e4   : > { %v3487_v23 = vrot.slane %v8324_v55, 1  ;;  %v3937_v61 = vrot.slane %v8325_v11, 1  ;;  %v8327_v36 = vshll.u32 %v7593_v28, 16  ;;  %v7905_v10 = vsel %vm4038_vm8, %v4071_v44, %v4075_v49 }
 0x2e5   : > { %3387 = vmatmul.mubr.bf16.gmra.mrb[84].mxu0 %v7444_v12  ;;  %5361 = vmatpush3.bf16.msra.mxu1 %v7614_v59  ;;  %v3591_v56 = vrot.slane %v8326_v40, 1  ;;  %v3603_v14 = vsel %vm3548_vm1, %v7821_v17, %v3602_v1  ;;  %v3611_v12 = vrot.slane %v3609_v53, 1  ;;  %v3614_v43 = vrot.slane %v3612_v27, 2 }
 0x2e6   : > { %v3592_v31 = vrot.slane %v8327_v36, 2  ;;  %3394 = vmatprep.mubr.bf16.mxu0 %v3187_v30  ;;  %5354 = vmatprep.subr.bf16.mxu1 %v7622_v3  ;;  %v3489_v7 = vshrl.u32 %v7723_v6, 16  ;;  %v3493_v59 = vshll.u32 %v7785_v35, 16  ;;  %v3190_v47 = vrot.slane %v6146_v54, 1 }
 0x2e7   : > { %v3488_v39 = vsel %vm2501_vm0, %v3483_v24, %v3487_v23  ;;  %v8328_v28 = vshrl.u32 %v7648_v0, 16  ;;  %v3941_v30 = vor.u32 %v3939_v26, %v3937_v61  ;;  %v3945_v13 = vrot.slane %v3943_v32, 1 }
 0x2e8   : > { %3837 = vmatmul.mubr.bf16.gmra.mrb[40].mxu1 %v3581_v58  ;;  %v3593_v17 = vor.u32 %v3592_v31, %v3591_v56  ;;  %v3615_v3 = vor.u32 %v3614_v43, %v3611_v12  ;;  %v3622_v53 = vshrl.u32 %v3488_v39, 16  ;;  %v3625_v27 = vshll.u32 %v3488_v39, 16 }
 0x2e9   : > { %v3933_v44 = vor.u32 %v7699_v52, %v8328_v28  ;;  %3844 = vmatprep.mubr.bf16.mxu1 %v3603_v14  ;;  %5362 = vmatpush3.bf16.msra.mxu1 %v7636_v62  ;;  %v8329_v54 = vrot.slane %v7813_v51, 1  ;;  %v3491_v55 = vor.u32 %v3489_v7, %v3487_v23  ;;  %v3495_v52 = vrot.slane %v3493_v59, 1  ;;  %v7947_v28 = vld [vmem:[#allocation2 + $0x50] ss:$0 sps:$4 sm:$0x33]  }
 0x2ea   : > { %5355 = vmatprep.subr.bf16.mxu1 %v7645_v4  ;;  %v3946_v11 = vsel %vm2501_vm0, %v3941_v30, %v3945_v13  ;;  %v3947_v62 = vshrl.u32 %v7500_v34, 16  ;;  %v3594_v4 = vsel %vm3548_vm1, %v3580_v63, %v3593_v17  ;;  %v8330_v26 = vshrl.u32 %v7630_v16, 16 }
 0x2eb   : > { %v3191_v24 = vsel %vm3153_vm6, %v8329_v54, %v3190_v47  ;;  %v3938_v49 = vsel %vm2501_vm0, %v3933_v44, %v3937_v61  ;;  %v8331_v58 = vshll.u32 %v7630_v16, 16  ;;  %v3497_v23 = vshrl.u32 %v7785_v35, 16 }
 0x2ec   : > { %v3604_v32 = vrot.slane %v8330_v26, 1  ;;  %v3616_v61 = vsel %vm3548_vm1, %v3602_v1, %v3615_v3  ;;  %v3624_v56 = vrot.slane %v3622_v53, 1  ;;  %v3627_v36 = vrot.slane %v3625_v27, 2 }
 0x2ed   : > { %3395 = vmatmul.mubr.bf16.gmra.mrb[88].mxu0 %v7471_v8  ;;  %v3605_v40 = vrot.slane %v8331_v58, 2  ;;  %5363 = vmatpush3.bf16.msra.mxu1 %v7658_v19  ;;  %v3501_v8 = vshll.u32 %v7813_v51, 16  ;;  %v4042_v63 = vrot.slane %v3938_v49, 2  ;;  %v4043_v31 = vrot.slane %v3946_v11, 2 }
 0x2ee   : > { %3402 = vmatprep.mubr.bf16.mxu0 %v3191_v24  ;;  %5356 = vmatprep.subr.bf16.mxu1 %v7669_v18  ;;  %v3496_v14 = vsel %vm2501_vm0, %v3491_v55, %v3495_v52  ;;  %v3949_v16 = vor.u32 %v3947_v62, %v3945_v13  ;;  %v3628_v19 = vor.u32 %v3627_v36, %v3624_v56  ;;  %v4039_v30 = vrot.slane %v7648_v0, 2 }
 0x2ef   : > { %v3606_v12 = vor.u32 %v3605_v40, %v3604_v32  ;;  %v3635_v43 = vshrl.u32 %v3496_v14, 16  ;;  %v3638_v47 = vshll.u32 %v3496_v14, 16  ;;  %v4044_v1 = vsel %vm4038_vm8, %v4042_v63, %v4043_v31 }
 0x2f0   : > { %3845 = vmatmul.mubr.bf16.gmra.mrb[44].mxu1 %v3594_v4  ;;  %v3499_v18 = vor.u32 %v3497_v23, %v3495_v52  ;;  %v3503_v39 = vrot.slane %v3501_v8, 1  ;;  %v3954_v44 = vsel %vm2501_vm0, %v3949_v16, %v7735_v50  ;;  %v8333_v53 = vshll.u32 %v7687_v5, 16 }
 0x2f1   : > { %3852 = vmatprep.mubr.bf16.mxu1 %v3616_v61  ;;  %5364 = vmatpush3.bf16.msra.mxu1 %v7684_v2  ;;  %v3607_v2 = vsel %vm3548_vm1, %v3593_v17, %v3606_v12  ;;  %v4040_v54 = vrot.slane %v7479_v60, 2  ;;  %v3629_v24 = vsel %vm3548_vm1, %v3615_v3, %v3628_v19  ;;  %v3637_v50 = vrot.slane %v3635_v43, 1 }
 0x2f2   : > { %5357 = vmatprep.subr.bf16.mxu1 %v7694_v57  ;;  %v8332_v57 = vshrl.u32 %v7687_v5, 16  ;;  %v3618_v27 = vrot.slane %v8333_v53, 2  ;;  %v3640_v55 = vrot.slane %v3638_v47, 2  ;;  %v4047_v0 = vrot.slane %v3954_v44, 2 }
 0x2f3   : > { %v3504_v17 = vsel %vm2501_vm0, %v3499_v18, %v3503_v39  ;;  %v3509_v52 = vshll.u32 %v7947_v28, 16  ;;  %v4041_v60 = vsel %vm4038_vm8, %v4039_v30, %v4040_v54  ;;  %v4045_v26 = vrot.slane %v7500_v34, 2 }
 0x2f4   : > { %v3617_v13 = vrot.slane %v8332_v57, 1  ;;  %v3648_v3 = vshrl.u32 %v3504_v17, 16  ;;  %v3651_v49 = vshll.u32 %v3504_v17, 16  ;;  %v8334_v32 = vshll.u32 %v7723_v6, 16 }
 0x2f5   : > { %3403 = vmatmul.mubr.bf16.gmra.mrb[92].mxu0 %v7482_v48  ;;  %5365 = vmatpush3.bf16.msra.mxu1 %v7711_v46  ;;  %v3505_v48 = vshrl.u32 %v7813_v51, 16  ;;  %v3641_v46 = vor.u32 %v3640_v55, %v3637_v50  ;;  %v3511_v62 = vrot.slane %v3509_v52, 1  ;;  %v4046_v36 = vsel %vm4038_vm8, %v4040_v54, %v4045_v26  ;;  %v8337_v50 = vld [vmem:[#allocation9_spill] sm:$0xff] }
 0x2f6   : > { %4223 = vmatprep.mubr.bf16.mxu0 %v4044_v1  ;;  %5358 = vmatprep.subr.bf16.mxu1 %v7718_v21  ;;  %v3619_v5 = vor.u32 %v3618_v27, %v3617_v13  ;;  %v4048_v21 = vsel %vm4038_vm8, %v4043_v31, %v4047_v0  ;;  %v3631_v58 = vrot.slane %v8334_v32, 2  ;;  %v3650_v40 = vrot.slane %v3648_v3, 1  ;;  %v8340_v3 = vld [vmem:[#allocation11_spill] sm:$0xff] }
 0x2f7   : > { %v3507_v11 = vor.u32 %v3505_v48, %v3503_v39  ;;  %v3653_v61 = vrot.slane %v3651_v49, 2  ;;  %v3513_v6 = vshrl.u32 %v7947_v28, 16  ;;  %v8335_v14 = vrot.slane %v7778_v37, 2 }
 0x2f8   : > { %3853 = vmatmul.mubr.bf16.gmra.mrb[48].mxu1 %v3607_v2  ;;  %v3620_v4 = vsel %vm3548_vm1, %v3606_v12, %v3619_v5  ;;  %v8336_v12 = vld [vmem:[#allocation8_spill] sm:$0xff]  ;;  %v3643_v43 = vrot.slane %v3497_v23, 1  ;;  %v3644_v47 = vrot.slane %v3493_v59, 2  ;;  %v3656_v53 = vrot.slane %v3505_v48, 1 }
 0x2f9   : > { %3860 = vmatprep.mubr.bf16.mxu1 %v3629_v24  ;;  %5366 = vmatpush3.bf16.msra.mxu1 %v7748_v45  ;;  %v3630_v45 = vrot.slane %v3489_v7, 1  ;;  %v3512_v56 = vsel %vm2501_vm0, %v3507_v11, %v3511_v62  ;;  %v3654_v63 = vor.u32 %v3653_v61, %v3650_v40  ;;  %v3515_v44 = vor.u32 %v3513_v6, %v3511_v62 }
 0x2fa   : > { %5359 = vmatprep.subr.bf16.mxu1 %v7755_v41  ;;  %v3642_v41 = vsel %vm3548_vm1, %v3628_v19, %v3641_v46  ;;  %v3661_v31 = vshrl.u32 %v3512_v56, 16  ;;  %v3664_v7 = vshll.u32 %v3512_v56, 16  ;;  %v4049_v19 = vrot.slane %v8336_v12, 2 }
 0x2fb   : > { %v3632_v34 = vor.u32 %v3631_v58, %v3630_v45  ;;  %v3655_v1 = vsel %vm3548_vm1, %v3641_v46, %v3654_v63  ;;  %v3645_v37 = vor.u32 %v3644_v47, %v3643_v43  ;;  %v3674_v57 = vshrl.u32 %v3515_v44, 16 }
 0x2fc   : > { %v3663_v18 = vrot.slane %v3661_v31, 1  ;;  %v3666_v39 = vrot.slane %v3664_v7, 2  ;;  %v4050_v2 = vsel %vm4038_vm8, %v4045_v26, %v4049_v19  ;;  %v3677_v13 = vshll.u32 %v3515_v44, 16 }
 0x2fd   : > { %4224 = vmatmul.mubr.bf16.vlgmr.msra.gmra.mrb[96].mxu0 %v4041_v60  ;;  %5367 = vmatpush3.bf16.msra.mxu1 %v7774_v38  ;;  %v4052_v38 = vsel %vm4038_vm8, %v4047_v0, %v8335_v14  ;;  %v3633_v16 = vsel %vm3548_vm1, %v3619_v5, %v3632_v34  ;;  %v3646_v23 = vsel %vm3548_vm1, %v3632_v34, %v3645_v37  ;;  %v3657_v35 = vrot.slane %v3501_v8, 2  ;;  %v8339_v60 = vld [vmem:[#allocation10_spill] sm:$0xff] }
 0x2fe   : > { %4231 = vmatprep.mubr.bf16.mxu0 %v4048_v21  ;;  %v3667_v30 = vor.u32 %v3666_v39, %v3663_v18  ;;  %v3676_v27 = vrot.slane %v3674_v57, 1  ;;  %v3679_v54 = vrot.slane %v3677_v13, 2  ;;  %v8338_v55 = vrot.slane %v8337_v50, 2 }
 0x2ff   : > { %v3658_v24 = vor.u32 %v3657_v35, %v3656_v53  ;;  %v3669_v5 = vrot.slane %v3513_v6, 1  ;;  %v3670_v51 = vrot.slane %v3509_v52, 2 }
 0x300   : > { %3861 = vmatmul.mubr.bf16.gmra.mrb[52].mxu1 %v3620_v4  ;;  %v3668_v59 = vsel %vm3548_vm1, %v3654_v63, %v3667_v30  ;;  %v4054_v0 = vsel %vm4038_vm8, %v4049_v19, %v8338_v55  ;;  %v3680_v17 = vor.u32 %v3679_v54, %v3676_v27 }
 0x301   : > { %3868 = vmatprep.mubr.bf16.mxu1 %v3642_v41  ;;  %v3659_v48 = vsel %vm3548_vm1, %v3645_v37, %v3658_v24  ;;  %v3671_v8 = vor.u32 %v3670_v51, %v3669_v5 }
 0x303   : > { %v3672_v46 = vsel %vm3548_vm1, %v3658_v24, %v3671_v8 }
 0x305   : > { %4232 = vmatmul.mubr.bf16.gmra.mrb[100].mxu0 %v4046_v36 }
 0x306   : > { %4239 = vmatprep.mubr.bf16.mxu0 %v4052_v38  ;;  %v8023_v38 = vld [vmem:[%s8284_s7] ss:$0 sm:$0xff] }
 0x308   : > { %3869 = vmatmul.mubr.bf16.gmra.mrb[56].mxu1 %v3633_v16 }
 0x309   : > { %3876 = vmatprep.mubr.bf16.mxu1 %v3655_v1 }
 0x30d   : > { %4240 = vmatmul.mubr.bf16.gmra.mrb[104].mxu0 %v4050_v2 }
 0x30e   : > { %4247 = vmatprep.mubr.bf16.mxu0 %v7805_v22  ;;  %v3681_v22 = vsel %vm3548_vm1, %v3667_v30, %v3680_v17 }
 0x310   : > { %3877 = vmatmul.mubr.bf16.gmra.mrb[60].mxu1 %v3646_v23 }
 0x311   : > { %3884 = vmatprep.mubr.bf16.mxu1 %v3668_v59 }
 0x315   : > { %4248 = vmatmul.mubr.bf16.gmra.mrb[108].mxu0 %v4054_v0 }
 0x316   : > { %4255 = vmatprep.mubr.bf16.mxu0 %v7839_v42 }
 0x318   : > { %3885 = vmatmul.mubr.bf16.gmra.mrb[64].mxu1 %v3659_v48 }
 0x319   : > { %3892 = vmatprep.mubr.bf16.mxu1 %v3681_v22 }
 0x31d   : > { %4256 = vmatmul.mubr.bf16.gmra.mrb[112].mxu0 %v8339_v60 }
 0x31e   : > { %4263 = vmatprep.mubr.bf16.mxu0 %v7865_v9 }
 0x320   : > { %3893 = vmatmul.mubr.bf16.gmra.mrb[68].mxu1 %v3672_v46 }
 0x321   : > { %4271 = vmatprep.mubr.bf16.mxu1 %v7875_v29 }
 0x325   : > { %4264 = vmatmul.mubr.bf16.gmra.mrb[116].mxu0 %v8340_v3 }
 0x328   : > { %4272 = vmatmul.mubr.bf16.vlgmr.msra.gmra.mrb[72].mxu1 %v7860_v20 }
 0x329   : > { %4279 = vmatprep.mubr.bf16.mxu1 %v7894_v25 }
 0x330   : > { %4280 = vmatmul.mubr.bf16.gmra.mrb[76].mxu1 %v7869_v15 }
 0x331   : > { %4287 = vmatprep.mubr.bf16.mxu1 %v7905_v10 }
 0x338   : > { %4288 = vmatmul.mubr.bf16.gmra.mrb[80].mxu1 %v7878_v33 }
 0x340   : > { %v4951_v42 = vpop.f32.mrb[24].mxu0 }
 0x341   : > { %v4952_v28 = vpop.f32.mrb[25].mxu0 }
 0x342   : > { %v4953_v52 = vadd.f32 %v4952_v28, %v4951_v42  ;;  %v4954_v49 = vpop.f32.mrb[26].mxu0 }
 0x343   : > { %v4955_v9 = vpop.f32.mrb[27].mxu0 }
 0x344   : > { %v4956_v21 = vadd.f32 %v4955_v9, %v4954_v49  ;;  %v5368_v19 = vadd.f32 %v4953_v52, %v8023_v38 }
 0x346   : > { %v5374_v37 = vadd.f32 %v4956_v21, %v8023_v38 }
 0x348   : > { %v4957_v11 = vpop.f32.mrb[28].mxu0 }
 0x349   : > { %v4958_v29 = vpop.f32.mrb[29].mxu0 }
 0x34a   : > { %v4959_v62 = vadd.f32 %v4958_v29, %v4957_v11  ;;  %v4960_v4 = vpop.f32.mrb[30].mxu0 }
 0x34b   : > { %v4961_v26 = vpop.f32.mrb[31].mxu0 }
 0x34c   : > { %v4962_v20 = vadd.f32 %v4961_v26, %v4960_v4  ;;  %v5380_v35 = vadd.f32 %v4959_v62, %v8023_v38 }
 0x34e   : > { %v5386_v0 = vadd.f32 %v4962_v20, %v8023_v38 }
 0x350   : > { %v4963_v45 = vpop.f32.mrb[32].mxu0 }
 0x351   : > { %v4964_v25 = vpop.f32.mrb[33].mxu0 }
 0x352   : > { %v4965_v32 = vadd.f32 %v4964_v25, %v4963_v45  ;;  %v4966_v15 = vpop.f32.mrb[34].mxu0 }
 0x353   : > { %v4967_v58 = vpop.f32.mrb[35].mxu0 }
 0x354   : > { %v4968_v10 = vadd.f32 %v4967_v58, %v4966_v15  ;;  %v5392_v60 = vadd.f32 %v4965_v32, %v8023_v38 }
 0x356   : > { %v5398_v9 = vadd.f32 %v4968_v10, %v8023_v38 }
 0x358   : > { %v4969_v41 = vpop.f32.mrb[36].mxu0 }
 0x359   : > { %v4970_v33 = vpop.f32.mrb[37].mxu0 }
 0x35a   : > { %v4971_v40 = vadd.f32 %v4970_v33, %v4969_v41  ;;  %v4972_v61 = vpop.f32.mrb[38].mxu0 }
 0x35b   : > { %v4973_v56 = vpop.f32.mrb[39].mxu0 }
 0x35c   : > { %v4974_v36 = vadd.f32 %v4973_v56, %v4972_v61  ;;  %v5404_v20 = vadd.f32 %v4971_v40, %v8023_v38 }
 0x35e   : > { %v5410_v33 = vadd.f32 %v4974_v36, %v8023_v38 }
 0x360   : > { %v4975_v34 = vpop.f32.mrb[40].mxu0 }
 0x361   : > { %v4976_v63 = vpop.f32.mrb[41].mxu0 }
 0x362   : > { %v8016_v31 = vadd.f32 %v4976_v63, %v4975_v34  ;;  %v4978_v7 = vpop.f32.mrb[42].mxu0 }
 0x363   : > { %v4979_v6 = vpop.f32.mrb[43].mxu0 }
 0x364   : > { %v8018_v14 = vadd.f32 %v4979_v6, %v4978_v7  ;;  %v5416_v40 = vadd.f32 %v8016_v31, %v8023_v38 }
 0x368   : > { %v4981_v16 = vpop.f32.mrb[44].mxu0 }
 0x369   : > { %v4982_v12 = vpop.f32.mrb[45].mxu0 }
 0x36a   : > { %v8026_v43 = vadd.f32 %v4982_v12, %v4981_v16  ;;  %v4984_v47 = vpop.f32.mrb[46].mxu0 }
 0x36b   : > { %v2979_v1 = vpop.f32.mrb[0].mxu1  ;;  %v4985_v18 = vpop.f32.mrb[47].mxu0 }
 0x36c   : > { %v5369_v39 = vadd.f32 %v5368_v19, %v2979_v1  ;;  %v5318_v44 = vpop.f32.mrb[1].mxu1  ;;  %v8029_v2 = vadd.f32 %v4985_v18, %v4984_v47 }
 0x36d   : > { %v2982_v30 = vpop.f32.mrb[2].mxu1  ;;  %v5422_v44 = vadd.f32 %v8018_v14, %v8023_v38 }
 0x36e   : > { %v5375_v57 = vadd.f32 %v5374_v37, %v2982_v30  ;;  %v5319_v13 = vpop.f32.mrb[3].mxu1 }
 0x370   : > { %v4987_v23 = vpop.f32.mrb[48].mxu0 }
 0x371   : > { %v4988_v53 = vpop.f32.mrb[49].mxu0 }
 0x372   : > { %v8032_v59 = vadd.f32 %v4988_v53, %v4987_v23  ;;  %v4990_v27 = vpop.f32.mrb[50].mxu0 }
 0x373   : > { %v2987_v54 = vpop.f32.mrb[4].mxu1  ;;  %v4991_v24 = vpop.f32.mrb[51].mxu0 }
 0x374   : > { %v5381_v50 = vadd.f32 %v5380_v35, %v2987_v54  ;;  %v5322_v55 = vpop.f32.mrb[5].mxu1  ;;  %v8035_v17 = vadd.f32 %v4991_v24, %v4990_v27 }
 0x375   : > { %v2990_v48 = vpop.f32.mrb[6].mxu1 }
 0x376   : > { %v5387_v5 = vadd.f32 %v5386_v0, %v2990_v48  ;;  %v5323_v51 = vpop.f32.mrb[7].mxu1 }
 0x378   : > { %v4993_v22 = vpop.f32.mrb[52].mxu0 }
 0x379   : > { %v4994_v8 = vpop.f32.mrb[53].mxu0 }
 0x37a   : > { %v8038_v46 = vadd.f32 %v4994_v8, %v4993_v22  ;;  %v4996_v3 = vpop.f32.mrb[54].mxu0 }
 0x37b   : > { %v2995_v42 = vpop.f32.mrb[8].mxu1  ;;  %v4997_v28 = vpop.f32.mrb[55].mxu0 }
 0x37c   : > { %v5393_v52 = vadd.f32 %v5392_v60, %v2995_v42  ;;  %v5326_v49 = vpop.f32.mrb[9].mxu1  ;;  %v8041_v21 = vadd.f32 %v4997_v28, %v4996_v3 }
 0x37d   : > { %v2998_v11 = vpop.f32.mrb[10].mxu1 }
 0x37e   : > { %v5399_v29 = vadd.f32 %v5398_v9, %v2998_v11  ;;  %v5327_v62 = vpop.f32.mrb[11].mxu1 }
 0x380   : > { %v4999_v4 = vpop.f32.mrb[56].mxu0 }
 0x381   : > { %v5000_v26 = vpop.f32.mrb[57].mxu0 }
 0x382   : > { %v8044_v45 = vadd.f32 %v5000_v26, %v4999_v4  ;;  %v5002_v25 = vpop.f32.mrb[58].mxu0 }
 0x383   : > { %v3003_v32 = vpop.f32.mrb[12].mxu1  ;;  %v5003_v15 = vpop.f32.mrb[59].mxu0 }
 0x384   : > { %v5405_v58 = vadd.f32 %v5404_v20, %v3003_v32  ;;  %v5330_v41 = vpop.f32.mrb[13].mxu1  ;;  %v8047_v61 = vadd.f32 %v5003_v15, %v5002_v25 }
 0x385   : > { %v3006_v10 = vpop.f32.mrb[14].mxu1 }
 0x386   : > { %v8049_v56 = vadd.f32 %v5410_v33, %v3006_v10  ;;  %v5331_v34 = vpop.f32.mrb[15].mxu1 }
 0x388   : > { %v5038_v63 = vpop.f32.mrb[60].mxu0 }
 0x389   : > { %v5039_v7 = vpop.f32.mrb[61].mxu0 }
 0x38a   : > { %v5040_v6 = vadd.f32 %v5039_v7, %v5038_v63  ;;  %v5041_v16 = vpop.f32.mrb[62].mxu0 }
 0x38b   : > { %v3011_v12 = vpop.f32.mrb[16].mxu1  ;;  %v5042_v19 = vpop.f32.mrb[63].mxu0 }
 0x38c   : > { %v8053_v47 = vadd.f32 %v5369_v39, %v5040_v6  ;;  %v8055_v1 = vadd.f32 %v5416_v40, %v3011_v12  ;;  %v5334_v36 = vpop.f32.mrb[17].mxu1  ;;  %v5043_v18 = vadd.f32 %v5042_v19, %v5041_v16  ;;  %v5428_v39 = vadd.f32 %v8026_v43, %v8023_v38 }
 0x38d   : > { %v3014_v37 = vpop.f32.mrb[18].mxu1  ;;  %v5440_v43 = vadd.f32 %v8032_v59, %v8023_v38  ;;  %v5452_v59 = vadd.f32 %v8038_v46, %v8023_v38 }
 0x38e   : > { %v8059_v30 = vadd.f32 %v5375_v57, %v5043_v18  ;;  %v8061_v13 = vadd.f32 %v5422_v44, %v3014_v37  ;;  %v5335_v23 = vpop.f32.mrb[19].mxu1  ;;  %v5434_v57 = vadd.f32 %v8029_v2, %v8023_v38  ;;  %v5446_v2 = vadd.f32 %v8035_v17, %v8023_v38 }
 0x38f   : > { %v5458_v17 = vadd.f32 %v8041_v21, %v8023_v38  ;;  %v5464_v44 = vadd.f32 %v8044_v45, %v8023_v38 }
 0x390   : > { %v5044_v53 = vpop.f32.mrb[64].mxu0 }
 0x391   : > { %v5045_v31 = vpop.f32.mrb[65].mxu0 }
 0x392   : > { %v5046_v35 = vadd.f32 %v5045_v31, %v5044_v53  ;;  %v5047_v27 = vpop.f32.mrb[66].mxu0 }
 0x393   : > { %v3019_v54 = vpop.f32.mrb[20].mxu1  ;;  %v5048_v24 = vpop.f32.mrb[67].mxu0 }
 0x394   : > { %v8065_v55 = vadd.f32 %v5381_v50, %v5046_v35  ;;  %v5429_v0 = vadd.f32 %v5428_v39, %v3019_v54  ;;  %v5338_v48 = vpop.f32.mrb[21].mxu1  ;;  %v5049_v14 = vadd.f32 %v5048_v24, %v5047_v27 }
 0x395   : > { %v3022_v51 = vpop.f32.mrb[22].mxu1 }
 0x396   : > { %v8069_v22 = vadd.f32 %v5387_v5, %v5049_v14  ;;  %v5435_v8 = vadd.f32 %v5434_v57, %v3022_v51  ;;  %v5339_v60 = vpop.f32.mrb[23].mxu1 }
 0x398   : > { %v5050_v3 = vpop.f32.mrb[68].mxu0 }
 0x399   : > { %v5051_v42 = vpop.f32.mrb[69].mxu0 }
 0x39a   : > { %v5052_v28 = vadd.f32 %v5051_v42, %v5050_v3  ;;  %v5053_v49 = vpop.f32.mrb[70].mxu0 }
 0x39b   : > { %v3027_v50 = vpop.f32.mrb[24].mxu1  ;;  %v5054_v9 = vpop.f32.mrb[71].mxu0 }
 0x39c   : > { %v8073_v11 = vadd.f32 %v5393_v52, %v5052_v28  ;;  %v5441_v62 = vadd.f32 %v5440_v43, %v3027_v50  ;;  %v5342_v4 = vpop.f32.mrb[25].mxu1  ;;  %v5055_v26 = vadd.f32 %v5054_v9, %v5053_v49 }
 0x39d   : > { %v3030_v5 = vpop.f32.mrb[26].mxu1 }
 0x39e   : > { %v8077_v20 = vadd.f32 %v5399_v29, %v5055_v26  ;;  %v5447_v25 = vadd.f32 %v5446_v2, %v3030_v5  ;;  %v5343_v32 = vpop.f32.mrb[27].mxu1 }
 0x3a0   : > { %v5056_v15 = vpop.f32.mrb[72].mxu0 }
 0x3a1   : > { %v5057_v41 = vpop.f32.mrb[73].mxu0 }
 0x3a2   : > { %v5058_v33 = vadd.f32 %v5057_v41, %v5056_v15  ;;  %v5059_v10 = vpop.f32.mrb[74].mxu0 }
 0x3a3   : > { %v3035_v52 = vpop.f32.mrb[28].mxu1  ;;  %v5060_v34 = vpop.f32.mrb[75].mxu0 }
 0x3a4   : > { %v8081_v63 = vadd.f32 %v5405_v58, %v5058_v33  ;;  %v5453_v7 = vadd.f32 %v5452_v59, %v3035_v52  ;;  %v5346_v6 = vpop.f32.mrb[29].mxu1  ;;  %v5061_v40 = vadd.f32 %v5060_v34, %v5059_v10 }
 0x3a5   : > { %v3038_v29 = vpop.f32.mrb[30].mxu1 }
 0x3a6   : > { %v8086_v16 = vadd.f32 %v8049_v56, %v5061_v40  ;;  %v5459_v12 = vadd.f32 %v5458_v17, %v3038_v29  ;;  %v5347_v19 = vpop.f32.mrb[31].mxu1  ;;  %v5470_v56 = vadd.f32 %v8047_v61, %v8023_v38 }
 0x3a8   : > { %v5062_v36 = vpop.f32.mrb[76].mxu0 }
 0x3a9   : > { %v5063_v18 = vpop.f32.mrb[77].mxu0 }
 0x3aa   : > { %v5064_v46 = vadd.f32 %v5063_v18, %v5062_v36  ;;  %v5065_v58 = vpop.f32.mrb[78].mxu0 }
 0x3ab   : > { %v3043_v37 = vpop.f32.mrb[32].mxu1  ;;  %v5066_v23 = vpop.f32.mrb[79].mxu0 }
 0x3ac   : > { %v8091_v53 = vadd.f32 %v8055_v1, %v5064_v46  ;;  %v5465_v31 = vadd.f32 %v5464_v44, %v3043_v37  ;;  %v5350_v21 = vpop.f32.mrb[33].mxu1  ;;  %v5067_v35 = vadd.f32 %v5066_v23, %v5065_v58 }
 0x3ad   : > { %v3046_v39 = vpop.f32.mrb[34].mxu1 }
 0x3ae   : > { %v8096_v27 = vadd.f32 %v8061_v13, %v5067_v35  ;;  %v5471_v54 = vadd.f32 %v5470_v56, %v3046_v39  ;;  %v5351_v24 = vpop.f32.mrb[35].mxu1 }
 0x3b0   : > { %v5068_v48 = vpop.f32.mrb[80].mxu0 }
 0x3b1   : > { %v5069_v45 = vpop.f32.mrb[81].mxu0 }
 0x3b2   : > { %v5070_v14 = vadd.f32 %v5069_v45, %v5068_v48  ;;  %v5071_v57 = vpop.f32.mrb[82].mxu0 }
 0x3b3   : > { %v5108_v51 = vpop.f32.mrb[36].mxu1  ;;  %v5072_v60 = vpop.f32.mrb[83].mxu0 }
 0x3b4   : > { %v8098_v1 = vadd.f32 %v5429_v0, %v5070_v14  ;;  %v5073_v3 = vadd.f32 %v5072_v60, %v5071_v57  ;;  %v5109_v42 = vpop.f32.mrb[37].mxu1 }
 0x3b5   : > { %v5110_v28 = vadd.f32 %v5109_v42, %v5108_v51  ;;  %v5111_v43 = vpop.f32.mrb[38].mxu1 }
 0x3b6   : > { %v8100_v49 = vadd.f32 %v5435_v8, %v5073_v3  ;;  %v5112_v38 = vpop.f32.mrb[39].mxu1 }
 0x3b7   : > { %v5371_v61 = vadd.f32 %v8053_v47, %v5110_v28  ;;  %v5113_v13 = vadd.f32 %v5112_v38, %v5111_v43 }
 0x3b8   : > { %v5074_v50 = vpop.f32.mrb[84].mxu0 }
 0x3b9   : > { %v5377_v9 = vadd.f32 %v8059_v30, %v5113_v13  ;;  %v5075_v4 = vpop.f32.mrb[85].mxu0 }
 0x3ba   : > { %v5076_v26 = vadd.f32 %v5075_v4, %v5074_v50  ;;  %v5077_v2 = vpop.f32.mrb[86].mxu0 }
 0x3bb   : > { %v5114_v5 = vpop.f32.mrb[40].mxu1  ;;  %v5078_v32 = vpop.f32.mrb[87].mxu0 }
 0x3bc   : > { %v8104_v0 = vadd.f32 %v5441_v62, %v5076_v26  ;;  %v5079_v15 = vadd.f32 %v5078_v32, %v5077_v2  ;;  %v5115_v41 = vpop.f32.mrb[41].mxu1 }
 0x3bd   : > { %v5116_v33 = vadd.f32 %v5115_v41, %v5114_v5  ;;  %v5117_v59 = vpop.f32.mrb[42].mxu1 }
 0x3be   : > { %v8106_v8 = vadd.f32 %v5447_v25, %v5079_v15  ;;  %v5118_v10 = vpop.f32.mrb[43].mxu1 }
 0x3bf   : > { %v8109_v47 = vadd.f32 %v8065_v55, %v5116_v33  ;;  %v5119_v52 = vadd.f32 %v5118_v10, %v5117_v59 }
 0x3c0   : > { %v5080_v34 = vpop.f32.mrb[88].mxu0 }
 0x3c1   : > { %v8112_v30 = vadd.f32 %v8069_v22, %v5119_v52  ;;  %v5081_v6 = vpop.f32.mrb[89].mxu0 }
 0x3c2   : > { %v5082_v40 = vadd.f32 %v5081_v6, %v5080_v34  ;;  %v5083_v17 = vpop.f32.mrb[90].mxu0 }
 0x3c3   : > { %v5120_v62 = vpop.f32.mrb[44].mxu1  ;;  %v5084_v29 = vpop.f32.mrb[91].mxu0 }
 0x3c4   : > { %v8114_v19 = vadd.f32 %v5453_v7, %v5082_v40  ;;  %v5085_v36 = vadd.f32 %v5084_v29, %v5083_v17  ;;  %v5121_v18 = vpop.f32.mrb[45].mxu1 }
 0x3c5   : > { %v5122_v25 = vadd.f32 %v5121_v18, %v5120_v62  ;;  %v5123_v46 = vpop.f32.mrb[46].mxu1 }
 0x3c6   : > { %v8116_v44 = vadd.f32 %v5459_v12, %v5085_v36  ;;  %v5124_v55 = vpop.f32.mrb[47].mxu1 }
 0x3c7   : > { %v8119_v58 = vadd.f32 %v8073_v11, %v5122_v25  ;;  %v5125_v37 = vadd.f32 %v5124_v55, %v5123_v46 }
 0x3c8   : > { %v5086_v22 = vpop.f32.mrb[92].mxu0 }
 0x3c9   : > { %v8122_v23 = vadd.f32 %v8077_v20, %v5125_v37  ;;  %v5087_v21 = vpop.f32.mrb[93].mxu0 }
 0x3ca   : > { %v5088_v35 = vadd.f32 %v5087_v21, %v5086_v22  ;;  %v5089_v56 = vpop.f32.mrb[94].mxu0 }
 0x3cb   : > { %v5126_v7 = vpop.f32.mrb[48].mxu1  ;;  %v5090_v39 = vpop.f32.mrb[95].mxu0 }
 0x3cc   : > { %v8124_v24 = vadd.f32 %v5465_v31, %v5088_v35  ;;  %v5091_v48 = vadd.f32 %v5090_v39, %v5089_v56  ;;  %v5127_v45 = vpop.f32.mrb[49].mxu1  ;;  %v8137_v31 = vld [vmem:[%s8281_s4] ss:$0 sm:$0xff] }
 0x3cd   : > { %v5128_v12 = vadd.f32 %v5127_v45, %v5126_v7  ;;  %v5129_v14 = vpop.f32.mrb[50].mxu1 }
 0x3ce   : > { %v8126_v57 = vadd.f32 %v5471_v54, %v5091_v48  ;;  %v5130_v11 = vpop.f32.mrb[51].mxu1 }
 0x3cf   : > { %v8129_v51 = vadd.f32 %v8081_v63, %v5128_v12  ;;  %v5131_v60 = vadd.f32 %v5130_v11, %v5129_v14 }
 0x3d0   : > { %v5178_v20 = vpop.f32.mrb[96].mxu0 }
 0x3d1   : > { %v8132_v3 = vadd.f32 %v8086_v16, %v5131_v60  ;;  %v5179_v42 = vpop.f32.mrb[97].mxu0 }
 0x3d2   : > { %v5180_v28 = vadd.f32 %v5179_v42, %v5178_v20  ;;  %v5181_v43 = vpop.f32.mrb[98].mxu0 }
 0x3d3   : > { %v5132_v38 = vpop.f32.mrb[52].mxu1  ;;  %v5182_v54 = vpop.f32.mrb[99].mxu0 }
 0x3d4   : > { %v5372_v13 = vadd.f32 %v5371_v61, %v5180_v28  ;;  %v5133_v50 = vpop.f32.mrb[53].mxu1  ;;  %v5183_v63 = vadd.f32 %v5182_v54, %v5181_v43 }
 0x3d5   : > { %v5134_v4 = vadd.f32 %v5133_v50, %v5132_v38  ;;  %v5135_v26 = vpop.f32.mrb[54].mxu1 }
 0x3d6   : > { %v5373_v2 = vadd.f32 %v5372_v13, %v8137_v31  ;;  %v5378_v16 = vadd.f32 %v5377_v9, %v5183_v63  ;;  %v5136_v5 = vpop.f32.mrb[55].mxu1 }
 0x3d7   : > { %v8141_v32 = vadd.f32 %v8091_v53, %v5134_v4  ;;  %v5137_v15 = vadd.f32 %v5136_v5, %v5135_v26 }
 0x3d8   : > { %v4357_v41 = vmax.f32 %v5373_v2, 0.0  ;;  %v5379_v33 = vadd.f32 %v5378_v16, %v8137_v31  ;;  %v5184_v59 = vpop.f32.mrb[100].mxu0 }
 0x3d9   : > { %v8145_v10 = vadd.f32 %v8096_v27, %v5137_v15  ;;  %v5185_v61 = vpop.f32.mrb[101].mxu0 }
 0x3da   : > { %4375 = vst [vmem:[%s7219_s21] sm:$0xff] %v4357_v41  ;;  %v4358_v52 = vmax.f32 %v5379_v33, 0.0  ;;  %v5186_v34 = vadd.f32 %v5185_v61, %v5184_v59  ;;  %v5187_v6 = vpop.f32.mrb[102].mxu0 }
 0x3db   : > { %v5138_v40 = vpop.f32.mrb[56].mxu1  ;;  %v5188_v17 = vpop.f32.mrb[103].mxu0 }
 0x3dc   : > { %4376 = vst [vmem:[%s7219_s21 + $0x8] sm:$0xff] %v4358_v52  ;;  %v5384_v53 = vadd.f32 %v8109_v47, %v5186_v34  ;;  %v5139_v9 = vpop.f32.mrb[57].mxu1  ;;  %v5189_v62 = vadd.f32 %v5188_v17, %v5187_v6 }
 0x3dd   : > { %v5140_v29 = vadd.f32 %v5139_v9, %v5138_v40  ;;  %v5141_v36 = vpop.f32.mrb[58].mxu1 }
 0x3de   : > { %v5385_v18 = vadd.f32 %v5384_v53, %v8137_v31  ;;  %v5390_v27 = vadd.f32 %v8112_v30, %v5189_v62  ;;  %v5142_v25 = vpop.f32.mrb[59].mxu1 }
 0x3df   : > { %v8153_v46 = vadd.f32 %v8098_v1, %v5140_v29  ;;  %v5143_v55 = vadd.f32 %v5142_v25, %v5141_v36 }
 0x3e0   : > { %v4359_v37 = vmax.f32 %v5385_v18, 0.0  ;;  %v5391_v22 = vadd.f32 %v5390_v27, %v8137_v31  ;;  %v5190_v21 = vpop.f32.mrb[104].mxu0 }
 0x3e1   : > { %v8157_v47 = vadd.f32 %v8100_v49, %v5143_v55  ;;  %v5191_v35 = vpop.f32.mrb[105].mxu0 }
 0x3e2   : > { %4377 = vst [vmem:[%s7219_s21 + $0x10] sm:$0xff] %v4359_v37  ;;  %v4360_v56 = vmax.f32 %v5391_v22, 0.0  ;;  %v5192_v7 = vadd.f32 %v5191_v35, %v5190_v21  ;;  %v5193_v39 = vpop.f32.mrb[106].mxu0 }
 0x3e3   : > { %v5144_v48 = vpop.f32.mrb[60].mxu1  ;;  %v5194_v45 = vpop.f32.mrb[107].mxu0 }
 0x3e4   : > { %4378 = vst [vmem:[%s7219_s21 + $0x18] sm:$0xff] %v4360_v56  ;;  %v5396_v1 = vadd.f32 %v8119_v58, %v5192_v7  ;;  %v5145_v30 = vpop.f32.mrb[61].mxu1  ;;  %v5195_v12 = vadd.f32 %v5194_v45, %v5193_v39 }
 0x3e5   : > { %v5146_v14 = vadd.f32 %v5145_v30, %v5144_v48  ;;  %v5147_v11 = vpop.f32.mrb[62].mxu1 }
 0x3e6   : > { %v5397_v60 = vadd.f32 %v5396_v1, %v8137_v31  ;;  %v5402_v49 = vadd.f32 %v8122_v23, %v5195_v12  ;;  %v5148_v20 = vpop.f32.mrb[63].mxu1 }
 0x3e7   : > { %v8165_v42 = vadd.f32 %v8104_v0, %v5146_v14  ;;  %v5149_v28 = vadd.f32 %v5148_v20, %v5147_v11 }
 0x3e8   : > { %v4361_v43 = vmax.f32 %v5397_v60, 0.0  ;;  %v5403_v38 = vadd.f32 %v5402_v49, %v8137_v31  ;;  %v5196_v54 = vpop.f32.mrb[108].mxu0 }
 0x3e9   : > { %v8169_v58 = vadd.f32 %v8106_v8, %v5149_v28  ;;  %v5197_v13 = vpop.f32.mrb[109].mxu0 }
 0x3ea   : > { %4379 = vst [vmem:[%s7219_s21 + $0x20] sm:$0xff] %v4361_v43  ;;  %v4362_v50 = vmax.f32 %v5403_v38, 0.0  ;;  %v5198_v63 = vadd.f32 %v5197_v13, %v5196_v54  ;;  %v5199_v4 = vpop.f32.mrb[110].mxu0 }
 0x3eb   : > { %v5150_v26 = vpop.f32.mrb[64].mxu1  ;;  %v5200_v2 = vpop.f32.mrb[111].mxu0 }
 0x3ec   : > { %4380 = vst [vmem:[%s7219_s21 + $0x28] sm:$0xff] %v4362_v50  ;;  %v5408_v0 = vadd.f32 %v8129_v51, %v5198_v63  ;;  %v5151_v23 = vpop.f32.mrb[65].mxu1  ;;  %v5201_v16 = vadd.f32 %v5200_v2, %v5199_v4 }
 0x3ed   : > { %v5152_v5 = vadd.f32 %v5151_v23, %v5150_v26  ;;  %v5153_v15 = vpop.f32.mrb[66].mxu1 }
 0x3ee   : > { %v5409_v41 = vadd.f32 %v5408_v0, %v8137_v31  ;;  %v5414_v8 = vadd.f32 %v8132_v3, %v5201_v16  ;;  %v5154_v33 = vpop.f32.mrb[67].mxu1 }
 0x3ef   : > { %v8177_v59 = vadd.f32 %v8114_v19, %v5152_v5  ;;  %v5155_v61 = vadd.f32 %v5154_v33, %v5153_v15 }
 0x3f0   : > { %v4363_v52 = vmax.f32 %v5409_v41, 0.0  ;;  %v5415_v34 = vadd.f32 %v5414_v8, %v8137_v31  ;;  %v5202_v6 = vpop.f32.mrb[112].mxu0 }
 0x3f1   : > { %v5461_v51 = vadd.f32 %v8116_v44, %v5155_v61  ;;  %v5203_v40 = vpop.f32.mrb[113].mxu0 }
 0x3f2   : > { %4381 = vst [vmem:[%s7219_s21 + $0x30] sm:$0xff] %v4363_v52  ;;  %v4364_v17 = vmax.f32 %v5415_v34, 0.0  ;;  %v5204_v53 = vadd.f32 %v5203_v40, %v5202_v6  ;;  %v5205_v9 = vpop.f32.mrb[114].mxu0 }
 0x3f3   : > { %v5156_v62 = vpop.f32.mrb[68].mxu1  ;;  %v5206_v29 = vpop.f32.mrb[115].mxu0 }
 0x3f4   : > { %4382 = vst [vmem:[%s7219_s21 + $0x38] sm:$0xff] %v4364_v17  ;;  %v5420_v3 = vadd.f32 %v8141_v32, %v5204_v53  ;;  %v5157_v19 = vpop.f32.mrb[69].mxu1  ;;  %v5207_v36 = vadd.f32 %v5206_v29, %v5205_v9 }
 0x3f5   : > { %v5158_v18 = vadd.f32 %v5157_v19, %v5156_v62  ;;  %v5159_v27 = vpop.f32.mrb[70].mxu1 }
 0x3f6   : > { %v5421_v25 = vadd.f32 %v5420_v3, %v8137_v31  ;;  %v5426_v44 = vadd.f32 %v8145_v10, %v5207_v36  ;;  %v5160_v55 = vpop.f32.mrb[71].mxu1 }
 0x3f7   : > { %v5467_v37 = vadd.f32 %v8124_v24, %v5158_v18  ;;  %v5161_v22 = vadd.f32 %v5160_v55, %v5159_v27 }
 0x3f8   : > { %v4365_v21 = vmax.f32 %v5421_v25, 0.0  ;;  %v5427_v35 = vadd.f32 %v5426_v44, %v8137_v31  ;;  %v5208_v56 = vpop.f32.mrb[116].mxu0 }
 0x3f9   : > { %v5473_v7 = vadd.f32 %v8126_v57, %v5161_v22  ;;  %v5209_v32 = vpop.f32.mrb[117].mxu0 }
 0x3fa   : > { %4383 = vst [vmem:[%s7219_s21 + $0x40] sm:$0xff] %v4365_v21  ;;  %v4366_v39 = vmax.f32 %v5427_v35, 0.0  ;;  %v5210_v48 = vadd.f32 %v5209_v32, %v5208_v56  ;;  %v5211_v45 = vpop.f32.mrb[118].mxu0 }
 0x3fb   : > { %v5214_v1 = vpop.f32.mrb[72].mxu1  ;;  %v5212_v30 = vpop.f32.mrb[119].mxu0 }
 0x3fc   : > { %4384 = vst [vmem:[%s7219_s21 + $0x48] sm:$0xff] %v4366_v39  ;;  %v5432_v10 = vadd.f32 %v8153_v46, %v5210_v48  ;;  %v5213_v12 = vadd.f32 %v5212_v30, %v5211_v45  ;;  %v5215_v24 = vpop.f32.mrb[73].mxu1 }
 0x3fd   : > { %v5216_v14 = vadd.f32 %v5215_v24, %v5214_v1  ;;  %v5217_v11 = vpop.f32.mrb[74].mxu1 }
 0x3fe   : > { %v5433_v60 = vadd.f32 %v5432_v10, %v8137_v31  ;;  %v5438_v57 = vadd.f32 %v8157_v47, %v5213_v12  ;;  %v5218_v49 = vpop.f32.mrb[75].mxu1 }
 0x3ff   : > { %v5444_v20 = vadd.f32 %v8165_v42, %v5216_v14  ;;  %v5219_v28 = vadd.f32 %v5218_v49, %v5217_v11 }
 0x400   : > { %v4367_v43 = vmax.f32 %v5433_v60, 0.0  ;;  %v5439_v38 = vadd.f32 %v5438_v57, %v8137_v31 }
 0x401   : > { %v5445_v46 = vadd.f32 %v5444_v20, %v8137_v31  ;;  %v5450_v54 = vadd.f32 %v8169_v58, %v5219_v28 }
 0x402   : > { %4385 = vst [vmem:[%s7219_s21 + $0x50] sm:$0xff] %v4367_v43  ;;  %v4368_v13 = vmax.f32 %v5439_v38, 0.0 }
 0x403   : > { %v4369_v50 = vmax.f32 %v5445_v46, 0.0  ;;  %v5451_v63 = vadd.f32 %v5450_v54, %v8137_v31  ;;  %v5220_v47 = vpop.f32.mrb[76].mxu1 }
 0x404   : > { %4386 = vst [vmem:[%s7219_s21 + $0x58] sm:$0xff] %v4368_v13  ;;  %v5221_v4 = vpop.f32.mrb[77].mxu1 }
 0x405   : > { %4387 = vst [vmem:[%s7219_s21 + $0x60] sm:$0xff] %v4369_v50  ;;  %v4370_v42 = vmax.f32 %v5451_v63, 0.0  ;;  %v5222_v26 = vadd.f32 %v5221_v4, %v5220_v47  ;;  %v5223_v2 = vpop.f32.mrb[78].mxu1 }
 0x406   : > { %v5224_v0 = vpop.f32.mrb[79].mxu1 }
 0x407   : > { %4388 = vst [vmem:[%s7219_s21 + $0x68] sm:$0xff] %v4370_v42  ;;  %v5456_v23 = vadd.f32 %v8177_v59, %v5222_v26  ;;  %v5225_v58 = vadd.f32 %v5224_v0, %v5223_v2 }
 0x409   : > { %v5457_v16 = vadd.f32 %v5456_v23, %v8137_v31  ;;  %v5462_v5 = vadd.f32 %v5461_v51, %v5225_v58 }
 0x40b   : > { %v4371_v15 = vmax.f32 %v5457_v16, 0.0  ;;  %v5463_v41 = vadd.f32 %v5462_v5, %v8137_v31  ;;  %v5226_v8 = vpop.f32.mrb[80].mxu1 }
 0x40c   : > { %v5227_v33 = vpop.f32.mrb[81].mxu1 }
 0x40d   : > { %4389 = vst [vmem:[%s7219_s21 + $0x70] sm:$0xff] %v4371_v15  ;;  %v4372_v61 = vmax.f32 %v5463_v41, 0.0  ;;  %v5228_v52 = vadd.f32 %v5227_v33, %v5226_v8  ;;  %v5229_v34 = vpop.f32.mrb[82].mxu1 }
 0x40e   : > { %v5230_v59 = vpop.f32.mrb[83].mxu1 }
 0x40f   : > { %4390 = vst [vmem:[%s7219_s21 + $0x78] sm:$0xff] %v4372_v61  ;;  %v5468_v6 = vadd.f32 %v5467_v37, %v5228_v52  ;;  %v5231_v51 = vadd.f32 %v5230_v59, %v5229_v34 }
 0x411   : > { %v5469_v40 = vadd.f32 %v5468_v6, %v8137_v31  ;;  %v5474_v17 = vadd.f32 %v5473_v7, %v5231_v51 }
 0x413   : > { %v4373_v53 = vmax.f32 %v5469_v40, 0.0  ;;  %v5475_v9 = vadd.f32 %v5474_v17, %v8137_v31 }
 0x415   : > { %4391 = vst [vmem:[%s7219_s21 + $0x80] sm:$0xff] %v4373_v53  ;;  %v4374_v62 = vmax.f32 %v5475_v9, 0.0 }
 0x417   : > { %4392 = vst [vmem:[%s7219_s21 + $0x88] sm:$0xff] %v4374_v62 }
 0x418   : > { %6166 = shalt.err (!%p6163_p9)
}
 0x419   : > { %s6167_s24 = scalar_lea.hbm %s8216_s17, 2304  ;;  %s6171_s30 = scalar_lea.hbm %s8285_s8, 9216 }
 0x41a   : > { %p6168_p10 = scmp.ne.s32.totalorder %s8216_s17, %s6167_s24  ;;  %p6172_p13 = scmp.lt.u32.totalorder %s8216_s17, %s8285_s8 }
 0x41b   : > { %p6173_p0 = scmp.lt.u32.totalorder %s6171_s30, %s6167_s24  ;;  %p6175_p2 = scmp.lt.u32.totalorder %s6167_s24, %s8216_s17 }
 0x41c   : > { %p6169_p11 = pnand %p6168_p10, %p6360_p3 }
 0x41d   : > { %p6174_p1 = por %p6173_p0, %p6172_p13 }
 0x41e   : > { %p6170_p12 = pneg %p6169_p11 }
 0x41f   : > { %p6176_p4 = por %p6175_p2, %p6174_p1 }
 0x421   : > { %p6177_p5 = pnand %p6176_p4, %p6170_p12 }
 0x423   : > { %6180 = shalt.err (!%p6177_p5)
}
 0x424   : > { %s6263_s22 = smov 128   ;;  %s8341_s13 = smov 8  }
 0x425   : > { %5516 = dma.vmem_to_hbm [thread:$0]  (%p6360_p3), %s8219_s9, 2304, %s8216_s17, %s8224_s15, %s6263_s22, %s6263_s22, %s8341_s13  }
 0x426 PF: > { %p5522_p6 = scmp.ge.s32.totalorder %s6247_s12, 2  ;;  %s4424_s14 = sand.u32 1, %s6219_s27  }
 0x427   : > { %s4425_s20 = scalar_lea.sflag [#allocation4], %s4424_s14 }
 0x428   : > { %p5519_p7 = pnand %p5522_p6, %p6369_p8 }
 0x42a   : > { %6214 = dma.done.wait (!%p5519_p7), %s4425_s20, 2304  }
 0x42b   : > { %6216 = vsyncadd (!%p5519_p7), %s4425_s20, 4294964992  ;;  %s21_s12 = sadd.s32 1, %s6247_s12   ;;  %s8342_s30 = sld [smem:[#allocation6_spill]] }
 0x42c   : > { %p18_p9 = scmp.ge.s32.totalorder %s21_s12, 6   ;;  %s8343_s10 = sld [smem:[#allocation7_spill]] }
 0x42d   : > { %s8344_s27 = smov %s6223_s28  ;;  %s8345_s28 = smov %s6227_s29 }
 0x42e   : > { %s8346_s29 = smov %s6378_s23  ;;  %s8347_s9 = smov %s6243_s11 }
 0x42f   : > { %s8348_s11 = smov %s8354_s16  ;;  %20 = sbr.rel (!%p18_p9) target bundleno = 5 (0x5), region = 105 }
 0x436   :  { %4430 = vsyncpa [#allocation4], 1 }
 0x437   :  { %4432 = vsyncpa [#allocation4 + $0x1], 1 }

</bundles_post_ra>
